<compile_context>
chip_gen: v5e
topology: v5e:2x2
jax: 0.10.0
libtpu: 0.0.40
codegen_flags: <defaults>
</compile_context>

<pallas_src>
import jax
import jax.numpy as jnp
import numpy as np
from jax import lax
from jax.experimental import pallas as pl
from jax.experimental.pallas import tpu as pltpu


# ----------------------------- Pallas kernel ------------------------------ #
def _lstm_layer_kernel(x_ref, wih_ref, whh_ref, b_ref,
                       seq_ref, h_out_ref, c_out_ref,
                       h_scr, c_scr):
    """One LSTM layer, T timesteps per grid step. Grid axis = time blocks (sequential).

    x_ref:   (B, T, in_dim)   current block of the input sequence
    seq_ref: (B, T, H)        per-step hidden outputs (input of the next layer)
    h/c_out: (B, H)           final state, written only on the last grid step
    h/c_scr: (B, H) VMEM      recurrent carry across grid steps
    """
    tb = pl.program_id(0)
    B, T, E = x_ref.shape
    H = h_scr.shape[-1]

    @pl.when(tb == 0)
    def _init():
        h_scr[...] = jnp.zeros_like(h_scr)
        c_scr[...] = jnp.zeros_like(c_scr)

    wih = wih_ref[...]          # (E, 4H)
    whh = whh_ref[...]          # (H, 4H)
    bias = b_ref[...]           # (1, 4H)

    # Hoisted input projection: one GEMM for all T timesteps of this block.
    x_blk = x_ref[...].reshape(B * T, E)                                   # (B*T, E)
    xg = (jnp.dot(x_blk, wih, preferred_element_type=jnp.float32) + bias)  # (B*T, 4H)
    xg = xg.reshape(B, T, 4 * H)

    h = h_scr[...]              # (B, H)
    c = c_scr[...]              # (B, H)

    # Static unroll over the T in-block timesteps (T is small and compile-time known);
    # only the (B,H)x(H,4H) recurrent matmul remains on the per-step critical chain.
    for t in range(T):
        gates = xg[:, t, :] + jnp.dot(h, whh, preferred_element_type=jnp.float32)  # (B, 4H)
        i_g = jax.nn.sigmoid(gates[:, 0 * H:1 * H])
        f_g = jax.nn.sigmoid(gates[:, 1 * H:2 * H])
        g_g = jnp.tanh(gates[:, 2 * H:3 * H])
        o_g = jax.nn.sigmoid(gates[:, 3 * H:4 * H])
        c = f_g * c + i_g * g_g
        h = o_g * jnp.tanh(c)
        seq_ref[:, t, :] = h

    h_scr[...] = h
    c_scr[...] = c

    # Final states written only once, on the last time block (saves 2 vst / step).
    @pl.when(tb == pl.num_programs(0) - 1)
    def _final():
        h_out_ref[...] = h
        c_out_ref[...] = c


def _pick_time_block(S, max_T=8):
    """Largest T <= max_T with S % T == 0 and (T % 8 == 0 or T == S)."""
    for T in range(min(S, max_T), 0, -1):
        if S % T == 0 and (T % 8 == 0 or T == S):
            return T
    return S


def lstm_layer_pallas(x_bse, wih_t, whh_t, b, *, max_time_block=8):
    """x_bse: (B, S, in_dim) f32.  Returns (seq_out (B,S,H), h_final (B,H), c_final (B,H))."""
    B, S, E = x_bse.shape
    H = whh_t.shape[0]
    T = _pick_time_block(S, max_time_block)

    out_shape = (
        jax.ShapeDtypeStruct((B, S, H), jnp.float32),
        jax.ShapeDtypeStruct((B, H), jnp.float32),
        jax.ShapeDtypeStruct((B, H), jnp.float32),
    )
    return pl.pallas_call(
        _lstm_layer_kernel,
        out_shape=out_shape,
        grid_spec=pltpu.PrefetchScalarGridSpec(
            num_scalar_prefetch=0,
            grid=(S // T,),
            in_specs=[
                pl.BlockSpec((B, T, E), lambda tb: (0, tb, 0)),     # x block (T steps)
                pl.BlockSpec((E, 4 * H), lambda tb: (0, 0)),        # W_ih^T (whole, invariant)
                pl.BlockSpec((H, 4 * H), lambda tb: (0, 0)),        # W_hh^T (whole, invariant)
                pl.BlockSpec((1, 4 * H), lambda tb: (0, 0)),        # bias
            ],
            out_specs=[
                pl.BlockSpec((B, T, H), lambda tb: (0, tb, 0)),     # per-step hidden outputs
                pl.BlockSpec((B, H), lambda tb: (0, 0)),            # final h (resident)
                pl.BlockSpec((B, H), lambda tb: (0, 0)),            # final c (resident)
            ],
            scratch_shapes=[
                pltpu.VMEM((B, H), jnp.float32),                    # h carry
                pltpu.VMEM((B, H), jnp.float32),                    # c carry
            ],
        ),
        compiler_params=pltpu.CompilerParams(
            dimension_semantics=("arbitrary",)),                    # time is sequential
    )(x_bse, wih_t, whh_t, b)


# --------------------------- Encoder (wrapper) ----------------------------- #
def init_encoder_params(key, input_size, embedding_dim, hidden_dim, num_layers,
                        padding_idx):
    keys = jax.random.split(key, 1 + 4 * num_layers)
    emb = 0.1 * jax.random.normal(keys[0], (input_size, embedding_dim), jnp.float32)
    emb = emb.at[padding_idx].set(0.0)   # nn.Embedding padding_idx row is zero

    layers = []
    bound = 1.0 / np.sqrt(hidden_dim)
    for l in range(num_layers):
        in_dim = embedding_dim if l == 0 else hidden_dim
        k0, k1, k2, k3 = keys[1 + 4 * l:1 + 4 * (l + 1)]
        w_ih = jax.random.uniform(k0, (4 * hidden_dim, in_dim), jnp.float32, -bound, bound)
        w_hh = jax.random.uniform(k1, (4 * hidden_dim, hidden_dim), jnp.float32, -bound, bound)
        b_ih = jax.random.uniform(k2, (4 * hidden_dim,), jnp.float32, -bound, bound)
        b_hh = jax.random.uniform(k3, (4 * hidden_dim,), jnp.float32, -bound, bound)
        layers.append({
            "wih_t": w_ih.T,                                # (in_dim, 4H)
            "whh_t": w_hh.T,                                # (H, 4H)
            "b": (b_ih + b_hh).reshape(1, 4 * hidden_dim),  # combined bias
        })
    return {"embedding": emb, "layers": layers}


@jax.jit
def encoder_forward(params, x_ids):
    """x_ids: (B, S) int32.  Returns (hidden, cell): each (num_layers, B, H)."""
    # Embedding lookup (gather) + eval-mode dropout (identity) -- plain-JAX glue.
    x = jnp.take(params["embedding"], x_ids, axis=0)        # (B, S, E), batch-major

    hs, cs = [], []
    for layer in params["layers"]:
        x, h_f, c_f = lstm_layer_pallas(x, layer["wih_t"], layer["whh_t"], layer["b"])
        hs.append(h_f)
        cs.append(c_f)
    return jnp.stack(hs, axis=0), jnp.stack(cs, axis=0)


# --------------------------- pure-JAX reference ----------------------------- #
def encoder_reference(params, x_ids):
    emb = jnp.take(params["embedding"], x_ids, axis=0)       # (B, S, E)
    x = jnp.transpose(emb, (1, 0, 2))                        # (S, B, E)
    S, B, _ = x.shape
    H = params["layers"][0]["whh_t"].shape[0]
    hs, cs = [], []
    for layer in params["layers"]:
        def step(carry, x_t, layer=layer):
            h, c = carry
            gates = x_t @ layer["wih_t"] + h @ layer["whh_t"] + layer["b"]
            i = jax.nn.sigmoid(gates[:, 0 * H:1 * H])
            f = jax.nn.sigmoid(gates[:, 1 * H:2 * H])
            g = jnp.tanh(gates[:, 2 * H:3 * H])
            o = jax.nn.sigmoid(gates[:, 3 * H:4 * H])
            c_new = f * c + i * g
            h_new = o * jnp.tanh(c_new)
            return (h_new, c_new), h_new
        (h_f, c_f), seq = lax.scan(step, (jnp.zeros((B, H)), jnp.zeros((B, H))), x)
        x = seq
        hs.append(h_f)
        cs.append(c_f)
    return jnp.stack(hs, axis=0), jnp.stack(cs, axis=0)


if __name__ == "__main__":
    # Encoder(input_size=16, embedding_dim=32, hidden_dim=32, num_layers=2,
    #         dropout=0.1, padding_idx=0)
    input_size, embedding_dim, hidden_dim, num_layers, padding_idx = 16, 32, 32, 2, 0
    B, S = 2, 16   # S=16 with T=8 -> 2 time blocks: exercises init/carry/finalize paths

    key = jax.random.PRNGKey(0)
    pkey, xkey = jax.random.split(key)
    params = init_encoder_params(pkey, input_size, embedding_dim, hidden_dim,
                                 num_layers, padding_idx)
    x_ids = jax.random.randint(xkey, (B, S), 0, input_size, dtype=jnp.int32)

    hidden, cell = encoder_forward(params, x_ids)
    jax.block_until_ready((hidden, cell))

    h_ref, c_ref = encoder_reference(params, x_ids)
    np.testing.assert_allclose(np.asarray(hidden), np.asarray(h_ref), rtol=2e-3, atol=2e-3)
    np.testing.assert_allclose(np.asarray(cell), np.asarray(c_ref), rtol=2e-3, atol=2e-3)
    assert hidden.shape == (num_layers, B, hidden_dim)
    assert cell.shape == (num_layers, B, hidden_dim)

    print("KERNEL_OK")
</pallas_src>

<mosaic_0001>
module attributes {stable_mosaic.version = 11 : i64} {
  func.func @_lstm_layer_kernel(%arg0: i32, %arg1: memref<2x8x32xf32, #tpu.memory_space<vmem>>, %arg2: memref<32x128xf32, #tpu.memory_space<vmem>>, %arg3: memref<32x128xf32, #tpu.memory_space<vmem>>, %arg4: memref<1x128xf32, #tpu.memory_space<vmem>>, %arg5: memref<2x8x32xf32, #tpu.memory_space<vmem>>, %arg6: memref<2x32xf32, #tpu.memory_space<vmem>>, %arg7: memref<2x32xf32, #tpu.memory_space<vmem>>, %arg8: memref<2x32xf32, #tpu.memory_space<vmem>>, %arg9: memref<2x32xf32, #tpu.memory_space<vmem>>) attributes {dimension_semantics = [#tpu.dimension_semantics<arbitrary>], iteration_bounds = array<i64: 2>, scalar_prefetch = 0 : i64, scratch_operands = 2 : i64, tpu.core_type = #tpu.core_type<tc>, window_params = [{transform_indices = @transform_0, window_bounds = array<i64: 2, 8, 32>}, {pipeline_mode = #tpu.pipeline_mode<synchronous>, transform_indices = @transform_1, window_bounds = array<i64: 32, 128>}, {pipeline_mode = #tpu.pipeline_mode<synchronous>, transform_indices = @transform_2, window_bounds = array<i64: 32, 128>}, {pipeline_mode = #tpu.pipeline_mode<synchronous>, transform_indices = @transform_3, window_bounds = array<i64: 1, 128>}, {transform_indices = @transform_4, window_bounds = array<i64: 2, 8, 32>}, {pipeline_mode = #tpu.pipeline_mode<synchronous>, transform_indices = @transform_5, window_bounds = array<i64: 2, 32>}, {pipeline_mode = #tpu.pipeline_mode<synchronous>, transform_indices = @transform_6, window_bounds = array<i64: 2, 32>}]} {
    %c0_i32 = arith.constant 0 : i32
    %0 = arith.cmpi eq, %arg0, %c0_i32 : i32
    %1 = arith.extui %0 : i1 to i32
    %c0_i32_0 = arith.constant 0 : i32
    %2 = arith.cmpi ne, %1, %c0_i32_0 : i32
    scf.if %2 {
      %cst_67 = arith.constant 0.000000e+00 : f32
      %275 = vector.broadcast %cst_67 : f32 to vector<2x32xf32>
      %c0_68 = arith.constant 0 : index
      %c0_69 = arith.constant 0 : index
      %276 = vector.load %arg8[%c0_68, %c0_69] : memref<2x32xf32, #tpu.memory_space<vmem>>, vector<2x32xf32>
      tpu.vector_store %arg8[%c0_68, %c0_69], %275 {strides = array<i32>} : memref<2x32xf32, #tpu.memory_space<vmem>>, vector<2x32xf32>,
      %cst_70 = arith.constant 0.000000e+00 : f32
      %277 = vector.broadcast %cst_70 : f32 to vector<2x32xf32>
      %c0_71 = arith.constant 0 : index
      %c0_72 = arith.constant 0 : index
      %278 = vector.load %arg9[%c0_71, %c0_72] : memref<2x32xf32, #tpu.memory_space<vmem>>, vector<2x32xf32>
      tpu.vector_store %arg9[%c0_71, %c0_72], %277 {strides = array<i32>} : memref<2x32xf32, #tpu.memory_space<vmem>>, vector<2x32xf32>,
    } else {
    }
    %c0 = arith.constant 0 : index
    %c0_1 = arith.constant 0 : index
    %3 = vector.load %arg2[%c0, %c0_1] : memref<32x128xf32, #tpu.memory_space<vmem>>, vector<32x128xf32>
    %c0_2 = arith.constant 0 : index
    %c0_3 = arith.constant 0 : index
    %4 = vector.load %arg3[%c0_2, %c0_3] : memref<32x128xf32, #tpu.memory_space<vmem>>, vector<32x128xf32>
    %c0_4 = arith.constant 0 : index
    %c0_5 = arith.constant 0 : index
    %5 = vector.load %arg4[%c0_4, %c0_5] : memref<1x128xf32, #tpu.memory_space<vmem>>, vector<1x128xf32>
    %c0_6 = arith.constant 0 : index
    %c0_7 = arith.constant 0 : index
    %c0_8 = arith.constant 0 : index
    %6 = vector.load %arg1[%c0_6, %c0_7, %c0_8] : memref<2x8x32xf32, #tpu.memory_space<vmem>>, vector<2x8x32xf32>
    %7 = vector.shape_cast %6 : vector<2x8x32xf32> to vector<16x32xf32>
    %cst = arith.constant dense<0.000000e+00> : vector<16x128xf32>
    %8 = tpu.matmul %7, %3, %cst {dimension_numbers = #tpu.dot_dimension_numbers<[1], [0], [0], [1], [0, 0, 1, 1], [], []>} : vector<16x32xf32>, vector<32x128xf32>, vector<16x128xf32> -> vector<16x128xf32>
    %9 = vector.broadcast %5 : vector<1x128xf32> to vector<16x128xf32>
    %10 = arith.addf %8, %9 : vector<16x128xf32>
    %11 = vector.shape_cast %10 : vector<16x128xf32> to vector<2x8x128xf32>
    %c0_9 = arith.constant 0 : index
    %c0_10 = arith.constant 0 : index
    %12 = vector.load %arg8[%c0_9, %c0_10] : memref<2x32xf32, #tpu.memory_space<vmem>>, vector<2x32xf32>
    %c0_11 = arith.constant 0 : index
    %c0_12 = arith.constant 0 : index
    %13 = vector.load %arg9[%c0_11, %c0_12] : memref<2x32xf32, #tpu.memory_space<vmem>>, vector<2x32xf32>
    %14 = vector.extract_strided_slice %11 {offsets = [0, 0, 0], sizes = [2, 1, 128], strides = [1, 1, 1]} : vector<2x8x128xf32> to vector<2x1x128xf32>
    %15 = vector.shape_cast %14 : vector<2x1x128xf32> to vector<2x128xf32>
    %cst_13 = arith.constant dense<0.000000e+00> : vector<2x128xf32>
    %16 = tpu.matmul %12, %4, %cst_13 {dimension_numbers = #tpu.dot_dimension_numbers<[1], [0], [0], [1], [0, 0, 1, 1], [], []>} : vector<2x32xf32>, vector<32x128xf32>, vector<2x128xf32> -> vector<2x128xf32>
    %17 = arith.addf %15, %16 : vector<2x128xf32>
    %18 = vector.extract_strided_slice %17 {offsets = [0, 0], sizes = [2, 32], strides = [1, 1]} : vector<2x128xf32> to vector<2x32xf32>
    %19 = arith.negf %18 : vector<2x32xf32>
    %20 = math.exp %19 : vector<2x32xf32>
    %cst_14 = arith.constant 1.000000e+00 : f32
    %21 = vector.broadcast %cst_14 : f32 to vector<2x32xf32>
    %22 = arith.addf %21, %20 : vector<2x32xf32>
    %23 = arith.divf %21, %22 : vector<2x32xf32>
    %24 = vector.extract_strided_slice %17 {offsets = [0, 32], sizes = [2, 32], strides = [1, 1]} : vector<2x128xf32> to vector<2x32xf32>
    %25 = arith.negf %24 : vector<2x32xf32>
    %26 = math.exp %25 : vector<2x32xf32>
    %cst_15 = arith.constant 1.000000e+00 : f32
    %27 = vector.broadcast %cst_15 : f32 to vector<2x32xf32>
    %28 = arith.addf %27, %26 : vector<2x32xf32>
    %29 = arith.divf %27, %28 : vector<2x32xf32>
    %30 = vector.extract_strided_slice %17 {offsets = [0, 64], sizes = [2, 32], strides = [1, 1]} : vector<2x128xf32> to vector<2x32xf32>
    %31 = math.tanh %30 : vector<2x32xf32>
    %32 = vector.extract_strided_slice %17 {offsets = [0, 96], sizes = [2, 32], strides = [1, 1]} : vector<2x128xf32> to vector<2x32xf32>
    %33 = arith.negf %32 : vector<2x32xf32>
    %34 = math.exp %33 : vector<2x32xf32>
    %cst_16 = arith.constant 1.000000e+00 : f32
    %35 = vector.broadcast %cst_16 : f32 to vector<2x32xf32>
    %36 = arith.addf %35, %34 : vector<2x32xf32>
    %37 = arith.divf %35, %36 : vector<2x32xf32>
    %38 = arith.mulf %29, %13 : vector<2x32xf32>
    %39 = arith.mulf %23, %31 : vector<2x32xf32>
    %40 = arith.addf %38, %39 : vector<2x32xf32>
    %41 = math.tanh %40 : vector<2x32xf32>
    %42 = arith.mulf %37, %41 : vector<2x32xf32>
    %c0_17 = arith.constant 0 : index
    %c0_18 = arith.constant 0 : index
    %c0_19 = arith.constant 0 : index
    %43 = vector.load %arg5[%c0_17, %c0_18, %c0_19] : memref<2x8x32xf32, #tpu.memory_space<vmem>>, vector<2x1x32xf32>
    %44 = vector.shape_cast %43 : vector<2x1x32xf32> to vector<2x32xf32>
    %45 = vector.shape_cast %42 : vector<2x32xf32> to vector<2x1x32xf32>
    tpu.vector_store %arg5[%c0_17, %c0_18, %c0_19], %45 {strides = array<i32>} : memref<2x8x32xf32, #tpu.memory_space<vmem>>, vector<2x1x32xf32>,
    %46 = vector.extract_strided_slice %11 {offsets = [0, 1, 0], sizes = [2, 1, 128], strides = [1, 1, 1]} : vector<2x8x128xf32> to vector<2x1x128xf32>
    %47 = vector.shape_cast %46 : vector<2x1x128xf32> to vector<2x128xf32>
    %cst_20 = arith.constant dense<0.000000e+00> : vector<2x128xf32>
    %48 = tpu.matmul %42, %4, %cst_20 {dimension_numbers = #tpu.dot_dimension_numbers<[1], [0], [0], [1], [0, 0, 1, 1], [], []>} : vector<2x32xf32>, vector<32x128xf32>, vector<2x128xf32> -> vector<2x128xf32>
    %49 = arith.addf %47, %48 : vector<2x128xf32>
    %50 = vector.extract_strided_slice %49 {offsets = [0, 0], sizes = [2, 32], strides = [1, 1]} : vector<2x128xf32> to vector<2x32xf32>
    %51 = arith.negf %50 : vector<2x32xf32>
    %52 = math.exp %51 : vector<2x32xf32>
    %cst_21 = arith.constant 1.000000e+00 : f32
    %53 = vector.broadcast %cst_21 : f32 to vector<2x32xf32>
    %54 = arith.addf %53, %52 : vector<2x32xf32>
    %55 = arith.divf %53, %54 : vector<2x32xf32>
    %56 = vector.extract_strided_slice %49 {offsets = [0, 32], sizes = [2, 32], strides = [1, 1]} : vector<2x128xf32> to vector<2x32xf32>
    %57 = arith.negf %56 : vector<2x32xf32>
    %58 = math.exp %57 : vector<2x32xf32>
    %cst_22 = arith.constant 1.000000e+00 : f32
    %59 = vector.broadcast %cst_22 : f32 to vector<2x32xf32>
    %60 = arith.addf %59, %58 : vector<2x32xf32>
    %61 = arith.divf %59, %60 : vector<2x32xf32>
    %62 = vector.extract_strided_slice %49 {offsets = [0, 64], sizes = [2, 32], strides = [1, 1]} : vector<2x128xf32> to vector<2x32xf32>
    %63 = math.tanh %62 : vector<2x32xf32>
    %64 = vector.extract_strided_slice %49 {offsets = [0, 96], sizes = [2, 32], strides = [1, 1]} : vector<2x128xf32> to vector<2x32xf32>
    %65 = arith.negf %64 : vector<2x32xf32>
    %66 = math.exp %65 : vector<2x32xf32>
    %cst_23 = arith.constant 1.000000e+00 : f32
    %67 = vector.broadcast %cst_23 : f32 to vector<2x32xf32>
    %68 = arith.addf %67, %66 : vector<2x32xf32>
    %69 = arith.divf %67, %68 : vector<2x32xf32>
    %70 = arith.mulf %61, %40 : vector<2x32xf32>
    %71 = arith.mulf %55, %63 : vector<2x32xf32>
    %72 = arith.addf %70, %71 : vector<2x32xf32>
    %73 = math.tanh %72 : vector<2x32xf32>
    %74 = arith.mulf %69, %73 : vector<2x32xf32>
    %c0_24 = arith.constant 0 : index
    %c1 = arith.constant 1 : index
    %c0_25 = arith.constant 0 : index
    %75 = vector.load %arg5[%c0_24, %c1, %c0_25] : memref<2x8x32xf32, #tpu.memory_space<vmem>>, vector<2x1x32xf32>
    %76 = vector.shape_cast %75 : vector<2x1x32xf32> to vector<2x32xf32>
    %77 = vector.shape_cast %74 : vector<2x32xf32> to vector<2x1x32xf32>
    tpu.vector_store %arg5[%c0_24, %c1, %c0_25], %77 {strides = array<i32>} : memref<2x8x32xf32, #tpu.memory_space<vmem>>, vector<2x1x32xf32>,
    %78 = vector.extract_strided_slice %11 {offsets = [0, 2, 0], sizes = [2, 1, 128], strides = [1, 1, 1]} : vector<2x8x128xf32> to vector<2x1x128xf32>
    %79 = vector.shape_cast %78 : vector<2x1x128xf32> to vector<2x128xf32>
    %cst_26 = arith.constant dense<0.000000e+00> : vector<2x128xf32>
    %80 = tpu.matmul %74, %4, %cst_26 {dimension_numbers = #tpu.dot_dimension_numbers<[1], [0], [0], [1], [0, 0, 1, 1], [], []>} : vector<2x32xf32>, vector<32x128xf32>, vector<2x128xf32> -> vector<2x128xf32>
    %81 = arith.addf %79, %80 : vector<2x128xf32>
    %82 = vector.extract_strided_slice %81 {offsets = [0, 0], sizes = [2, 32], strides = [1, 1]} : vector<2x128xf32> to vector<2x32xf32>
    %83 = arith.negf %82 : vector<2x32xf32>
    %84 = math.exp %83 : vector<2x32xf32>
    %cst_27 = arith.constant 1.000000e+00 : f32
    %85 = vector.broadcast %cst_27 : f32 to vector<2x32xf32>
    %86 = arith.addf %85, %84 : vector<2x32xf32>
    %87 = arith.divf %85, %86 : vector<2x32xf32>
    %88 = vector.extract_strided_slice %81 {offsets = [0, 32], sizes = [2, 32], strides = [1, 1]} : vector<2x128xf32> to vector<2x32xf32>
    %89 = arith.negf %88 : vector<2x32xf32>
    %90 = math.exp %89 : vector<2x32xf32>
    %cst_28 = arith.constant 1.000000e+00 : f32
    %91 = vector.broadcast %cst_28 : f32 to vector<2x32xf32>
    %92 = arith.addf %91, %90 : vector<2x32xf32>
    %93 = arith.divf %91, %92 : vector<2x32xf32>
    %94 = vector.extract_strided_slice %81 {offsets = [0, 64], sizes = [2, 32], strides = [1, 1]} : vector<2x128xf32> to vector<2x32xf32>
    %95 = math.tanh %94 : vector<2x32xf32>
    %96 = vector.extract_strided_slice %81 {offsets = [0, 96], sizes = [2, 32], strides = [1, 1]} : vector<2x128xf32> to vector<2x32xf32>
    %97 = arith.negf %96 : vector<2x32xf32>
    %98 = math.exp %97 : vector<2x32xf32>
    %cst_29 = arith.constant 1.000000e+00 : f32
    %99 = vector.broadcast %cst_29 : f32 to vector<2x32xf32>
    %100 = arith.addf %99, %98 : vector<2x32xf32>
    %101 = arith.divf %99, %100 : vector<2x32xf32>
    %102 = arith.mulf %93, %72 : vector<2x32xf32>
    %103 = arith.mulf %87, %95 : vector<2x32xf32>
    %104 = arith.addf %102, %103 : vector<2x32xf32>
    %105 = math.tanh %104 : vector<2x32xf32>
    %106 = arith.mulf %101, %105 : vector<2x32xf32>
    %c0_30 = arith.constant 0 : index
    %c2 = arith.constant 2 : index
    %c0_31 = arith.constant 0 : index
    %107 = vector.load %arg5[%c0_30, %c2, %c0_31] : memref<2x8x32xf32, #tpu.memory_space<vmem>>, vector<2x1x32xf32>
    %108 = vector.shape_cast %107 : vector<2x1x32xf32> to vector<2x32xf32>
    %109 = vector.shape_cast %106 : vector<2x32xf32> to vector<2x1x32xf32>
    tpu.vector_store %arg5[%c0_30, %c2, %c0_31], %109 {strides = array<i32>} : memref<2x8x32xf32, #tpu.memory_space<vmem>>, vector<2x1x32xf32>,
    %110 = vector.extract_strided_slice %11 {offsets = [0, 3, 0], sizes = [2, 1, 128], strides = [1, 1, 1]} : vector<2x8x128xf32> to vector<2x1x128xf32>
    %111 = vector.shape_cast %110 : vector<2x1x128xf32> to vector<2x128xf32>
    %cst_32 = arith.constant dense<0.000000e+00> : vector<2x128xf32>
    %112 = tpu.matmul %106, %4, %cst_32 {dimension_numbers = #tpu.dot_dimension_numbers<[1], [0], [0], [1], [0, 0, 1, 1], [], []>} : vector<2x32xf32>, vector<32x128xf32>, vector<2x128xf32> -> vector<2x128xf32>
    %113 = arith.addf %111, %112 : vector<2x128xf32>
    %114 = vector.extract_strided_slice %113 {offsets = [0, 0], sizes = [2, 32], strides = [1, 1]} : vector<2x128xf32> to vector<2x32xf32>
    %115 = arith.negf %114 : vector<2x32xf32>
    %116 = math.exp %115 : vector<2x32xf32>
    %cst_33 = arith.constant 1.000000e+00 : f32
    %117 = vector.broadcast %cst_33 : f32 to vector<2x32xf32>
    %118 = arith.addf %117, %116 : vector<2x32xf32>
    %119 = arith.divf %117, %118 : vector<2x32xf32>
    %120 = vector.extract_strided_slice %113 {offsets = [0, 32], sizes = [2, 32], strides = [1, 1]} : vector<2x128xf32> to vector<2x32xf32>
    %121 = arith.negf %120 : vector<2x32xf32>
    %122 = math.exp %121 : vector<2x32xf32>
    %cst_34 = arith.constant 1.000000e+00 : f32
    %123 = vector.broadcast %cst_34 : f32 to vector<2x32xf32>
    %124 = arith.addf %123, %122 : vector<2x32xf32>
    %125 = arith.divf %123, %124 : vector<2x32xf32>
    %126 = vector.extract_strided_slice %113 {offsets = [0, 64], sizes = [2, 32], strides = [1, 1]} : vector<2x128xf32> to vector<2x32xf32>
    %127 = math.tanh %126 : vector<2x32xf32>
    %128 = vector.extract_strided_slice %113 {offsets = [0, 96], sizes = [2, 32], strides = [1, 1]} : vector<2x128xf32> to vector<2x32xf32>
    %129 = arith.negf %128 : vector<2x32xf32>
    %130 = math.exp %129 : vector<2x32xf32>
    %cst_35 = arith.constant 1.000000e+00 : f32
    %131 = vector.broadcast %cst_35 : f32 to vector<2x32xf32>
    %132 = arith.addf %131, %130 : vector<2x32xf32>
    %133 = arith.divf %131, %132 : vector<2x32xf32>
    %134 = arith.mulf %125, %104 : vector<2x32xf32>
    %135 = arith.mulf %119, %127 : vector<2x32xf32>
    %136 = arith.addf %134, %135 : vector<2x32xf32>
    %137 = math.tanh %136 : vector<2x32xf32>
    %138 = arith.mulf %133, %137 : vector<2x32xf32>
    %c0_36 = arith.constant 0 : index
    %c3 = arith.constant 3 : index
    %c0_37 = arith.constant 0 : index
    %139 = vector.load %arg5[%c0_36, %c3, %c0_37] : memref<2x8x32xf32, #tpu.memory_space<vmem>>, vector<2x1x32xf32>
    %140 = vector.shape_cast %139 : vector<2x1x32xf32> to vector<2x32xf32>
    %141 = vector.shape_cast %138 : vector<2x32xf32> to vector<2x1x32xf32>
    tpu.vector_store %arg5[%c0_36, %c3, %c0_37], %141 {strides = array<i32>} : memref<2x8x32xf32, #tpu.memory_space<vmem>>, vector<2x1x32xf32>,
    %142 = vector.extract_strided_slice %11 {offsets = [0, 4, 0], sizes = [2, 1, 128], strides = [1, 1, 1]} : vector<2x8x128xf32> to vector<2x1x128xf32>
    %143 = vector.shape_cast %142 : vector<2x1x128xf32> to vector<2x128xf32>
    %cst_38 = arith.constant dense<0.000000e+00> : vector<2x128xf32>
    %144 = tpu.matmul %138, %4, %cst_38 {dimension_numbers = #tpu.dot_dimension_numbers<[1], [0], [0], [1], [0, 0, 1, 1], [], []>} : vector<2x32xf32>, vector<32x128xf32>, vector<2x128xf32> -> vector<2x128xf32>
    %145 = arith.addf %143, %144 : vector<2x128xf32>
    %146 = vector.extract_strided_slice %145 {offsets = [0, 0], sizes = [2, 32], strides = [1, 1]} : vector<2x128xf32> to vector<2x32xf32>
    %147 = arith.negf %146 : vector<2x32xf32>
    %148 = math.exp %147 : vector<2x32xf32>
    %cst_39 = arith.constant 1.000000e+00 : f32
    %149 = vector.broadcast %cst_39 : f32 to vector<2x32xf32>
    %150 = arith.addf %149, %148 : vector<2x32xf32>
    %151 = arith.divf %149, %150 : vector<2x32xf32>
    %152 = vector.extract_strided_slice %145 {offsets = [0, 32], sizes = [2, 32], strides = [1, 1]} : vector<2x128xf32> to vector<2x32xf32>
    %153 = arith.negf %152 : vector<2x32xf32>
    %154 = math.exp %153 : vector<2x32xf32>
    %cst_40 = arith.constant 1.000000e+00 : f32
    %155 = vector.broadcast %cst_40 : f32 to vector<2x32xf32>
    %156 = arith.addf %155, %154 : vector<2x32xf32>
    %157 = arith.divf %155, %156 : vector<2x32xf32>
    %158 = vector.extract_strided_slice %145 {offsets = [0, 64], sizes = [2, 32], strides = [1, 1]} : vector<2x128xf32> to vector<2x32xf32>
    %159 = math.tanh %158 : vector<2x32xf32>
    %160 = vector.extract_strided_slice %145 {offsets = [0, 96], sizes = [2, 32], strides = [1, 1]} : vector<2x128xf32> to vector<2x32xf32>
    %161 = arith.negf %160 : vector<2x32xf32>
    %162 = math.exp %161 : vector<2x32xf32>
    %cst_41 = arith.constant 1.000000e+00 : f32
    %163 = vector.broadcast %cst_41 : f32 to vector<2x32xf32>
    %164 = arith.addf %163, %162 : vector<2x32xf32>
    %165 = arith.divf %163, %164 : vector<2x32xf32>
    %166 = arith.mulf %157, %136 : vector<2x32xf32>
    %167 = arith.mulf %151, %159 : vector<2x32xf32>
    %168 = arith.addf %166, %167 : vector<2x32xf32>
    %169 = math.tanh %168 : vector<2x32xf32>
    %170 = arith.mulf %165, %169 : vector<2x32xf32>
    %c0_42 = arith.constant 0 : index
    %c4 = arith.constant 4 : index
    %c0_43 = arith.constant 0 : index
    %171 = vector.load %arg5[%c0_42, %c4, %c0_43] : memref<2x8x32xf32, #tpu.memory_space<vmem>>, vector<2x1x32xf32>
    %172 = vector.shape_cast %171 : vector<2x1x32xf32> to vector<2x32xf32>
    %173 = vector.shape_cast %170 : vector<2x32xf32> to vector<2x1x32xf32>
    tpu.vector_store %arg5[%c0_42, %c4, %c0_43], %173 {strides = array<i32>} : memref<2x8x32xf32, #tpu.memory_space<vmem>>, vector<2x1x32xf32>,
    %174 = vector.extract_strided_slice %11 {offsets = [0, 5, 0], sizes = [2, 1, 128], strides = [1, 1, 1]} : vector<2x8x128xf32> to vector<2x1x128xf32>
    %175 = vector.shape_cast %174 : vector<2x1x128xf32> to vector<2x128xf32>
    %cst_44 = arith.constant dense<0.000000e+00> : vector<2x128xf32>
    %176 = tpu.matmul %170, %4, %cst_44 {dimension_numbers = #tpu.dot_dimension_numbers<[1], [0], [0], [1], [0, 0, 1, 1], [], []>} : vector<2x32xf32>, vector<32x128xf32>, vector<2x128xf32> -> vector<2x128xf32>
    %177 = arith.addf %175, %176 : vector<2x128xf32>
    %178 = vector.extract_strided_slice %177 {offsets = [0, 0], sizes = [2, 32], strides = [1, 1]} : vector<2x128xf32> to vector<2x32xf32>
    %179 = arith.negf %178 : vector<2x32xf32>
    %180 = math.exp %179 : vector<2x32xf32>
    %cst_45 = arith.constant 1.000000e+00 : f32
    %181 = vector.broadcast %cst_45 : f32 to vector<2x32xf32>
    %182 = arith.addf %181, %180 : vector<2x32xf32>
    %183 = arith.divf %181, %182 : vector<2x32xf32>
    %184 = vector.extract_strided_slice %177 {offsets = [0, 32], sizes = [2, 32], strides = [1, 1]} : vector<2x128xf32> to vector<2x32xf32>
    %185 = arith.negf %184 : vector<2x32xf32>
    %186 = math.exp %185 : vector<2x32xf32>
    %cst_46 = arith.constant 1.000000e+00 : f32
    %187 = vector.broadcast %cst_46 : f32 to vector<2x32xf32>
    %188 = arith.addf %187, %186 : vector<2x32xf32>
    %189 = arith.divf %187, %188 : vector<2x32xf32>
    %190 = vector.extract_strided_slice %177 {offsets = [0, 64], sizes = [2, 32], strides = [1, 1]} : vector<2x128xf32> to vector<2x32xf32>
    %191 = math.tanh %190 : vector<2x32xf32>
    %192 = vector.extract_strided_slice %177 {offsets = [0, 96], sizes = [2, 32], strides = [1, 1]} : vector<2x128xf32> to vector<2x32xf32>
    %193 = arith.negf %192 : vector<2x32xf32>
    %194 = math.exp %193 : vector<2x32xf32>
    %cst_47 = arith.constant 1.000000e+00 : f32
    %195 = vector.broadcast %cst_47 : f32 to vector<2x32xf32>
    %196 = arith.addf %195, %194 : vector<2x32xf32>
    %197 = arith.divf %195, %196 : vector<2x32xf32>
    %198 = arith.mulf %189, %168 : vector<2x32xf32>
    %199 = arith.mulf %183, %191 : vector<2x32xf32>
    %200 = arith.addf %198, %199 : vector<2x32xf32>
    %201 = math.tanh %200 : vector<2x32xf32>
    %202 = arith.mulf %197, %201 : vector<2x32xf32>
    %c0_48 = arith.constant 0 : index
    %c5 = arith.constant 5 : index
    %c0_49 = arith.constant 0 : index
    %203 = vector.load %arg5[%c0_48, %c5, %c0_49] : memref<2x8x32xf32, #tpu.memory_space<vmem>>, vector<2x1x32xf32>
    %204 = vector.shape_cast %203 : vector<2x1x32xf32> to vector<2x32xf32>
    %205 = vector.shape_cast %202 : vector<2x32xf32> to vector<2x1x32xf32>
    tpu.vector_store %arg5[%c0_48, %c5, %c0_49], %205 {strides = array<i32>} : memref<2x8x32xf32, #tpu.memory_space<vmem>>, vector<2x1x32xf32>,
    %206 = vector.extract_strided_slice %11 {offsets = [0, 6, 0], sizes = [2, 1, 128], strides = [1, 1, 1]} : vector<2x8x128xf32> to vector<2x1x128xf32>
    %207 = vector.shape_cast %206 : vector<2x1x128xf32> to vector<2x128xf32>
    %cst_50 = arith.constant dense<0.000000e+00> : vector<2x128xf32>
    %208 = tpu.matmul %202, %4, %cst_50 {dimension_numbers = #tpu.dot_dimension_numbers<[1], [0], [0], [1], [0, 0, 1, 1], [], []>} : vector<2x32xf32>, vector<32x128xf32>, vector<2x128xf32> -> vector<2x128xf32>
    %209 = arith.addf %207, %208 : vector<2x128xf32>
    %210 = vector.extract_strided_slice %209 {offsets = [0, 0], sizes = [2, 32], strides = [1, 1]} : vector<2x128xf32> to vector<2x32xf32>
    %211 = arith.negf %210 : vector<2x32xf32>
    %212 = math.exp %211 : vector<2x32xf32>
    %cst_51 = arith.constant 1.000000e+00 : f32
    %213 = vector.broadcast %cst_51 : f32 to vector<2x32xf32>
    %214 = arith.addf %213, %212 : vector<2x32xf32>
    %215 = arith.divf %213, %214 : vector<2x32xf32>
    %216 = vector.extract_strided_slice %209 {offsets = [0, 32], sizes = [2, 32], strides = [1, 1]} : vector<2x128xf32> to vector<2x32xf32>
    %217 = arith.negf %216 : vector<2x32xf32>
    %218 = math.exp %217 : vector<2x32xf32>
    %cst_52 = arith.constant 1.000000e+00 : f32
    %219 = vector.broadcast %cst_52 : f32 to vector<2x32xf32>
    %220 = arith.addf %219, %218 : vector<2x32xf32>
    %221 = arith.divf %219, %220 : vector<2x32xf32>
    %222 = vector.extract_strided_slice %209 {offsets = [0, 64], sizes = [2, 32], strides = [1, 1]} : vector<2x128xf32> to vector<2x32xf32>
    %223 = math.tanh %222 : vector<2x32xf32>
    %224 = vector.extract_strided_slice %209 {offsets = [0, 96], sizes = [2, 32], strides = [1, 1]} : vector<2x128xf32> to vector<2x32xf32>
    %225 = arith.negf %224 : vector<2x32xf32>
    %226 = math.exp %225 : vector<2x32xf32>
    %cst_53 = arith.constant 1.000000e+00 : f32
    %227 = vector.broadcast %cst_53 : f32 to vector<2x32xf32>
    %228 = arith.addf %227, %226 : vector<2x32xf32>
    %229 = arith.divf %227, %228 : vector<2x32xf32>
    %230 = arith.mulf %221, %200 : vector<2x32xf32>
    %231 = arith.mulf %215, %223 : vector<2x32xf32>
    %232 = arith.addf %230, %231 : vector<2x32xf32>
    %233 = math.tanh %232 : vector<2x32xf32>
    %234 = arith.mulf %229, %233 : vector<2x32xf32>
    %c0_54 = arith.constant 0 : index
    %c6 = arith.constant 6 : index
    %c0_55 = arith.constant 0 : index
    %235 = vector.load %arg5[%c0_54, %c6, %c0_55] : memref<2x8x32xf32, #tpu.memory_space<vmem>>, vector<2x1x32xf32>
    %236 = vector.shape_cast %235 : vector<2x1x32xf32> to vector<2x32xf32>
    %237 = vector.shape_cast %234 : vector<2x32xf32> to vector<2x1x32xf32>
    tpu.vector_store %arg5[%c0_54, %c6, %c0_55], %237 {strides = array<i32>} : memref<2x8x32xf32, #tpu.memory_space<vmem>>, vector<2x1x32xf32>,
    %238 = vector.extract_strided_slice %11 {offsets = [0, 7, 0], sizes = [2, 1, 128], strides = [1, 1, 1]} : vector<2x8x128xf32> to vector<2x1x128xf32>
    %239 = vector.shape_cast %238 : vector<2x1x128xf32> to vector<2x128xf32>
    %cst_56 = arith.constant dense<0.000000e+00> : vector<2x128xf32>
    %240 = tpu.matmul %234, %4, %cst_56 {dimension_numbers = #tpu.dot_dimension_numbers<[1], [0], [0], [1], [0, 0, 1, 1], [], []>} : vector<2x32xf32>, vector<32x128xf32>, vector<2x128xf32> -> vector<2x128xf32>
    %241 = arith.addf %239, %240 : vector<2x128xf32>
    %242 = vector.extract_strided_slice %241 {offsets = [0, 0], sizes = [2, 32], strides = [1, 1]} : vector<2x128xf32> to vector<2x32xf32>
    %243 = arith.negf %242 : vector<2x32xf32>
    %244 = math.exp %243 : vector<2x32xf32>
    %cst_57 = arith.constant 1.000000e+00 : f32
    %245 = vector.broadcast %cst_57 : f32 to vector<2x32xf32>
    %246 = arith.addf %245, %244 : vector<2x32xf32>
    %247 = arith.divf %245, %246 : vector<2x32xf32>
    %248 = vector.extract_strided_slice %241 {offsets = [0, 32], sizes = [2, 32], strides = [1, 1]} : vector<2x128xf32> to vector<2x32xf32>
    %249 = arith.negf %248 : vector<2x32xf32>
    %250 = math.exp %249 : vector<2x32xf32>
    %cst_58 = arith.constant 1.000000e+00 : f32
    %251 = vector.broadcast %cst_58 : f32 to vector<2x32xf32>
    %252 = arith.addf %251, %250 : vector<2x32xf32>
    %253 = arith.divf %251, %252 : vector<2x32xf32>
    %254 = vector.extract_strided_slice %241 {offsets = [0, 64], sizes = [2, 32], strides = [1, 1]} : vector<2x128xf32> to vector<2x32xf32>
    %255 = math.tanh %254 : vector<2x32xf32>
    %256 = vector.extract_strided_slice %241 {offsets = [0, 96], sizes = [2, 32], strides = [1, 1]} : vector<2x128xf32> to vector<2x32xf32>
    %257 = arith.negf %256 : vector<2x32xf32>
    %258 = math.exp %257 : vector<2x32xf32>
    %cst_59 = arith.constant 1.000000e+00 : f32
    %259 = vector.broadcast %cst_59 : f32 to vector<2x32xf32>
    %260 = arith.addf %259, %258 : vector<2x32xf32>
    %261 = arith.divf %259, %260 : vector<2x32xf32>
    %262 = arith.mulf %253, %232 : vector<2x32xf32>
    %263 = arith.mulf %247, %255 : vector<2x32xf32>
    %264 = arith.addf %262, %263 : vector<2x32xf32>
    %265 = math.tanh %264 : vector<2x32xf32>
    %266 = arith.mulf %261, %265 : vector<2x32xf32>
    %c0_60 = arith.constant 0 : index
    %c7 = arith.constant 7 : index
    %c0_61 = arith.constant 0 : index
    %267 = vector.load %arg5[%c0_60, %c7, %c0_61] : memref<2x8x32xf32, #tpu.memory_space<vmem>>, vector<2x1x32xf32>
    %268 = vector.shape_cast %267 : vector<2x1x32xf32> to vector<2x32xf32>
    %269 = vector.shape_cast %266 : vector<2x32xf32> to vector<2x1x32xf32>
    tpu.vector_store %arg5[%c0_60, %c7, %c0_61], %269 {strides = array<i32>} : memref<2x8x32xf32, #tpu.memory_space<vmem>>, vector<2x1x32xf32>,
    %c0_62 = arith.constant 0 : index
    %c0_63 = arith.constant 0 : index
    %270 = vector.load %arg8[%c0_62, %c0_63] : memref<2x32xf32, #tpu.memory_space<vmem>>, vector<2x32xf32>
    tpu.vector_store %arg8[%c0_62, %c0_63], %266 {strides = array<i32>} : memref<2x32xf32, #tpu.memory_space<vmem>>, vector<2x32xf32>,
    %c0_64 = arith.constant 0 : index
    %c0_65 = arith.constant 0 : index
    %271 = vector.load %arg9[%c0_64, %c0_65] : memref<2x32xf32, #tpu.memory_space<vmem>>, vector<2x32xf32>
    tpu.vector_store %arg9[%c0_64, %c0_65], %264 {strides = array<i32>} : memref<2x32xf32, #tpu.memory_space<vmem>>, vector<2x32xf32>,
    %c1_i32 = arith.constant 1 : i32
    %272 = arith.cmpi eq, %arg0, %c1_i32 : i32
    %273 = arith.extui %272 : i1 to i32
    %c0_i32_66 = arith.constant 0 : i32
    %274 = arith.cmpi ne, %273, %c0_i32_66 : i32
    scf.if %274 {
      %c0_67 = arith.constant 0 : index
      %c0_68 = arith.constant 0 : index
      %275 = vector.load %arg6[%c0_67, %c0_68] : memref<2x32xf32, #tpu.memory_space<vmem>>, vector<2x32xf32>
      tpu.vector_store %arg6[%c0_67, %c0_68], %266 {strides = array<i32>} : memref<2x32xf32, #tpu.memory_space<vmem>>, vector<2x32xf32>,
      %c0_69 = arith.constant 0 : index
      %c0_70 = arith.constant 0 : index
      %276 = vector.load %arg7[%c0_69, %c0_70] : memref<2x32xf32, #tpu.memory_space<vmem>>, vector<2x32xf32>
      tpu.vector_store %arg7[%c0_69, %c0_70], %264 {strides = array<i32>} : memref<2x32xf32, #tpu.memory_space<vmem>>, vector<2x32xf32>,
    } else {
    }
    return
  }
  func.func @transform_0(%arg0: i32) -> (i32, i32, i32) {
    %c0_i32 = arith.constant 0 : i32
    %c0_i32_0 = arith.constant 0 : i32
    %c0_i32_1 = arith.constant 0 : i32
    return %c0_i32, %arg0, %c0_i32_0 : i32, i32, i32
  }
  func.func @transform_1(%arg0: i32) -> (i32, i32) {
    %c0_i32 = arith.constant 0 : i32
    %c0_i32_0 = arith.constant 0 : i32
    %c0_i32_1 = arith.constant 0 : i32
    return %c0_i32, %c0_i32_0 : i32, i32
  }
  func.func @transform_2(%arg0: i32) -> (i32, i32) {
    %c0_i32 = arith.constant 0 : i32
    %c0_i32_0 = arith.constant 0 : i32
    %c0_i32_1 = arith.constant 0 : i32
    return %c0_i32, %c0_i32_0 : i32, i32
  }
  func.func @transform_3(%arg0: i32) -> (i32, i32) {
    %c0_i32 = arith.constant 0 : i32
    %c0_i32_0 = arith.constant 0 : i32
    %c0_i32_1 = arith.constant 0 : i32
    return %c0_i32, %c0_i32_0 : i32, i32
  }
  func.func @transform_4(%arg0: i32) -> (i32, i32, i32) {
    %c0_i32 = arith.constant 0 : i32
    %c0_i32_0 = arith.constant 0 : i32
    %c0_i32_1 = arith.constant 0 : i32
    return %c0_i32, %arg0, %c0_i32_0 : i32, i32, i32
  }
  func.func @transform_5(%arg0: i32) -> (i32, i32) {
    %c0_i32 = arith.constant 0 : i32
    %c0_i32_0 = arith.constant 0 : i32
    %c0_i32_1 = arith.constant 0 : i32
    return %c0_i32, %c0_i32_0 : i32, i32
  }
  func.func @transform_6(%arg0: i32) -> (i32, i32) {
    %c0_i32 = arith.constant 0 : i32
    %c0_i32_0 = arith.constant 0 : i32
    %c0_i32_1 = arith.constant 0 : i32
    return %c0_i32, %c0_i32_0 : i32, i32
  }
}

module attributes {stable_mosaic.version = 11 : i64} {
  func.func @_lstm_layer_kernel(%arg0: i32, %arg1: memref<2x8x32xf32, #tpu.memory_space<vmem>>, %arg2: memref<32x128xf32, #tpu.memory_space<vmem>>, %arg3: memref<32x128xf32, #tpu.memory_space<vmem>>, %arg4: memref<1x128xf32, #tpu.memory_space<vmem>>, %arg5: memref<2x8x32xf32, #tpu.memory_space<vmem>>, %arg6: memref<2x32xf32, #tpu.memory_space<vmem>>, %arg7: memref<2x32xf32, #tpu.memory_space<vmem>>, %arg8: memref<2x32xf32, #tpu.memory_space<vmem>>, %arg9: memref<2x32xf32, #tpu.memory_space<vmem>>) attributes {dimension_semantics = [#tpu.dimension_semantics<arbitrary>], iteration_bounds = array<i64: 2>, scalar_prefetch = 0 : i64, scratch_operands = 2 : i64, tpu.core_type = #tpu.core_type<tc>, window_params = [{transform_indices = @transform_0, window_bounds = array<i64: 2, 8, 32>}, {pipeline_mode = #tpu.pipeline_mode<synchronous>, transform_indices = @transform_1, window_bounds = array<i64: 32, 128>}, {pipeline_mode = #tpu.pipeline_mode<synchronous>, transform_indices = @transform_2, window_bounds = array<i64: 32, 128>}, {pipeline_mode = #tpu.pipeline_mode<synchronous>, transform_indices = @transform_3, window_bounds = array<i64: 1, 128>}, {transform_indices = @transform_4, window_bounds = array<i64: 2, 8, 32>}, {pipeline_mode = #tpu.pipeline_mode<synchronous>, transform_indices = @transform_5, window_bounds = array<i64: 2, 32>}, {pipeline_mode = #tpu.pipeline_mode<synchronous>, transform_indices = @transform_6, window_bounds = array<i64: 2, 32>}]} {
    %c0_i32 = arith.constant 0 : i32
    %0 = arith.cmpi eq, %arg0, %c0_i32 : i32
    %1 = arith.extui %0 : i1 to i32
    %c0_i32_0 = arith.constant 0 : i32
    %2 = arith.cmpi ne, %1, %c0_i32_0 : i32
    scf.if %2 {
      %cst_67 = arith.constant 0.000000e+00 : f32
      %275 = vector.broadcast %cst_67 : f32 to vector<2x32xf32>
      %c0_68 = arith.constant 0 : index
      %c0_69 = arith.constant 0 : index
      %276 = vector.load %arg8[%c0_68, %c0_69] : memref<2x32xf32, #tpu.memory_space<vmem>>, vector<2x32xf32>
      tpu.vector_store %arg8[%c0_68, %c0_69], %275 {strides = array<i32>} : memref<2x32xf32, #tpu.memory_space<vmem>>, vector<2x32xf32>,
      %cst_70 = arith.constant 0.000000e+00 : f32
      %277 = vector.broadcast %cst_70 : f32 to vector<2x32xf32>
      %c0_71 = arith.constant 0 : index
      %c0_72 = arith.constant 0 : index
      %278 = vector.load %arg9[%c0_71, %c0_72] : memref<2x32xf32, #tpu.memory_space<vmem>>, vector<2x32xf32>
      tpu.vector_store %arg9[%c0_71, %c0_72], %277 {strides = array<i32>} : memref<2x32xf32, #tpu.memory_space<vmem>>, vector<2x32xf32>,
    } else {
    }
    %c0 = arith.constant 0 : index
    %c0_1 = arith.constant 0 : index
    %3 = vector.load %arg2[%c0, %c0_1] : memref<32x128xf32, #tpu.memory_space<vmem>>, vector<32x128xf32>
    %c0_2 = arith.constant 0 : index
    %c0_3 = arith.constant 0 : index
    %4 = vector.load %arg3[%c0_2, %c0_3] : memref<32x128xf32, #tpu.memory_space<vmem>>, vector<32x128xf32>
    %c0_4 = arith.constant 0 : index
    %c0_5 = arith.constant 0 : index
    %5 = vector.load %arg4[%c0_4, %c0_5] : memref<1x128xf32, #tpu.memory_space<vmem>>, vector<1x128xf32>
    %c0_6 = arith.constant 0 : index
    %c0_7 = arith.constant 0 : index
    %c0_8 = arith.constant 0 : index
    %6 = vector.load %arg1[%c0_6, %c0_7, %c0_8] : memref<2x8x32xf32, #tpu.memory_space<vmem>>, vector<2x8x32xf32>
    %7 = vector.shape_cast %6 : vector<2x8x32xf32> to vector<16x32xf32>
    %cst = arith.constant dense<0.000000e+00> : vector<16x128xf32>
    %8 = tpu.matmul %7, %3, %cst {dimension_numbers = #tpu.dot_dimension_numbers<[1], [0], [0], [1], [0, 0, 1, 1], [], []>} : vector<16x32xf32>, vector<32x128xf32>, vector<16x128xf32> -> vector<16x128xf32>
    %9 = vector.broadcast %5 : vector<1x128xf32> to vector<16x128xf32>
    %10 = arith.addf %8, %9 : vector<16x128xf32>
    %11 = vector.shape_cast %10 : vector<16x128xf32> to vector<2x8x128xf32>
    %c0_9 = arith.constant 0 : index
    %c0_10 = arith.constant 0 : index
    %12 = vector.load %arg8[%c0_9, %c0_10] : memref<2x32xf32, #tpu.memory_space<vmem>>, vector<2x32xf32>
    %c0_11 = arith.constant 0 : index
    %c0_12 = arith.constant 0 : index
    %13 = vector.load %arg9[%c0_11, %c0_12] : memref<2x32xf32, #tpu.memory_space<vmem>>, vector<2x32xf32>
    %14 = vector.extract_strided_slice %11 {offsets = [0, 0, 0], sizes = [2, 1, 128], strides = [1, 1, 1]} : vector<2x8x128xf32> to vector<2x1x128xf32>
    %15 = vector.shape_cast %14 : vector<2x1x128xf32> to vector<2x128xf32>
    %cst_13 = arith.constant dense<0.000000e+00> : vector<2x128xf32>
    %16 = tpu.matmul %12, %4, %cst_13 {dimension_numbers = #tpu.dot_dimension_numbers<[1], [0], [0], [1], [0, 0, 1, 1], [], []>} : vector<2x32xf32>, vector<32x128xf32>, vector<2x128xf32> -> vector<2x128xf32>
    %17 = arith.addf %15, %16 : vector<2x128xf32>
    %18 = vector.extract_strided_slice %17 {offsets = [0, 0], sizes = [2, 32], strides = [1, 1]} : vector<2x128xf32> to vector<2x32xf32>
    %19 = arith.negf %18 : vector<2x32xf32>
    %20 = math.exp %19 : vector<2x32xf32>
    %cst_14 = arith.constant 1.000000e+00 : f32
    %21 = vector.broadcast %cst_14 : f32 to vector<2x32xf32>
    %22 = arith.addf %21, %20 : vector<2x32xf32>
    %23 = arith.divf %21, %22 : vector<2x32xf32>
    %24 = vector.extract_strided_slice %17 {offsets = [0, 32], sizes = [2, 32], strides = [1, 1]} : vector<2x128xf32> to vector<2x32xf32>
    %25 = arith.negf %24 : vector<2x32xf32>
    %26 = math.exp %25 : vector<2x32xf32>
    %cst_15 = arith.constant 1.000000e+00 : f32
    %27 = vector.broadcast %cst_15 : f32 to vector<2x32xf32>
    %28 = arith.addf %27, %26 : vector<2x32xf32>
    %29 = arith.divf %27, %28 : vector<2x32xf32>
    %30 = vector.extract_strided_slice %17 {offsets = [0, 64], sizes = [2, 32], strides = [1, 1]} : vector<2x128xf32> to vector<2x32xf32>
    %31 = math.tanh %30 : vector<2x32xf32>
    %32 = vector.extract_strided_slice %17 {offsets = [0, 96], sizes = [2, 32], strides = [1, 1]} : vector<2x128xf32> to vector<2x32xf32>
    %33 = arith.negf %32 : vector<2x32xf32>
    %34 = math.exp %33 : vector<2x32xf32>
    %cst_16 = arith.constant 1.000000e+00 : f32
    %35 = vector.broadcast %cst_16 : f32 to vector<2x32xf32>
    %36 = arith.addf %35, %34 : vector<2x32xf32>
    %37 = arith.divf %35, %36 : vector<2x32xf32>
    %38 = arith.mulf %29, %13 : vector<2x32xf32>
    %39 = arith.mulf %23, %31 : vector<2x32xf32>
    %40 = arith.addf %38, %39 : vector<2x32xf32>
    %41 = math.tanh %40 : vector<2x32xf32>
    %42 = arith.mulf %37, %41 : vector<2x32xf32>
    %c0_17 = arith.constant 0 : index
    %c0_18 = arith.constant 0 : index
    %c0_19 = arith.constant 0 : index
    %43 = vector.load %arg5[%c0_17, %c0_18, %c0_19] : memref<2x8x32xf32, #tpu.memory_space<vmem>>, vector<2x1x32xf32>
    %44 = vector.shape_cast %43 : vector<2x1x32xf32> to vector<2x32xf32>
    %45 = vector.shape_cast %42 : vector<2x32xf32> to vector<2x1x32xf32>
    tpu.vector_store %arg5[%c0_17, %c0_18, %c0_19], %45 {strides = array<i32>} : memref<2x8x32xf32, #tpu.memory_space<vmem>>, vector<2x1x32xf32>,
    %46 = vector.extract_strided_slice %11 {offsets = [0, 1, 0], sizes = [2, 1, 128], strides = [1, 1, 1]} : vector<2x8x128xf32> to vector<2x1x128xf32>
    %47 = vector.shape_cast %46 : vector<2x1x128xf32> to vector<2x128xf32>
    %cst_20 = arith.constant dense<0.000000e+00> : vector<2x128xf32>
    %48 = tpu.matmul %42, %4, %cst_20 {dimension_numbers = #tpu.dot_dimension_numbers<[1], [0], [0], [1], [0, 0, 1, 1], [], []>} : vector<2x32xf32>, vector<32x128xf32>, vector<2x128xf32> -> vector<2x128xf32>
    %49 = arith.addf %47, %48 : vector<2x128xf32>
    %50 = vector.extract_strided_slice %49 {offsets = [0, 0], sizes = [2, 32], strides = [1, 1]} : vector<2x128xf32> to vector<2x32xf32>
    %51 = arith.negf %50 : vector<2x32xf32>
    %52 = math.exp %51 : vector<2x32xf32>
    %cst_21 = arith.constant 1.000000e+00 : f32
    %53 = vector.broadcast %cst_21 : f32 to vector<2x32xf32>
    %54 = arith.addf %53, %52 : vector<2x32xf32>
    %55 = arith.divf %53, %54 : vector<2x32xf32>
    %56 = vector.extract_strided_slice %49 {offsets = [0, 32], sizes = [2, 32], strides = [1, 1]} : vector<2x128xf32> to vector<2x32xf32>
    %57 = arith.negf %56 : vector<2x32xf32>
    %58 = math.exp %57 : vector<2x32xf32>
    %cst_22 = arith.constant 1.000000e+00 : f32
    %59 = vector.broadcast %cst_22 : f32 to vector<2x32xf32>
    %60 = arith.addf %59, %58 : vector<2x32xf32>
    %61 = arith.divf %59, %60 : vector<2x32xf32>
    %62 = vector.extract_strided_slice %49 {offsets = [0, 64], sizes = [2, 32], strides = [1, 1]} : vector<2x128xf32> to vector<2x32xf32>
    %63 = math.tanh %62 : vector<2x32xf32>
    %64 = vector.extract_strided_slice %49 {offsets = [0, 96], sizes = [2, 32], strides = [1, 1]} : vector<2x128xf32> to vector<2x32xf32>
    %65 = arith.negf %64 : vector<2x32xf32>
    %66 = math.exp %65 : vector<2x32xf32>
    %cst_23 = arith.constant 1.000000e+00 : f32
    %67 = vector.broadcast %cst_23 : f32 to vector<2x32xf32>
    %68 = arith.addf %67, %66 : vector<2x32xf32>
    %69 = arith.divf %67, %68 : vector<2x32xf32>
    %70 = arith.mulf %61, %40 : vector<2x32xf32>
    %71 = arith.mulf %55, %63 : vector<2x32xf32>
    %72 = arith.addf %70, %71 : vector<2x32xf32>
    %73 = math.tanh %72 : vector<2x32xf32>
    %74 = arith.mulf %69, %73 : vector<2x32xf32>
    %c0_24 = arith.constant 0 : index
    %c1 = arith.constant 1 : index
    %c0_25 = arith.constant 0 : index
    %75 = vector.load %arg5[%c0_24, %c1, %c0_25] : memref<2x8x32xf32, #tpu.memory_space<vmem>>, vector<2x1x32xf32>
    %76 = vector.shape_cast %75 : vector<2x1x32xf32> to vector<2x32xf32>
    %77 = vector.shape_cast %74 : vector<2x32xf32> to vector<2x1x32xf32>
    tpu.vector_store %arg5[%c0_24, %c1, %c0_25], %77 {strides = array<i32>} : memref<2x8x32xf32, #tpu.memory_space<vmem>>, vector<2x1x32xf32>,
    %78 = vector.extract_strided_slice %11 {offsets = [0, 2, 0], sizes = [2, 1, 128], strides = [1, 1, 1]} : vector<2x8x128xf32> to vector<2x1x128xf32>
    %79 = vector.shape_cast %78 : vector<2x1x128xf32> to vector<2x128xf32>
    %cst_26 = arith.constant dense<0.000000e+00> : vector<2x128xf32>
    %80 = tpu.matmul %74, %4, %cst_26 {dimension_numbers = #tpu.dot_dimension_numbers<[1], [0], [0], [1], [0, 0, 1, 1], [], []>} : vector<2x32xf32>, vector<32x128xf32>, vector<2x128xf32> -> vector<2x128xf32>
    %81 = arith.addf %79, %80 : vector<2x128xf32>
    %82 = vector.extract_strided_slice %81 {offsets = [0, 0], sizes = [2, 32], strides = [1, 1]} : vector<2x128xf32> to vector<2x32xf32>
    %83 = arith.negf %82 : vector<2x32xf32>
    %84 = math.exp %83 : vector<2x32xf32>
    %cst_27 = arith.constant 1.000000e+00 : f32
    %85 = vector.broadcast %cst_27 : f32 to vector<2x32xf32>
    %86 = arith.addf %85, %84 : vector<2x32xf32>
    %87 = arith.divf %85, %86 : vector<2x32xf32>
    %88 = vector.extract_strided_slice %81 {offsets = [0, 32], sizes = [2, 32], strides = [1, 1]} : vector<2x128xf32> to vector<2x32xf32>
    %89 = arith.negf %88 : vector<2x32xf32>
    %90 = math.exp %89 : vector<2x32xf32>
    %cst_28 = arith.constant 1.000000e+00 : f32
    %91 = vector.broadcast %cst_28 : f32 to vector<2x32xf32>
    %92 = arith.addf %91, %90 : vector<2x32xf32>
    %93 = arith.divf %91, %92 : vector<2x32xf32>
    %94 = vector.extract_strided_slice %81 {offsets = [0, 64], sizes = [2, 32], strides = [1, 1]} : vector<2x128xf32> to vector<2x32xf32>
    %95 = math.tanh %94 : vector<2x32xf32>
    %96 = vector.extract_strided_slice %81 {offsets = [0, 96], sizes = [2, 32], strides = [1, 1]} : vector<2x128xf32> to vector<2x32xf32>
    %97 = arith.negf %96 : vector<2x32xf32>
    %98 = math.exp %97 : vector<2x32xf32>
    %cst_29 = arith.constant 1.000000e+00 : f32
    %99 = vector.broadcast %cst_29 : f32 to vector<2x32xf32>
    %100 = arith.addf %99, %98 : vector<2x32xf32>
    %101 = arith.divf %99, %100 : vector<2x32xf32>
    %102 = arith.mulf %93, %72 : vector<2x32xf32>
    %103 = arith.mulf %87, %95 : vector<2x32xf32>
    %104 = arith.addf %102, %103 : vector<2x32xf32>
    %105 = math.tanh %104 : vector<2x32xf32>
    %106 = arith.mulf %101, %105 : vector<2x32xf32>
    %c0_30 = arith.constant 0 : index
    %c2 = arith.constant 2 : index
    %c0_31 = arith.constant 0 : index
    %107 = vector.load %arg5[%c0_30, %c2, %c0_31] : memref<2x8x32xf32, #tpu.memory_space<vmem>>, vector<2x1x32xf32>
    %108 = vector.shape_cast %107 : vector<2x1x32xf32> to vector<2x32xf32>
    %109 = vector.shape_cast %106 : vector<2x32xf32> to vector<2x1x32xf32>
    tpu.vector_store %arg5[%c0_30, %c2, %c0_31], %109 {strides = array<i32>} : memref<2x8x32xf32, #tpu.memory_space<vmem>>, vector<2x1x32xf32>,
    %110 = vector.extract_strided_slice %11 {offsets = [0, 3, 0], sizes = [2, 1, 128], strides = [1, 1, 1]} : vector<2x8x128xf32> to vector<2x1x128xf32>
    %111 = vector.shape_cast %110 : vector<2x1x128xf32> to vector<2x128xf32>
    %cst_32 = arith.constant dense<0.000000e+00> : vector<2x128xf32>
    %112 = tpu.matmul %106, %4, %cst_32 {dimension_numbers = #tpu.dot_dimension_numbers<[1], [0], [0], [1], [0, 0, 1, 1], [], []>} : vector<2x32xf32>, vector<32x128xf32>, vector<2x128xf32> -> vector<2x128xf32>
    %113 = arith.addf %111, %112 : vector<2x128xf32>
    %114 = vector.extract_strided_slice %113 {offsets = [0, 0], sizes = [2, 32], strides = [1, 1]} : vector<2x128xf32> to vector<2x32xf32>
    %115 = arith.negf %114 : vector<2x32xf32>
    %116 = math.exp %115 : vector<2x32xf32>
    %cst_33 = arith.constant 1.000000e+00 : f32
    %117 = vector.broadcast %cst_33 : f32 to vector<2x32xf32>
    %118 = arith.addf %117, %116 : vector<2x32xf32>
    %119 = arith.divf %117, %118 : vector<2x32xf32>
    %120 = vector.extract_strided_slice %113 {offsets = [0, 32], sizes = [2, 32], strides = [1, 1]} : vector<2x128xf32> to vector<2x32xf32>
    %121 = arith.negf %120 : vector<2x32xf32>
    %122 = math.exp %121 : vector<2x32xf32>
    %cst_34 = arith.constant 1.000000e+00 : f32
    %123 = vector.broadcast %cst_34 : f32 to vector<2x32xf32>
    %124 = arith.addf %123, %122 : vector<2x32xf32>
    %125 = arith.divf %123, %124 : vector<2x32xf32>
    %126 = vector.extract_strided_slice %113 {offsets = [0, 64], sizes = [2, 32], strides = [1, 1]} : vector<2x128xf32> to vector<2x32xf32>
    %127 = math.tanh %126 : vector<2x32xf32>
    %128 = vector.extract_strided_slice %113 {offsets = [0, 96], sizes = [2, 32], strides = [1, 1]} : vector<2x128xf32> to vector<2x32xf32>
    %129 = arith.negf %128 : vector<2x32xf32>
    %130 = math.exp %129 : vector<2x32xf32>
    %cst_35 = arith.constant 1.000000e+00 : f32
    %131 = vector.broadcast %cst_35 : f32 to vector<2x32xf32>
    %132 = arith.addf %131, %130 : vector<2x32xf32>
    %133 = arith.divf %131, %132 : vector<2x32xf32>
    %134 = arith.mulf %125, %104 : vector<2x32xf32>
    %135 = arith.mulf %119, %127 : vector<2x32xf32>
    %136 = arith.addf %134, %135 : vector<2x32xf32>
    %137 = math.tanh %136 : vector<2x32xf32>
    %138 = arith.mulf %133, %137 : vector<2x32xf32>
    %c0_36 = arith.constant 0 : index
    %c3 = arith.constant 3 : index
    %c0_37 = arith.constant 0 : index
    %139 = vector.load %arg5[%c0_36, %c3, %c0_37] : memref<2x8x32xf32, #tpu.memory_space<vmem>>, vector<2x1x32xf32>
    %140 = vector.shape_cast %139 : vector<2x1x32xf32> to vector<2x32xf32>
    %141 = vector.shape_cast %138 : vector<2x32xf32> to vector<2x1x32xf32>
    tpu.vector_store %arg5[%c0_36, %c3, %c0_37], %141 {strides = array<i32>} : memref<2x8x32xf32, #tpu.memory_space<vmem>>, vector<2x1x32xf32>,
    %142 = vector.extract_strided_slice %11 {offsets = [0, 4, 0], sizes = [2, 1, 128], strides = [1, 1, 1]} : vector<2x8x128xf32> to vector<2x1x128xf32>
    %143 = vector.shape_cast %142 : vector<2x1x128xf32> to vector<2x128xf32>
    %cst_38 = arith.constant dense<0.000000e+00> : vector<2x128xf32>
    %144 = tpu.matmul %138, %4, %cst_38 {dimension_numbers = #tpu.dot_dimension_numbers<[1], [0], [0], [1], [0, 0, 1, 1], [], []>} : vector<2x32xf32>, vector<32x128xf32>, vector<2x128xf32> -> vector<2x128xf32>
    %145 = arith.addf %143, %144 : vector<2x128xf32>
    %146 = vector.extract_strided_slice %145 {offsets = [0, 0], sizes = [2, 32], strides = [1, 1]} : vector<2x128xf32> to vector<2x32xf32>
    %147 = arith.negf %146 : vector<2x32xf32>
    %148 = math.exp %147 : vector<2x32xf32>
    %cst_39 = arith.constant 1.000000e+00 : f32
    %149 = vector.broadcast %cst_39 : f32 to vector<2x32xf32>
    %150 = arith.addf %149, %148 : vector<2x32xf32>
    %151 = arith.divf %149, %150 : vector<2x32xf32>
    %152 = vector.extract_strided_slice %145 {offsets = [0, 32], sizes = [2, 32], strides = [1, 1]} : vector<2x128xf32> to vector<2x32xf32>
    %153 = arith.negf %152 : vector<2x32xf32>
    %154 = math.exp %153 : vector<2x32xf32>
    %cst_40 = arith.constant 1.000000e+00 : f32
    %155 = vector.broadcast %cst_40 : f32 to vector<2x32xf32>
    %156 = arith.addf %155, %154 : vector<2x32xf32>
    %157 = arith.divf %155, %156 : vector<2x32xf32>
    %158 = vector.extract_strided_slice %145 {offsets = [0, 64], sizes = [2, 32], strides = [1, 1]} : vector<2x128xf32> to vector<2x32xf32>
    %159 = math.tanh %158 : vector<2x32xf32>
    %160 = vector.extract_strided_slice %145 {offsets = [0, 96], sizes = [2, 32], strides = [1, 1]} : vector<2x128xf32> to vector<2x32xf32>
    %161 = arith.negf %160 : vector<2x32xf32>
    %162 = math.exp %161 : vector<2x32xf32>
    %cst_41 = arith.constant 1.000000e+00 : f32
    %163 = vector.broadcast %cst_41 : f32 to vector<2x32xf32>
    %164 = arith.addf %163, %162 : vector<2x32xf32>
    %165 = arith.divf %163, %164 : vector<2x32xf32>
    %166 = arith.mulf %157, %136 : vector<2x32xf32>
    %167 = arith.mulf %151, %159 : vector<2x32xf32>
    %168 = arith.addf %166, %167 : vector<2x32xf32>
    %169 = math.tanh %168 : vector<2x32xf32>
    %170 = arith.mulf %165, %169 : vector<2x32xf32>
    %c0_42 = arith.constant 0 : index
    %c4 = arith.constant 4 : index
    %c0_43 = arith.constant 0 : index
    %171 = vector.load %arg5[%c0_42, %c4, %c0_43] : memref<2x8x32xf32, #tpu.memory_space<vmem>>, vector<2x1x32xf32>
    %172 = vector.shape_cast %171 : vector<2x1x32xf32> to vector<2x32xf32>
    %173 = vector.shape_cast %170 : vector<2x32xf32> to vector<2x1x32xf32>
    tpu.vector_store %arg5[%c0_42, %c4, %c0_43], %173 {strides = array<i32>} : memref<2x8x32xf32, #tpu.memory_space<vmem>>, vector<2x1x32xf32>,
    %174 = vector.extract_strided_slice %11 {offsets = [0, 5, 0], sizes = [2, 1, 128], strides = [1, 1, 1]} : vector<2x8x128xf32> to vector<2x1x128xf32>
    %175 = vector.shape_cast %174 : vector<2x1x128xf32> to vector<2x128xf32>
    %cst_44 = arith.constant dense<0.000000e+00> : vector<2x128xf32>
    %176 = tpu.matmul %170, %4, %cst_44 {dimension_numbers = #tpu.dot_dimension_numbers<[1], [0], [0], [1], [0, 0, 1, 1], [], []>} : vector<2x32xf32>, vector<32x128xf32>, vector<2x128xf32> -> vector<2x128xf32>
    %177 = arith.addf %175, %176 : vector<2x128xf32>
    %178 = vector.extract_strided_slice %177 {offsets = [0, 0], sizes = [2, 32], strides = [1, 1]} : vector<2x128xf32> to vector<2x32xf32>
    %179 = arith.negf %178 : vector<2x32xf32>
    %180 = math.exp %179 : vector<2x32xf32>
    %cst_45 = arith.constant 1.000000e+00 : f32
    %181 = vector.broadcast %cst_45 : f32 to vector<2x32xf32>
    %182 = arith.addf %181, %180 : vector<2x32xf32>
    %183 = arith.divf %181, %182 : vector<2x32xf32>
    %184 = vector.extract_strided_slice %177 {offsets = [0, 32], sizes = [2, 32], strides = [1, 1]} : vector<2x128xf32> to vector<2x32xf32>
    %185 = arith.negf %184 : vector<2x32xf32>
    %186 = math.exp %185 : vector<2x32xf32>
    %cst_46 = arith.constant 1.000000e+00 : f32
    %187 = vector.broadcast %cst_46 : f32 to vector<2x32xf32>
    %188 = arith.addf %187, %186 : vector<2x32xf32>
    %189 = arith.divf %187, %188 : vector<2x32xf32>
    %190 = vector.extract_strided_slice %177 {offsets = [0, 64], sizes = [2, 32], strides = [1, 1]} : vector<2x128xf32> to vector<2x32xf32>
    %191 = math.tanh %190 : vector<2x32xf32>
    %192 = vector.extract_strided_slice %177 {offsets = [0, 96], sizes = [2, 32], strides = [1, 1]} : vector<2x128xf32> to vector<2x32xf32>
    %193 = arith.negf %192 : vector<2x32xf32>
    %194 = math.exp %193 : vector<2x32xf32>
    %cst_47 = arith.constant 1.000000e+00 : f32
    %195 = vector.broadcast %cst_47 : f32 to vector<2x32xf32>
    %196 = arith.addf %195, %194 : vector<2x32xf32>
    %197 = arith.divf %195, %196 : vector<2x32xf32>
    %198 = arith.mulf %189, %168 : vector<2x32xf32>
    %199 = arith.mulf %183, %191 : vector<2x32xf32>
    %200 = arith.addf %198, %199 : vector<2x32xf32>
    %201 = math.tanh %200 : vector<2x32xf32>
    %202 = arith.mulf %197, %201 : vector<2x32xf32>
    %c0_48 = arith.constant 0 : index
    %c5 = arith.constant 5 : index
    %c0_49 = arith.constant 0 : index
    %203 = vector.load %arg5[%c0_48, %c5, %c0_49] : memref<2x8x32xf32, #tpu.memory_space<vmem>>, vector<2x1x32xf32>
    %204 = vector.shape_cast %203 : vector<2x1x32xf32> to vector<2x32xf32>
    %205 = vector.shape_cast %202 : vector<2x32xf32> to vector<2x1x32xf32>
    tpu.vector_store %arg5[%c0_48, %c5, %c0_49], %205 {strides = array<i32>} : memref<2x8x32xf32, #tpu.memory_space<vmem>>, vector<2x1x32xf32>,
    %206 = vector.extract_strided_slice %11 {offsets = [0, 6, 0], sizes = [2, 1, 128], strides = [1, 1, 1]} : vector<2x8x128xf32> to vector<2x1x128xf32>
    %207 = vector.shape_cast %206 : vector<2x1x128xf32> to vector<2x128xf32>
    %cst_50 = arith.constant dense<0.000000e+00> : vector<2x128xf32>
    %208 = tpu.matmul %202, %4, %cst_50 {dimension_numbers = #tpu.dot_dimension_numbers<[1], [0], [0], [1], [0, 0, 1, 1], [], []>} : vector<2x32xf32>, vector<32x128xf32>, vector<2x128xf32> -> vector<2x128xf32>
    %209 = arith.addf %207, %208 : vector<2x128xf32>
    %210 = vector.extract_strided_slice %209 {offsets = [0, 0], sizes = [2, 32], strides = [1, 1]} : vector<2x128xf32> to vector<2x32xf32>
    %211 = arith.negf %210 : vector<2x32xf32>
    %212 = math.exp %211 : vector<2x32xf32>
    %cst_51 = arith.constant 1.000000e+00 : f32
    %213 = vector.broadcast %cst_51 : f32 to vector<2x32xf32>
    %214 = arith.addf %213, %212 : vector<2x32xf32>
    %215 = arith.divf %213, %214 : vector<2x32xf32>
    %216 = vector.extract_strided_slice %209 {offsets = [0, 32], sizes = [2, 32], strides = [1, 1]} : vector<2x128xf32> to vector<2x32xf32>
    %217 = arith.negf %216 : vector<2x32xf32>
    %218 = math.exp %217 : vector<2x32xf32>
    %cst_52 = arith.constant 1.000000e+00 : f32
    %219 = vector.broadcast %cst_52 : f32 to vector<2x32xf32>
    %220 = arith.addf %219, %218 : vector<2x32xf32>
    %221 = arith.divf %219, %220 : vector<2x32xf32>
    %222 = vector.extract_strided_slice %209 {offsets = [0, 64], sizes = [2, 32], strides = [1, 1]} : vector<2x128xf32> to vector<2x32xf32>
    %223 = math.tanh %222 : vector<2x32xf32>
    %224 = vector.extract_strided_slice %209 {offsets = [0, 96], sizes = [2, 32], strides = [1, 1]} : vector<2x128xf32> to vector<2x32xf32>
    %225 = arith.negf %224 : vector<2x32xf32>
    %226 = math.exp %225 : vector<2x32xf32>
    %cst_53 = arith.constant 1.000000e+00 : f32
    %227 = vector.broadcast %cst_53 : f32 to vector<2x32xf32>
    %228 = arith.addf %227, %226 : vector<2x32xf32>
    %229 = arith.divf %227, %228 : vector<2x32xf32>
    %230 = arith.mulf %221, %200 : vector<2x32xf32>
    %231 = arith.mulf %215, %223 : vector<2x32xf32>
    %232 = arith.addf %230, %231 : vector<2x32xf32>
    %233 = math.tanh %232 : vector<2x32xf32>
    %234 = arith.mulf %229, %233 : vector<2x32xf32>
    %c0_54 = arith.constant 0 : index
    %c6 = arith.constant 6 : index
    %c0_55 = arith.constant 0 : index
    %235 = vector.load %arg5[%c0_54, %c6, %c0_55] : memref<2x8x32xf32, #tpu.memory_space<vmem>>, vector<2x1x32xf32>
    %236 = vector.shape_cast %235 : vector<2x1x32xf32> to vector<2x32xf32>
    %237 = vector.shape_cast %234 : vector<2x32xf32> to vector<2x1x32xf32>
    tpu.vector_store %arg5[%c0_54, %c6, %c0_55], %237 {strides = array<i32>} : memref<2x8x32xf32, #tpu.memory_space<vmem>>, vector<2x1x32xf32>,
    %238 = vector.extract_strided_slice %11 {offsets = [0, 7, 0], sizes = [2, 1, 128], strides = [1, 1, 1]} : vector<2x8x128xf32> to vector<2x1x128xf32>
    %239 = vector.shape_cast %238 : vector<2x1x128xf32> to vector<2x128xf32>
    %cst_56 = arith.constant dense<0.000000e+00> : vector<2x128xf32>
    %240 = tpu.matmul %234, %4, %cst_56 {dimension_numbers = #tpu.dot_dimension_numbers<[1], [0], [0], [1], [0, 0, 1, 1], [], []>} : vector<2x32xf32>, vector<32x128xf32>, vector<2x128xf32> -> vector<2x128xf32>
    %241 = arith.addf %239, %240 : vector<2x128xf32>
    %242 = vector.extract_strided_slice %241 {offsets = [0, 0], sizes = [2, 32], strides = [1, 1]} : vector<2x128xf32> to vector<2x32xf32>
    %243 = arith.negf %242 : vector<2x32xf32>
    %244 = math.exp %243 : vector<2x32xf32>
    %cst_57 = arith.constant 1.000000e+00 : f32
    %245 = vector.broadcast %cst_57 : f32 to vector<2x32xf32>
    %246 = arith.addf %245, %244 : vector<2x32xf32>
    %247 = arith.divf %245, %246 : vector<2x32xf32>
    %248 = vector.extract_strided_slice %241 {offsets = [0, 32], sizes = [2, 32], strides = [1, 1]} : vector<2x128xf32> to vector<2x32xf32>
    %249 = arith.negf %248 : vector<2x32xf32>
    %250 = math.exp %249 : vector<2x32xf32>
    %cst_58 = arith.constant 1.000000e+00 : f32
    %251 = vector.broadcast %cst_58 : f32 to vector<2x32xf32>
    %252 = arith.addf %251, %250 : vector<2x32xf32>
    %253 = arith.divf %251, %252 : vector<2x32xf32>
    %254 = vector.extract_strided_slice %241 {offsets = [0, 64], sizes = [2, 32], strides = [1, 1]} : vector<2x128xf32> to vector<2x32xf32>
    %255 = math.tanh %254 : vector<2x32xf32>
    %256 = vector.extract_strided_slice %241 {offsets = [0, 96], sizes = [2, 32], strides = [1, 1]} : vector<2x128xf32> to vector<2x32xf32>
    %257 = arith.negf %256 : vector<2x32xf32>
    %258 = math.exp %257 : vector<2x32xf32>
    %cst_59 = arith.constant 1.000000e+00 : f32
    %259 = vector.broadcast %cst_59 : f32 to vector<2x32xf32>
    %260 = arith.addf %259, %258 : vector<2x32xf32>
    %261 = arith.divf %259, %260 : vector<2x32xf32>
    %262 = arith.mulf %253, %232 : vector<2x32xf32>
    %263 = arith.mulf %247, %255 : vector<2x32xf32>
    %264 = arith.addf %262, %263 : vector<2x32xf32>
    %265 = math.tanh %264 : vector<2x32xf32>
    %266 = arith.mulf %261, %265 : vector<2x32xf32>
    %c0_60 = arith.constant 0 : index
    %c7 = arith.constant 7 : index
    %c0_61 = arith.constant 0 : index
    %267 = vector.load %arg5[%c0_60, %c7, %c0_61] : memref<2x8x32xf32, #tpu.memory_space<vmem>>, vector<2x1x32xf32>
    %268 = vector.shape_cast %267 : vector<2x1x32xf32> to vector<2x32xf32>
    %269 = vector.shape_cast %266 : vector<2x32xf32> to vector<2x1x32xf32>
    tpu.vector_store %arg5[%c0_60, %c7, %c0_61], %269 {strides = array<i32>} : memref<2x8x32xf32, #tpu.memory_space<vmem>>, vector<2x1x32xf32>,
    %c0_62 = arith.constant 0 : index
    %c0_63 = arith.constant 0 : index
    %270 = vector.load %arg8[%c0_62, %c0_63] : memref<2x32xf32, #tpu.memory_space<vmem>>, vector<2x32xf32>
    tpu.vector_store %arg8[%c0_62, %c0_63], %266 {strides = array<i32>} : memref<2x32xf32, #tpu.memory_space<vmem>>, vector<2x32xf32>,
    %c0_64 = arith.constant 0 : index
    %c0_65 = arith.constant 0 : index
    %271 = vector.load %arg9[%c0_64, %c0_65] : memref<2x32xf32, #tpu.memory_space<vmem>>, vector<2x32xf32>
    tpu.vector_store %arg9[%c0_64, %c0_65], %264 {strides = array<i32>} : memref<2x32xf32, #tpu.memory_space<vmem>>, vector<2x32xf32>,
    %c1_i32 = arith.constant 1 : i32
    %272 = arith.cmpi eq, %arg0, %c1_i32 : i32
    %273 = arith.extui %272 : i1 to i32
    %c0_i32_66 = arith.constant 0 : i32
    %274 = arith.cmpi ne, %273, %c0_i32_66 : i32
    scf.if %274 {
      %c0_67 = arith.constant 0 : index
      %c0_68 = arith.constant 0 : index
      %275 = vector.load %arg6[%c0_67, %c0_68] : memref<2x32xf32, #tpu.memory_space<vmem>>, vector<2x32xf32>
      tpu.vector_store %arg6[%c0_67, %c0_68], %266 {strides = array<i32>} : memref<2x32xf32, #tpu.memory_space<vmem>>, vector<2x32xf32>,
      %c0_69 = arith.constant 0 : index
      %c0_70 = arith.constant 0 : index
      %276 = vector.load %arg7[%c0_69, %c0_70] : memref<2x32xf32, #tpu.memory_space<vmem>>, vector<2x32xf32>
      tpu.vector_store %arg7[%c0_69, %c0_70], %264 {strides = array<i32>} : memref<2x32xf32, #tpu.memory_space<vmem>>, vector<2x32xf32>,
    } else {
    }
    return
  }
  func.func @transform_0(%arg0: i32) -> (i32, i32, i32) {
    %c0_i32 = arith.constant 0 : i32
    %c0_i32_0 = arith.constant 0 : i32
    %c0_i32_1 = arith.constant 0 : i32
    return %c0_i32, %arg0, %c0_i32_0 : i32, i32, i32
  }
  func.func @transform_1(%arg0: i32) -> (i32, i32) {
    %c0_i32 = arith.constant 0 : i32
    %c0_i32_0 = arith.constant 0 : i32
    %c0_i32_1 = arith.constant 0 : i32
    return %c0_i32, %c0_i32_0 : i32, i32
  }
  func.func @transform_2(%arg0: i32) -> (i32, i32) {
    %c0_i32 = arith.constant 0 : i32
    %c0_i32_0 = arith.constant 0 : i32
    %c0_i32_1 = arith.constant 0 : i32
    return %c0_i32, %c0_i32_0 : i32, i32
  }
  func.func @transform_3(%arg0: i32) -> (i32, i32) {
    %c0_i32 = arith.constant 0 : i32
    %c0_i32_0 = arith.constant 0 : i32
    %c0_i32_1 = arith.constant 0 : i32
    return %c0_i32, %c0_i32_0 : i32, i32
  }
  func.func @transform_4(%arg0: i32) -> (i32, i32, i32) {
    %c0_i32 = arith.constant 0 : i32
    %c0_i32_0 = arith.constant 0 : i32
    %c0_i32_1 = arith.constant 0 : i32
    return %c0_i32, %arg0, %c0_i32_0 : i32, i32, i32
  }
  func.func @transform_5(%arg0: i32) -> (i32, i32) {
    %c0_i32 = arith.constant 0 : i32
    %c0_i32_0 = arith.constant 0 : i32
    %c0_i32_1 = arith.constant 0 : i32
    return %c0_i32, %c0_i32_0 : i32, i32
  }
  func.func @transform_6(%arg0: i32) -> (i32, i32) {
    %c0_i32 = arith.constant 0 : i32
    %c0_i32_0 = arith.constant 0 : i32
    %c0_i32_1 = arith.constant 0 : i32
    return %c0_i32, %c0_i32_0 : i32, i32
  }
}

</mosaic_0001>

<bundles_post_ra>
// kernel: encoder_forward.3
= control target key start
LH: loop header
LB: loop body
LE: loop exit
PB: predicated region body
PF: predicated region fallthrough
CT: control target
= control target key end

     0   :  { %12 = vsyncpa [#allocation6], 0  ;;  %s2178_s0 = inlined_call_operand.vmem [shape: f32[2,16,32], index: 0, kind: input, shape index: {}]   ;;  %s2179_s1 = inlined_call_operand.vmem [shape: f32[32,128], index: 1, kind: input, shape index: {}]   ;;  %s2180_s2 = inlined_call_operand.vmem [shape: f32[32,128], index: 2, kind: input, shape index: {}]   ;;  %s2181_s3 = inlined_call_operand.vmem [shape: f32[1,128], index: 3, kind: input, shape index: {}]   ;;  %s2182_s4 = inlined_call_operand.hbm [shape: f32[2,16,32], index: 4, kind: output, shape index: {0}]   ;;  %s2183_s5 = inlined_call_operand.vmem [shape: f32[2,32], index: 5, kind: output, shape index: {1}]   ;;  %s2184_s6 = inlined_call_operand.vmem [shape: f32[2,32], index: 6, kind: output, shape index: {2}]  }
   0x1   :  { %14 = vsyncpa [#allocation6 + $0x1], 0  ;;  %s1773_s21 = smov 0   ;;  %s1775_s22 = smov 0  }
   0x2   :  { %s1777_s23 = smov 0   ;;  %s1779_s24 = smov 0  }
   0x3 LB: > { %s1794_s25 = sadd.s32 4294967295, %s1729_s24   ;;  %s1452_s26 = sadd.s32 4294967294, %s1729_s24   ;;  %s1729_s24 = sphi %s1779_s24, %s2190_s24   ;;  %s1725_s23 = sphi %s1777_s23, %s2189_s23   ;;  %s1721_s22 = sphi %s1775_s22, %s2188_s22   ;;  %s1717_s21 = sphi %s1773_s21, %s2187_s21  }
   0x4   : > { %s1798_s27 = sadd.s32 1, %s1729_s24   ;;  %s27_s28 = sadd.s32 1, %s1725_s23 }
   0x5   : > { %s24_s29 = ssub.s32 %s1729_s24, %s1798_s27  ;;  %p34_p0 = scmp.ne.s32.totalorder %s1725_s23, %s1721_s22 }
   0x6   : > { %p25_p1 = scmp.eq.s32.totalorder %s24_s29, 0  ;;  %p35_p2 = scmp.eq.s32.totalorder %s1729_s24, 0 }
   0x7   : > { %p127_p3 = scmp.eq.s32.totalorder %s1794_s25, 1  ;;  %p132_p4 = scmp.ne.s32.totalorder %s1721_s22, %s1717_s21 }
   0x8   : > { %s1810_s30 = scalar_select %p25_p1, %s1725_s23, %s27_s28  }
   0x9   : > { %p36_p5 = por %p35_p2, %p34_p0  ;;  %p1812_p6 = por %p127_p3, %p34_p0 }
   0xa   : > { %p133_p7 = scmp.eq.s32.totalorder %s1452_s26, 1  ;;  %p1454_p9 = scmp.ge.s32.totalorder %s1729_s24, 2 }
   0xc   : > { %p1816_p8 = por %p133_p7, %p132_p4  ;;  %200 = sbr.rel (%p1454_p9) target bundleno = 23 (0x17), region = 28 }
  0x11   : > { %203 = sbr.rel (!%p36_p5) target bundleno = 23 (0x17), region = 32  ;;  %s205_s9 = sand.u32 (%p36_p5), 1, %s1725_s23  }
  0x12   : > { %s1456_s10 = sshll.u32 (%p36_p5), %s1729_s24, 3  ;;  %s1455_s11 = sshll.u32 (%p36_p5), %s205_s9, 4 }
  0x13   : > { %s209_s14 = scalar_lea.vmem (%p36_p5), %s2178_s0, %s1456_s10  ;;  %s207_s15 = scalar_lea.vmem (%p36_p5), [#allocation4], %s1455_s11 }
  0x14   : > { %v240_v0 = vld [vmem:[%s209_s14] sm:$0xff] (%p36_p5)  ;;  %v242_v1 = vld [vmem:[%s209_s14 + $0x10] sm:$0xff] (%p36_p5) }
  0x15   : > { %241 = vst [vmem:[%s207_s15] sm:$0xff] (%p36_p5), %v240_v0 }
  0x16   : > { %243 = vst [vmem:[%s207_s15 + $0x8] sm:$0xff] %v242_v1 }
  0x17 PF: > { %p1457_p10 = scmp.ge.s32.totalorder %s1729_s24, 1  ;;  %p248_p11 = scmp.lt.s32.totalorder %s1729_s24, 3 }
  0x19   : > { %p249_p12 = pnand %p1457_p10, %p248_p11 }
  0x1a   : > { %s255_s16 = sand.u32 (!%p249_p12), 1, %s1721_s22   ;;  %p1460_p13 = scmp.ne.s32.totalorder (!%p249_p12), %s1794_s25, 0 }
  0x1b   : > { %252 = sbr.rel (%p249_p12) target bundleno = 4759 (0x1297), region = 70  ;;  %s1833_s17 = sshll.u32 (!%p249_p12), %s255_s16, 4 }
  0x1c   : > { %s257_s18 = scalar_lea.vmem (!%p249_p12), [#allocation4], %s1833_s17  ;;  %s1837_s19 = scalar_lea.vmem (!%p249_p12), [#allocation5], %s1833_s17 }
  0x20   : > { %287 = sbr.rel (%p1460_p13) target bundleno = 40 (0x28), region = 78 }
  0x25   : > { %vm288_vm0 = vcmask 254976   ;;  %v1731_v2 = vmov 0.0  }
  0x26   : > { %289 = vst.msk [vmem:[#allocation2] sm:$0x3] %vm288_vm0, %v1731_v2 }
  0x27   : > { %290 = vst.msk [vmem:[#allocation3] sm:$0x3] %vm288_vm0, %v1731_v2 }
  0x28 PF: > { %v294_v3 = vld [vmem:[%s2179_s1 + $0x18] sm:$0xff]  ;;  %v293_v4 = vld [vmem:[%s2179_s1 + $0x10] sm:$0xff]  ;;  %v292_v7 = vld [vmem:[%s2179_s1 + $0x8] sm:$0xff]  ;;  %vm305_vm1 = vcmask 261120   ;;  %s1732_s10 = smov 32   ;;  %s1733_s11 = smov 64  }
  0x29   : > { %v298_v5 = vld [vmem:[%s2180_s2 + $0x18] sm:$0xff]  ;;  %324 = vmatpush.msra.mxu0 %v294_v3  ;;  %v297_v6 = vld [vmem:[%s2180_s2 + $0x10] sm:$0xff]  ;;  %v296_v8 = vld [vmem:[%s2180_s2 + $0x8] sm:$0xff]  ;;  %vm460_vm10 = vcmask 1041409   ;;  %s1734_s12 = smov 96   ;;  %p1487_p0 = scmp.ne.s32.totalorder %s1794_s25, 1 }
  0x2a   : > { %352 = vmatpush.msra.mxu1 %v298_v5  ;;  %478 = vmatpush.msra.mxu2 %v298_v5  ;;  %v291_v10 = vld [vmem:[%s2179_s1] sm:$0xff] }
  0x2b   : > { %601 = vmatpush.msra.mxu3 %v298_v5  ;;  %325 = vmatpush.msra.mxu0 %v293_v4  ;;  %v295_v11 = vld [vmem:[%s2180_s2] sm:$0xff] }
  0x2c   : > { %353 = vmatpush.msra.mxu1 %v297_v6  ;;  %479 = vmatpush.msra.mxu2 %v297_v6  ;;  %v300_v13 = vld [vmem:[%s257_s18] sm:$0xff]  ;;  %v301_v15 = vld [vmem:[%s257_s18 + $0x8] sm:$0xff] }
  0x2d   : > { %602 = vmatpush.msra.mxu3 %v297_v6  ;;  %326 = vmatpush.msra.mxu0 %v292_v7  ;;  %v335_v14 = vld [vmem:[#allocation2] sm:$0x3] }
  0x2e   : > { %v336_v9 = vld [vmem:[#allocation3] sm:$0x3]  ;;  %354 = vmatpush.msra.mxu1 %v296_v8  ;;  %480 = vmatpush.msra.mxu2 %v296_v8  ;;  %v1538_v18 = vld [vmem:[%s2181_s3] ss:$0 sm:$0xff] }
  0x2f   : > { %v407_v12 = vrot.slane %v336_v9, 1  ;;  %327 = vmatpush.msra.mxu0 %v291_v10  ;;  %603 = vmatpush.msra.mxu3 %v296_v8 }
  0x30   : > { %355 = vmatpush.msra.mxu1 %v295_v11  ;;  %1461 = vmatmul.msk.f32.vlgmr.msra.gmra.mxu0 %vm305_vm1, %v300_v13 }
  0x31   : > { %410 = vrot.lane.b32.xlu1 %v407_v12, %s1732_s10  ;;  %1463 = vmatmul.msk.f32.vlgmr.msra.gmra.mxu1 %vm305_vm1, %v335_v14 }
  0x32   : > { %481 = vmatpush.msra.mxu2 %v295_v11  ;;  %726 = vmatpush.msrb.mxu1 %v298_v5 }
  0x33   : > { %604 = vmatpush.msra.mxu3 %v295_v11  ;;  %1101 = vmatpush.msrb.mxu0 %v298_v5 }
  0x34   : > { %851 = vmatpush.msrb.mxu2 %v298_v5  ;;  %727 = vmatpush.msrb.mxu1 %v297_v6 }
  0x35   : > { %976 = vmatpush.msrb.mxu3 %v298_v5  ;;  %1102 = vmatpush.msrb.mxu0 %v297_v6 }
  0x36   : > { %852 = vmatpush.msrb.mxu2 %v297_v6  ;;  %728 = vmatpush.msrb.mxu1 %v296_v8 }
  0x37   : > { %977 = vmatpush.msrb.mxu3 %v297_v6  ;;  %1103 = vmatpush.msrb.mxu0 %v296_v8 }
  0x38   : > { %853 = vmatpush.msrb.mxu2 %v296_v8  ;;  %1462 = vmatmul.msk.f32.gmra.mxu0 %vm305_vm1, %v301_v15 }
  0x39   : > { %408 = vrot.lane.b32.xlu1 %v336_v9, %s1732_s10  ;;  %729 = vmatpush.msrb.mxu1 %v295_v11 }
  0x3a   : > { %854 = vmatpush.msrb.mxu2 %v295_v11  ;;  %978 = vmatpush.msrb.mxu3 %v296_v8 }
  0x3b   : > { %1226 = vmatpush.msra.mxu1 %v298_v5  ;;  %1104 = vmatpush.msrb.mxu0 %v295_v11 }
  0x3c   : > { %979 = vmatpush.msrb.mxu3 %v295_v11 }
  0x3d   : > { %1227 = vmatpush.msra.mxu1 %v297_v6 }
  0x3f   : > { %1228 = vmatpush.msra.mxu1 %v296_v8 }
  0x41   : > { %1229 = vmatpush.msra.mxu1 %v295_v11 }
  0xa3   : > { %v411_v57 = vpop.permute.xlu1 %410 }
  0xab   : > { %v409_v61 = vpop.permute.xlu1 %408 }
  0xad   : > { %v329_v16 = vpop.f32.mrf.mxu0 }
  0xae   : > { %v357_v17 = vpop.f32.mrf.mxu1  ;;  %v1879_v23 = vadd.f32 %v1538_v18, %v329_v16 }
  0xaf   : > { %v361_v19 = vrot.slane %v357_v17, 1 }
  0xb0   : > { %v364_v24 = vadd.f32 %v357_v17, %v1879_v23 }
  0xb2   : > { %v1464_v28 = vmul.f32 -1.442695, %v364_v24 }
  0xb5   : > { %v332_v20 = vpop.f32.mrf.mxu0 }
  0xb6   : > { %v1876_v21 = vadd.f32 %v1538_v18, %v332_v20 }
  0xb8   : > { %v365_v22 = vadd.f32 %v361_v19, %v1876_v21 }
  0xba   : > { %1539 = vtanh.f32 %v365_v22  ;;  %v1465_v27 = vmul.f32 -1.442695, %v365_v22 }
  0xbb   : > { %1541 = vtanh.f32 %v364_v24 }
  0xbc   : > { %1543 = vpow2.f32 %v1465_v27 }
  0xbd   : > { %1545 = vpow2.f32 %v1464_v28 }
  0xc0   : > { %v1540_v25 = vpop.eup %1539 }
  0xc1   : > { %420 = vrot.lane.b32.xlu0 %v1540_v25, %s1733_s11  ;;  %v1542_v26 = vpop.eup %1541 }
  0xc2   : > { %v1544_v29 = vpop.eup %1543 }
  0xc3   : > { %v373_v30 = vadd.f32 1.0, %v1544_v29  ;;  %v1546_v31 = vpop.eup %1545 }
  0xc4   : > { %v372_v32 = vadd.f32 1.0, %v1546_v31 }
  0xc5   : > { %1547 = vrcp.f32 %v373_v30  ;;  %v400_v41 = vand.u32 2147483648, %v373_v30  ;;  %vm394_vm3 = vweird.f32 %v373_v30  ;;  %v398_v42 = vand.u32 2147483647, %v373_v30 }
  0xc6   : > { %1549 = vrcp.f32 %v372_v32  ;;  %v385_v50 = vand.u32 2147483648, %v372_v32  ;;  %vm379_vm7 = vweird.f32 %v372_v32  ;;  %v383_v51 = vand.u32 2147483647, %v372_v32 }
  0xc7   : > { %v401_v45 = vor.u32 1.1754944e-38, %v400_v41  ;;  %vm399_vm5 = vcmp.eq.f32.partialorder %v398_v42, 8.507059e+37 }
  0xc8   : > { %v386_v53 = vor.u32 1.1754944e-38, %v385_v50  ;;  %vm384_vm9 = vcmp.eq.f32.partialorder %v383_v51, 8.507059e+37 }
  0xc9   : > { %418 = vrot.lane.b32.xlu0 %v1542_v26, %s1733_s11 }
  0xcb   : > { %v1548_v33 = vpop.eup %1547 }
  0xcc   : > { %v390_v34 = vmul.f32 %v1548_v33, %v373_v30  ;;  %v1550_v36 = vpop.eup %1549  ;;  %vm395_vm2 = vweird.f32 %v1548_v33 }
  0xcd   : > { %v375_v38 = vmul.f32 %v1550_v36, %v372_v32  ;;  %vm396_vm4 = vmor %vm394_vm3, %vm395_vm2  ;;  %vm380_vm6 = vweird.f32 %v1550_v36 }
  0xce   : > { %v391_v35 = vsub.f32 1.0, %v390_v34  ;;  %vm381_vm8 = vmor %vm379_vm7, %vm380_vm6 }
  0xcf   : > { %v376_v40 = vsub.f32 1.0, %v375_v38 }
  0xd0   : > { %v392_v37 = vmul.f32 %v1548_v33, %v391_v35 }
  0xd1   : > { %v377_v44 = vmul.f32 %v1550_v36, %v376_v40 }
  0xd2   : > { %v393_v39 = vadd.f32 %v1548_v33, %v392_v37 }
  0xd3   : > { %v378_v48 = vadd.f32 %v1550_v36, %v377_v44 }
  0xd4   : > { %v397_v43 = vsel %vm396_vm4, %v1548_v33, %v393_v39 }
  0xd5   : > { %v402_v46 = vsel %vm399_vm5, %v401_v45, %v397_v43  ;;  %v382_v52 = vsel %vm381_vm8, %v1550_v36, %v378_v48 }
  0xd6   : > { %v387_v54 = vsel %vm384_vm9, %v386_v53, %v382_v52  ;;  %v415_v58 = vmul.f32 %v411_v57, %v402_v46 }
  0xd7   : > { %v414_v62 = vmul.f32 %v409_v61, %v387_v54 }
 0x133   : > { %v421_v47 = vpop.permute.xlu0 %420 }
 0x134   : > { %v425_v49 = vmul.f32 %v421_v47, %v402_v46 }
 0x136   : > { %430 = vrot.lane.b32.xlu2 %v425_v49, %s1732_s10 }
 0x13b   : > { %v419_v55 = vpop.permute.xlu0 %418 }
 0x13c   : > { %v424_v56 = vmul.f32 %v419_v55, %v387_v54 }
 0x13e   : > { %428 = vrot.lane.b32.xlu2 %v424_v56, %s1732_s10 }
 0x190   : > { %v431_v59 = vpop.permute.xlu2 %430 }
 0x191   : > { %v1886_v60 = vadd.f32 %v431_v59, %v415_v58 }
 0x193   : > { %1551 = vtanh.f32 %v1886_v60  ;;  %v535_v53 = vrot.slane %v1886_v60, 7 }
 0x198   : > { %v429_v63 = vpop.permute.xlu2 %428 }
 0x199   : > { %v1552_v0 = vpop.eup %1551  ;;  %v1889_v1 = vadd.f32 %v429_v63, %v414_v62 }
 0x19a   : > { %442 = vrot.lane.b32.xlu0 %v1552_v0, %s1733_s11 }
 0x19b   : > { %1553 = vtanh.f32 %v1889_v1  ;;  %v534_v48 = vrot.slane %v1889_v1, 7 }
 0x1a1   : > { %v1554_v2 = vpop.eup %1553 }
 0x1a2   : > { %440 = vrot.lane.b32.xlu1 %v1554_v2, %s1733_s11 }
 0x20c   : > { %v443_v3 = vpop.permute.xlu0 %442 }
 0x20d   : > { %v1894_v4 = vmul.f32 %v443_v3, %v402_v46 }
 0x20f   : > { %v459_v6 = vrot.slane %v1894_v4, 7 }
 0x214   : > { %v441_v5 = vpop.permute.xlu1 %440 }
 0x215   : > { %v1897_v7 = vmul.f32 %v441_v5, %v387_v54 }
 0x217   : > { %v461_v8 = vsel %vm460_vm10, %v459_v6, %v1897_v7 }
 0x218   : > { %462 = vrot.lane.b32.xlu2 %v461_v8, %s1732_s10 }
 0x272   : > { %v463_v9 = vpop.permute.xlu2 %462 }
 0x273   : > { %1466 = vmatmul.msk.f32.vlgmr.msra.gmra.mxu2 %vm305_vm1, %v463_v9 }
 0x2f6   : > { %v483_v10 = vpop.f32.mrf.mxu2 }
 0x2f7   : > { %v487_v11 = vrot.slane %v483_v10, 7  ;;  %v491_v12 = vadd.f32 %v483_v10, %v1876_v21 }
 0x2f9   : > { %v490_v13 = vadd.f32 %v487_v11, %v1879_v23  ;;  %1555 = vtanh.f32 %v491_v12  ;;  %v1468_v16 = vmul.f32 -1.442695, %v491_v12 }
 0x2fb   : > { %1557 = vtanh.f32 %v490_v13  ;;  %v1467_v17 = vmul.f32 -1.442695, %v490_v13 }
 0x2fc   : > { %1559 = vpow2.f32 %v1468_v16 }
 0x2fd   : > { %1561 = vpow2.f32 %v1467_v17 }
 0x2ff   : > { %v1556_v14 = vpop.eup %1555 }
 0x300   : > { %544 = vrot.lane.b32.xlu1 %v1556_v14, %s1733_s11 }
 0x301   : > { %v1558_v15 = vpop.eup %1557 }
 0x302   : > { %542 = vrot.lane.b32.xlu0 %v1558_v15, %s1733_s11  ;;  %v1560_v18 = vpop.eup %1559 }
 0x303   : > { %v1562_v19 = vpop.eup %1561  ;;  %v499_v20 = vadd.f32 1.0, %v1560_v18 }
 0x304   : > { %v498_v22 = vadd.f32 1.0, %v1562_v19 }
 0x305   : > { %1563 = vrcp.f32 %v499_v20  ;;  %v526_v33 = vand.u32 2147483648, %v499_v20  ;;  %vm520_vm12 = vweird.f32 %v499_v20  ;;  %v524_v34 = vand.u32 2147483647, %v499_v20 }
 0x306   : > { %1565 = vrcp.f32 %v498_v22  ;;  %v511_v37 = vand.u32 2147483648, %v498_v22  ;;  %vm505_vm15 = vweird.f32 %v498_v22  ;;  %v509_v39 = vand.u32 2147483647, %v498_v22 }
 0x307   : > { %v527_v38 = vor.u32 1.1754944e-38, %v526_v33  ;;  %vm525_vm0 = vcmp.eq.f32.partialorder %v524_v34, 8.507059e+37 }
 0x308   : > { %v512_v44 = vor.u32 1.1754944e-38, %v511_v37  ;;  %vm510_vm3 = vcmp.eq.f32.partialorder %v509_v39, 8.507059e+37 }
 0x30b   : > { %v1564_v24 = vpop.eup %1563 }
 0x30c   : > { %v1566_v25 = vpop.eup %1565  ;;  %v516_v26 = vmul.f32 %v1564_v24, %v499_v20  ;;  %vm521_vm11 = vweird.f32 %v1564_v24 }
 0x30d   : > { %v501_v27 = vmul.f32 %v1566_v25, %v498_v22  ;;  %vm522_vm13 = vmor %vm520_vm12, %vm521_vm11  ;;  %vm506_vm14 = vweird.f32 %v1566_v25 }
 0x30e   : > { %v517_v28 = vsub.f32 1.0, %v516_v26  ;;  %vm507_vm2 = vmor %vm505_vm15, %vm506_vm14 }
 0x30f   : > { %v502_v29 = vsub.f32 1.0, %v501_v27 }
 0x310   : > { %v518_v30 = vmul.f32 %v1564_v24, %v517_v28 }
 0x311   : > { %v503_v31 = vmul.f32 %v1566_v25, %v502_v29 }
 0x312   : > { %v519_v32 = vadd.f32 %v1564_v24, %v518_v30 }
 0x313   : > { %v504_v35 = vadd.f32 %v1566_v25, %v503_v31 }
 0x314   : > { %v523_v36 = vsel %vm522_vm13, %v1564_v24, %v519_v32 }
 0x315   : > { %v528_v41 = vsel %vm525_vm0, %v527_v38, %v523_v36  ;;  %v508_v42 = vsel %vm507_vm2, %v1566_v25, %v504_v35 }
 0x316   : > { %v513_v46 = vsel %vm510_vm3, %v512_v44, %v508_v42  ;;  %v539_v54 = vmul.f32 %v535_v53, %v528_v41 }
 0x317   : > { %v538_v49 = vmul.f32 %v534_v48, %v513_v46 }
 0x372   : > { %v545_v40 = vpop.permute.xlu1 %544 }
 0x373   : > { %v549_v43 = vmul.f32 %v545_v40, %v528_v41 }
 0x374   : > { %v543_v45 = vpop.permute.xlu0 %542 }
 0x375   : > { %554 = vrot.lane.b32.xlu0 %v549_v43, %s1732_s10  ;;  %v548_v47 = vmul.f32 %v543_v45, %v513_v46 }
 0x377   : > { %552 = vrot.lane.b32.xlu2 %v548_v47, %s1732_s10 }
 0x3d1   : > { %v553_v50 = vpop.permute.xlu2 %552 }
 0x3d2   : > { %v1910_v51 = vadd.f32 %v553_v50, %v538_v49 }
 0x3d4   : > { %1567 = vtanh.f32 %v1910_v51  ;;  %v658_v47 = vrot.slane %v1910_v51, 7 }
 0x3da   : > { %v1568_v52 = vpop.eup %1567 }
 0x3db   : > { %564 = vrot.lane.b32.xlu1 %v1568_v52, %s1733_s11 }
 0x3e7   : > { %v555_v55 = vpop.permute.xlu0 %554 }
 0x3e8   : > { %v1915_v56 = vadd.f32 %v555_v55, %v539_v54 }
 0x3ea   : > { %1569 = vtanh.f32 %v1915_v56  ;;  %v659_v42 = vrot.slane %v1915_v56, 7 }
 0x3f0   : > { %v1570_v57 = vpop.eup %1569 }
 0x3f1   : > { %566 = vrot.lane.b32.xlu2 %v1570_v57, %s1733_s11 }
 0x44b   : > { %v567_v58 = vpop.permute.xlu2 %566 }
 0x44c   : > { %v1921_v62 = vmul.f32 %v567_v58, %v528_v41 }
 0x44d   : > { %v565_v59 = vpop.permute.xlu1 %564 }
 0x44e   : > { %v1919_v61 = vmul.f32 %v565_v59, %v513_v46 }
 0x450   : > { %v583_v63 = vrot.slane %v1919_v61, 1 }
 0x452   : > { %v584_v60 = vsel %vm460_vm10, %v1921_v62, %v583_v63 }
 0x453   : > { %585 = vrot.lane.b32.xlu0 %v584_v60, %s1732_s10 }
 0x4c5   : > { %v586_v0 = vpop.permute.xlu0 %585 }
 0x4c6   : > { %1469 = vmatmul.msk.f32.vlgmr.msra.gmra.mxu3 %vm305_vm1, %v586_v0 }
 0x549   : > { %v606_v1 = vpop.f32.mrf.mxu3 }
 0x54a   : > { %v610_v2 = vrot.slane %v606_v1, 6  ;;  %v611_v3 = vrot.slane %v606_v1, 7 }
 0x54c   : > { %v614_v5 = vadd.f32 %v610_v2, %v1879_v23  ;;  %v615_v6 = vadd.f32 %v611_v3, %v1876_v21 }
 0x54e   : > { %1571 = vtanh.f32 %v614_v5  ;;  %v1471_v10 = vmul.f32 -1.442695, %v615_v6  ;;  %v1470_v14 = vmul.f32 -1.442695, %v614_v5 }
 0x54f   : > { %1573 = vtanh.f32 %v615_v6 }
 0x550   : > { %1575 = vpow2.f32 %v1471_v10 }
 0x554   : > { %v1572_v8 = vpop.eup %1571 }
 0x555   : > { %v1574_v9 = vpop.eup %1573  ;;  %666 = vrot.lane.b32.xlu1 %v1572_v8, %s1733_s11 }
 0x556   : > { %668 = vrot.lane.b32.xlu2 %v1574_v9, %s1733_s11  ;;  %v1576_v11 = vpop.eup %1575 }
 0x557   : > { %v623_v12 = vadd.f32 1.0, %v1576_v11 }
 0x559   : > { %1577 = vrcp.f32 %v623_v12  ;;  %v650_v22 = vand.u32 2147483648, %v623_v12  ;;  %vm644_vm5 = vweird.f32 %v623_v12  ;;  %v648_v24 = vand.u32 2147483647, %v623_v12 }
 0x55a   : > { %1579 = vpow2.f32 %v1470_v14 }
 0x55b   : > { %v651_v26 = vor.u32 1.1754944e-38, %v650_v22  ;;  %vm649_vm7 = vcmp.eq.f32.partialorder %v648_v24, 8.507059e+37 }
 0x55f   : > { %v1578_v13 = vpop.eup %1577 }
 0x560   : > { %v640_v15 = vmul.f32 %v1578_v13, %v623_v12  ;;  %v1580_v17 = vpop.eup %1579  ;;  %vm645_vm4 = vweird.f32 %v1578_v13 }
 0x561   : > { %v622_v19 = vadd.f32 1.0, %v1580_v17  ;;  %vm646_vm6 = vmor %vm644_vm5, %vm645_vm4 }
 0x562   : > { %v641_v16 = vsub.f32 1.0, %v640_v15 }
 0x563   : > { %1581 = vrcp.f32 %v622_v19  ;;  %v635_v35 = vand.u32 2147483648, %v622_v19  ;;  %vm629_vm9 = vweird.f32 %v622_v19  ;;  %v633_v36 = vand.u32 2147483647, %v622_v19 }
 0x564   : > { %v642_v18 = vmul.f32 %v1578_v13, %v641_v16 }
 0x565   : > { %v636_v38 = vor.u32 1.1754944e-38, %v635_v35  ;;  %vm634_vm12 = vcmp.eq.f32.partialorder %v633_v36, 8.507059e+37 }
 0x566   : > { %v643_v20 = vadd.f32 %v1578_v13, %v642_v18 }
 0x568   : > { %v647_v25 = vsel %vm646_vm6, %v1578_v13, %v643_v20 }
 0x569   : > { %v652_v28 = vsel %vm649_vm7, %v651_v26, %v647_v25  ;;  %v1582_v29 = vpop.eup %1581 }
 0x56a   : > { %v625_v31 = vmul.f32 %v1582_v29, %v622_v19  ;;  %vm630_vm8 = vweird.f32 %v1582_v29  ;;  %v663_v43 = vmul.f32 %v659_v42, %v652_v28 }
 0x56b   : > { %vm631_vm11 = vmor %vm629_vm9, %vm630_vm8 }
 0x56c   : > { %v626_v32 = vsub.f32 1.0, %v625_v31 }
 0x56e   : > { %v627_v33 = vmul.f32 %v1582_v29, %v626_v32 }
 0x570   : > { %v628_v34 = vadd.f32 %v1582_v29, %v627_v33 }
 0x572   : > { %v632_v37 = vsel %vm631_vm11, %v1582_v29, %v628_v34 }
 0x573   : > { %v637_v40 = vsel %vm634_vm12, %v636_v38, %v632_v37 }
 0x574   : > { %v662_v48 = vmul.f32 %v658_v47, %v637_v40 }
 0x5b0   : > { %v669_v27 = vpop.permute.xlu2 %668 }
 0x5b1   : > { %v673_v30 = vmul.f32 %v669_v27, %v652_v28 }
 0x5b3   : > { %678 = vrot.lane.b32.xlu1 %v673_v30, %s1732_s10 }
 0x5c7   : > { %v667_v39 = vpop.permute.xlu1 %666 }
 0x5c8   : > { %v672_v41 = vmul.f32 %v667_v39, %v637_v40 }
 0x5ca   : > { %676 = vrot.lane.b32.xlu0 %v672_v41, %s1732_s10 }
 0x625   : > { %v679_v44 = vpop.permute.xlu1 %678 }
 0x626   : > { %v1935_v45 = vadd.f32 %v679_v44, %v663_v43 }
 0x628   : > { %1583 = vtanh.f32 %v1935_v45 }
 0x62e   : > { %v1584_v46 = vpop.eup %1583 }
 0x62f   : > { %690 = vrot.lane.b32.xlu0 %v1584_v46, %s1733_s11 }
 0x63c   : > { %v677_v49 = vpop.permute.xlu0 %676 }
 0x63d   : > { %v1940_v50 = vadd.f32 %v677_v49, %v662_v48 }
 0x63f   : > { %1585 = vtanh.f32 %v1940_v50  ;;  %v783_v39 = vrot.slane %v1940_v50, 7 }
 0x645   : > { %v1586_v52 = vpop.eup %1585 }
 0x646   : > { %688 = vrot.lane.b32.xlu2 %v1586_v52, %s1733_s11 }
 0x6a0   : > { %v689_v53 = vpop.permute.xlu2 %688 }
 0x6a1   : > { %v691_v54 = vpop.permute.xlu0 %690  ;;  %v1944_v55 = vmul.f32 %v689_v53, %v637_v40  ;;  %v784_v40 = vrot.slane %v1935_v45, 7 }
 0x6a2   : > { %v1946_v56 = vmul.f32 %v691_v54, %v652_v28 }
 0x6a3   : > { %v707_v57 = vrot.slane %v1944_v55, 2 }
 0x6a4   : > { %v708_v58 = vrot.slane %v1946_v56, 1 }
 0x6a6   : > { %v709_v51 = vsel %vm460_vm10, %v708_v58, %v707_v57 }
 0x6a7   : > { %710 = vrot.lane.b32.xlu1 %v709_v51, %s1732_s10 }
 0x719   : > { %v711_v59 = vpop.permute.xlu1 %710 }
 0x71a   : > { %1472 = vmatmul.msk.f32.vlgmr.msrb.gmra.mxu1 %vm305_vm1, %v711_v59 }
 0x797   : > { %v731_v63 = vpop.f32.mrf.mxu1 }
 0x798   : > { %v735_v60 = vrot.slane %v731_v63, 5  ;;  %v736_v0 = vrot.slane %v731_v63, 6 }
 0x79a   : > { %v739_v1 = vadd.f32 %v735_v60, %v1879_v23  ;;  %v740_v2 = vadd.f32 %v736_v0, %v1876_v21 }
 0x79c   : > { %1587 = vtanh.f32 %v739_v1  ;;  %v1473_v6 = vmul.f32 -1.442695, %v739_v1  ;;  %v1474_v11 = vmul.f32 -1.442695, %v740_v2 }
 0x79d   : > { %1589 = vtanh.f32 %v740_v2 }
 0x79e   : > { %1591 = vpow2.f32 %v1473_v6 }
 0x7a2   : > { %v1588_v3 = vpop.eup %1587 }
 0x7a3   : > { %v1590_v5 = vpop.eup %1589  ;;  %791 = vrot.lane.b32.xlu2 %v1588_v3, %s1733_s11 }
 0x7a4   : > { %793 = vrot.lane.b32.xlu0 %v1590_v5, %s1733_s11  ;;  %v1592_v8 = vpop.eup %1591 }
 0x7a5   : > { %v747_v9 = vadd.f32 1.0, %v1592_v8 }
 0x7a7   : > { %1593 = vrcp.f32 %v747_v9  ;;  %v760_v18 = vand.u32 2147483648, %v747_v9  ;;  %vm754_vm14 = vweird.f32 %v747_v9  ;;  %v758_v19 = vand.u32 2147483647, %v747_v9 }
 0x7a8   : > { %1595 = vpow2.f32 %v1474_v11 }
 0x7a9   : > { %v761_v22 = vor.u32 1.1754944e-38, %v760_v18  ;;  %vm759_vm0 = vcmp.eq.f32.partialorder %v758_v19, 8.507059e+37 }
 0x7ad   : > { %v1594_v10 = vpop.eup %1593 }
 0x7ae   : > { %v750_v12 = vmul.f32 %v1594_v10, %v747_v9  ;;  %v1596_v15 = vpop.eup %1595  ;;  %vm755_vm13 = vweird.f32 %v1594_v10 }
 0x7af   : > { %v748_v16 = vadd.f32 1.0, %v1596_v15  ;;  %vm756_vm15 = vmor %vm754_vm14, %vm755_vm13 }
 0x7b0   : > { %v751_v13 = vsub.f32 1.0, %v750_v12 }
 0x7b1   : > { %1597 = vrcp.f32 %v748_v16  ;;  %v775_v32 = vand.u32 2147483648, %v748_v16  ;;  %vm769_vm3 = vweird.f32 %v748_v16  ;;  %v773_v33 = vand.u32 2147483647, %v748_v16 }
 0x7b2   : > { %v752_v14 = vmul.f32 %v1594_v10, %v751_v13 }
 0x7b3   : > { %v776_v35 = vor.u32 1.1754944e-38, %v775_v32  ;;  %vm774_vm5 = vcmp.eq.f32.partialorder %v773_v33, 8.507059e+37 }
 0x7b4   : > { %v753_v17 = vadd.f32 %v1594_v10, %v752_v14 }
 0x7b6   : > { %v757_v20 = vsel %vm756_vm15, %v1594_v10, %v753_v17 }
 0x7b7   : > { %v762_v25 = vsel %vm759_vm0, %v761_v22, %v757_v20  ;;  %v1598_v27 = vpop.eup %1597 }
 0x7b8   : > { %v765_v28 = vmul.f32 %v1598_v27, %v748_v16  ;;  %vm770_vm2 = vweird.f32 %v1598_v27  ;;  %v787_v41 = vmul.f32 %v783_v39, %v762_v25 }
 0x7b9   : > { %vm771_vm4 = vmor %vm769_vm3, %vm770_vm2 }
 0x7ba   : > { %v766_v29 = vsub.f32 1.0, %v765_v28 }
 0x7bc   : > { %v767_v30 = vmul.f32 %v1598_v27, %v766_v29 }
 0x7be   : > { %v768_v31 = vadd.f32 %v1598_v27, %v767_v30 }
 0x7c0   : > { %v772_v34 = vsel %vm771_vm4, %v1598_v27, %v768_v31 }
 0x7c1   : > { %v777_v37 = vsel %vm774_vm5, %v776_v35, %v772_v34 }
 0x7c2   : > { %v788_v42 = vmul.f32 %v784_v40, %v777_v37 }
 0x7fd   : > { %v792_v24 = vpop.permute.xlu2 %791 }
 0x7fe   : > { %v797_v26 = vmul.f32 %v792_v24, %v762_v25 }
 0x800   : > { %801 = vrot.lane.b32.xlu1 %v797_v26, %s1732_s10 }
 0x816   : > { %v794_v36 = vpop.permute.xlu0 %793 }
 0x817   : > { %v798_v38 = vmul.f32 %v794_v36, %v777_v37 }
 0x819   : > { %803 = vrot.lane.b32.xlu2 %v798_v38, %s1732_s10 }
 0x872   : > { %v802_v43 = vpop.permute.xlu1 %801 }
 0x873   : > { %v804_v44 = vpop.permute.xlu2 %803  ;;  %v1961_v46 = vadd.f32 %v802_v43, %v787_v41 }
 0x874   : > { %v1963_v47 = vadd.f32 %v804_v44, %v788_v42 }
 0x875   : > { %1599 = vtanh.f32 %v1961_v46  ;;  %v908_v38 = vrot.slane %v1961_v46, 7 }
 0x876   : > { %1601 = vtanh.f32 %v1963_v47  ;;  %v909_v43 = vrot.slane %v1963_v47, 7 }
 0x87b   : > { %v1600_v48 = vpop.eup %1599 }
 0x87c   : > { %v1602_v49 = vpop.eup %1601  ;;  %813 = vrot.lane.b32.xlu0 %v1600_v48, %s1733_s11 }
 0x87d   : > { %815 = vrot.lane.b32.xlu1 %v1602_v49, %s1733_s11 }
 0x8ee   : > { %v814_v50 = vpop.permute.xlu0 %813 }
 0x8ef   : > { %v816_v45 = vpop.permute.xlu1 %815  ;;  %v1969_v52 = vmul.f32 %v814_v50, %v762_v25 }
 0x8f0   : > { %v1971_v53 = vmul.f32 %v816_v45, %v777_v37 }
 0x8f1   : > { %v832_v54 = vrot.slane %v1969_v52, 3 }
 0x8f2   : > { %v833_v57 = vrot.slane %v1971_v53, 2 }
 0x8f4   : > { %v834_v58 = vsel %vm460_vm10, %v833_v57, %v832_v54 }
 0x8f5   : > { %835 = vrot.lane.b32.xlu2 %v834_v58, %s1732_s10 }
 0x94f   : > { %v836_v51 = vpop.permute.xlu2 %835 }
 0x950   : > { %1475 = vmatmul.msk.f32.vlgmr.msrb.gmra.mxu2 %vm305_vm1, %v836_v51 }
 0x9d3   : > { %v856_v59 = vpop.f32.mrf.mxu2 }
 0x9d4   : > { %v860_v63 = vrot.slane %v856_v59, 4  ;;  %v861_v60 = vrot.slane %v856_v59, 5 }
 0x9d6   : > { %v864_v0 = vadd.f32 %v860_v63, %v1879_v23  ;;  %v865_v1 = vadd.f32 %v861_v60, %v1876_v21 }
 0x9d8   : > { %1603 = vtanh.f32 %v864_v0  ;;  %v1476_v5 = vmul.f32 -1.442695, %v864_v0  ;;  %v1477_v6 = vmul.f32 -1.442695, %v865_v1 }
 0x9d9   : > { %1605 = vtanh.f32 %v865_v1 }
 0x9da   : > { %1607 = vpow2.f32 %v1476_v5 }
 0x9db   : > { %1609 = vpow2.f32 %v1477_v6 }
 0x9de   : > { %v1604_v2 = vpop.eup %1603 }
 0x9df   : > { %v1606_v3 = vpop.eup %1605  ;;  %916 = vrot.lane.b32.xlu0 %v1604_v2, %s1733_s11 }
 0x9e0   : > { %918 = vrot.lane.b32.xlu1 %v1606_v3, %s1733_s11  ;;  %v1608_v8 = vpop.eup %1607 }
 0x9e1   : > { %v1610_v9 = vpop.eup %1609  ;;  %v872_v10 = vadd.f32 1.0, %v1608_v8 }
 0x9e2   : > { %v873_v11 = vadd.f32 1.0, %v1610_v9 }
 0x9e3   : > { %1611 = vrcp.f32 %v872_v10  ;;  %v885_v24 = vand.u32 2147483648, %v872_v10  ;;  %vm879_vm8 = vweird.f32 %v872_v10  ;;  %v883_v26 = vand.u32 2147483647, %v872_v10 }
 0x9e4   : > { %1613 = vrcp.f32 %v873_v11  ;;  %v900_v25 = vand.u32 2147483648, %v873_v11  ;;  %vm894_vm9 = vweird.f32 %v873_v11  ;;  %v898_v27 = vand.u32 2147483647, %v873_v11 }
 0x9e5   : > { %v886_v30 = vor.u32 1.1754944e-38, %v885_v24  ;;  %vm884_vm13 = vcmp.eq.f32.partialorder %v883_v26, 8.507059e+37 }
 0x9e6   : > { %v901_v31 = vor.u32 1.1754944e-38, %v900_v25  ;;  %vm899_vm14 = vcmp.eq.f32.partialorder %v898_v27, 8.507059e+37 }
 0x9e9   : > { %v1612_v12 = vpop.eup %1611 }
 0x9ea   : > { %v1614_v13 = vpop.eup %1613  ;;  %v875_v14 = vmul.f32 %v1612_v12, %v872_v10  ;;  %vm880_vm6 = vweird.f32 %v1612_v12 }
 0x9eb   : > { %v890_v15 = vmul.f32 %v1614_v13, %v873_v11  ;;  %vm895_vm7 = vweird.f32 %v1614_v13  ;;  %vm881_vm11 = vmor %vm879_vm8, %vm880_vm6 }
 0x9ec   : > { %v876_v16 = vsub.f32 1.0, %v875_v14  ;;  %vm896_vm12 = vmor %vm894_vm9, %vm895_vm7 }
 0x9ed   : > { %v891_v17 = vsub.f32 1.0, %v890_v15 }
 0x9ee   : > { %v877_v18 = vmul.f32 %v1612_v12, %v876_v16 }
 0x9ef   : > { %v892_v19 = vmul.f32 %v1614_v13, %v891_v17 }
 0x9f0   : > { %v878_v20 = vadd.f32 %v1612_v12, %v877_v18 }
 0x9f1   : > { %v893_v22 = vadd.f32 %v1614_v13, %v892_v19 }
 0x9f2   : > { %v882_v28 = vsel %vm881_vm11, %v1612_v12, %v878_v20 }
 0x9f3   : > { %v897_v29 = vsel %vm896_vm12, %v1614_v13, %v893_v22  ;;  %v887_v33 = vsel %vm884_vm13, %v886_v30, %v882_v28 }
 0x9f4   : > { %v902_v35 = vsel %vm899_vm14, %v901_v31, %v897_v29  ;;  %v912_v39 = vmul.f32 %v908_v38, %v887_v33 }
 0x9f5   : > { %v913_v44 = vmul.f32 %v909_v43, %v902_v35 }
 0xa51   : > { %v917_v32 = vpop.permute.xlu0 %916 }
 0xa52   : > { %v919_v34 = vpop.permute.xlu1 %918  ;;  %v922_v36 = vmul.f32 %v917_v32, %v887_v33 }
 0xa53   : > { %v923_v37 = vmul.f32 %v919_v34, %v902_v35 }
 0xa54   : > { %926 = vrot.lane.b32.xlu2 %v922_v36, %s1732_s10 }
 0xa55   : > { %928 = vrot.lane.b32.xlu0 %v923_v37, %s1732_s10 }
 0xaae   : > { %v927_v40 = vpop.permute.xlu2 %926 }
 0xaaf   : > { %v1985_v41 = vadd.f32 %v927_v40, %v912_v39 }
 0xab1   : > { %1615 = vtanh.f32 %v1985_v41 }
 0xab7   : > { %v1616_v42 = vpop.eup %1615 }
 0xab8   : > { %938 = vrot.lane.b32.xlu1 %v1616_v42, %s1733_s11 }
 0xac7   : > { %v929_v48 = vpop.permute.xlu0 %928 }
 0xac8   : > { %v1990_v49 = vadd.f32 %v929_v48, %v913_v44  ;;  %v1033_v48 = vrot.slane %v1985_v41, 7 }
 0xaca   : > { %1617 = vtanh.f32 %v1990_v49  ;;  %v1034_v39 = vrot.slane %v1990_v49, 7 }
 0xad0   : > { %v1618_v50 = vpop.eup %1617 }
 0xad1   : > { %940 = vrot.lane.b32.xlu2 %v1618_v50, %s1733_s11 }
 0xb2a   : > { %v939_v46 = vpop.permute.xlu1 %938 }
 0xb2b   : > { %v941_v45 = vpop.permute.xlu2 %940  ;;  %v1994_v54 = vmul.f32 %v939_v46, %v887_v33 }
 0xb2c   : > { %v1996_v57 = vmul.f32 %v941_v45, %v902_v35 }
 0xb2d   : > { %v957_v58 = vrot.slane %v1994_v54, 4 }
 0xb2e   : > { %v958_v51 = vrot.slane %v1996_v57, 3 }
 0xb30   : > { %v959_v47 = vsel %vm460_vm10, %v958_v51, %v957_v58 }
 0xb31   : > { %960 = vrot.lane.b32.xlu0 %v959_v47, %s1732_s10 }
 0xba3   : > { %v961_v59 = vpop.permute.xlu0 %960 }
 0xba4   : > { %1478 = vmatmul.msk.f32.vlgmr.msrb.gmra.mxu3 %vm305_vm1, %v961_v59 }
 0xc27   : > { %v981_v63 = vpop.f32.mrf.mxu3 }
 0xc28   : > { %v985_v60 = vrot.slane %v981_v63, 3  ;;  %v986_v0 = vrot.slane %v981_v63, 4 }
 0xc2a   : > { %v989_v1 = vadd.f32 %v985_v60, %v1879_v23  ;;  %v990_v2 = vadd.f32 %v986_v0, %v1876_v21 }
 0xc2c   : > { %1619 = vtanh.f32 %v989_v1  ;;  %v1480_v6 = vmul.f32 -1.442695, %v990_v2  ;;  %v1479_v11 = vmul.f32 -1.442695, %v989_v1 }
 0xc2d   : > { %1621 = vtanh.f32 %v990_v2 }
 0xc2e   : > { %1623 = vpow2.f32 %v1480_v6 }
 0xc32   : > { %v1620_v3 = vpop.eup %1619 }
 0xc33   : > { %v1622_v5 = vpop.eup %1621  ;;  %1041 = vrot.lane.b32.xlu1 %v1620_v3, %s1733_s11 }
 0xc34   : > { %1043 = vrot.lane.b32.xlu2 %v1622_v5, %s1733_s11  ;;  %v1624_v8 = vpop.eup %1623 }
 0xc35   : > { %v998_v9 = vadd.f32 1.0, %v1624_v8 }
 0xc37   : > { %1625 = vrcp.f32 %v998_v9  ;;  %v1025_v18 = vand.u32 2147483648, %v998_v9  ;;  %vm1019_vm0 = vweird.f32 %v998_v9  ;;  %v1023_v19 = vand.u32 2147483647, %v998_v9 }
 0xc38   : > { %1627 = vpow2.f32 %v1479_v11 }
 0xc39   : > { %v1026_v22 = vor.u32 1.1754944e-38, %v1025_v18  ;;  %vm1024_vm3 = vcmp.eq.f32.partialorder %v1023_v19, 8.507059e+37 }
 0xc3d   : > { %v1626_v10 = vpop.eup %1625 }
 0xc3e   : > { %v1015_v12 = vmul.f32 %v1626_v10, %v998_v9  ;;  %v1628_v14 = vpop.eup %1627  ;;  %vm1020_vm15 = vweird.f32 %v1626_v10 }
 0xc3f   : > { %v997_v16 = vadd.f32 1.0, %v1628_v14  ;;  %vm1021_vm2 = vmor %vm1019_vm0, %vm1020_vm15 }
 0xc40   : > { %v1016_v13 = vsub.f32 1.0, %v1015_v12 }
 0xc41   : > { %1629 = vrcp.f32 %v997_v16  ;;  %v1010_v32 = vand.u32 2147483648, %v997_v16  ;;  %vm1004_vm5 = vweird.f32 %v997_v16  ;;  %v1008_v33 = vand.u32 2147483647, %v997_v16 }
 0xc42   : > { %v1017_v15 = vmul.f32 %v1626_v10, %v1016_v13 }
 0xc43   : > { %v1011_v35 = vor.u32 1.1754944e-38, %v1010_v32  ;;  %vm1009_vm7 = vcmp.eq.f32.partialorder %v1008_v33, 8.507059e+37 }
 0xc44   : > { %v1018_v17 = vadd.f32 %v1626_v10, %v1017_v15 }
 0xc46   : > { %v1022_v20 = vsel %vm1021_vm2, %v1626_v10, %v1018_v17 }
 0xc47   : > { %v1027_v25 = vsel %vm1024_vm3, %v1026_v22, %v1022_v20  ;;  %v1630_v26 = vpop.eup %1629 }
 0xc48   : > { %v1000_v28 = vmul.f32 %v1630_v26, %v997_v16  ;;  %vm1005_vm4 = vweird.f32 %v1630_v26  ;;  %v1038_v40 = vmul.f32 %v1034_v39, %v1027_v25 }
 0xc49   : > { %vm1006_vm6 = vmor %vm1004_vm5, %vm1005_vm4 }
 0xc4a   : > { %v1001_v29 = vsub.f32 1.0, %v1000_v28 }
 0xc4c   : > { %v1002_v30 = vmul.f32 %v1630_v26, %v1001_v29 }
 0xc4e   : > { %v1003_v31 = vadd.f32 %v1630_v26, %v1002_v30 }
 0xc50   : > { %v1007_v34 = vsel %vm1006_vm6, %v1630_v26, %v1003_v31 }
 0xc51   : > { %v1012_v37 = vsel %vm1009_vm7, %v1011_v35, %v1007_v34 }
 0xc52   : > { %v1037_v50 = vmul.f32 %v1033_v48, %v1012_v37 }
 0xc8e   : > { %v1044_v24 = vpop.permute.xlu2 %1043 }
 0xc8f   : > { %v1048_v27 = vmul.f32 %v1044_v24, %v1027_v25 }
 0xc91   : > { %1053 = vrot.lane.b32.xlu1 %v1048_v27, %s1732_s10 }
 0xca5   : > { %v1042_v36 = vpop.permute.xlu1 %1041 }
 0xca6   : > { %v1047_v38 = vmul.f32 %v1042_v36, %v1012_v37 }
 0xca8   : > { %1051 = vrot.lane.b32.xlu0 %v1047_v38, %s1732_s10 }
 0xd03   : > { %v1054_v42 = vpop.permute.xlu1 %1053 }
 0xd04   : > { %v2010_v43 = vadd.f32 %v1054_v42, %v1038_v40 }
 0xd06   : > { %1631 = vtanh.f32 %v2010_v43  ;;  %v1159_v48 = vrot.slane %v2010_v43, 7 }
 0xd0c   : > { %v1632_v44 = vpop.eup %1631 }
 0xd0d   : > { %1065 = vrot.lane.b32.xlu0 %v1632_v44, %s1733_s11 }
 0xd1a   : > { %v1052_v46 = vpop.permute.xlu0 %1051 }
 0xd1b   : > { %v2015_v45 = vadd.f32 %v1052_v46, %v1037_v50 }
 0xd1d   : > { %1633 = vtanh.f32 %v2015_v45  ;;  %v1158_v44 = vrot.slane %v2015_v45, 7 }
 0xd23   : > { %v1634_v58 = vpop.eup %1633 }
 0xd24   : > { %1063 = vrot.lane.b32.xlu2 %v1634_v58, %s1733_s11 }
 0xd7e   : > { %v1064_v49 = vpop.permute.xlu2 %1063 }
 0xd7f   : > { %v1066_v51 = vpop.permute.xlu0 %1065  ;;  %v2019_v47 = vmul.f32 %v1064_v49, %v1012_v37 }
 0xd80   : > { %v2021_v59 = vmul.f32 %v1066_v51, %v1027_v25 }
 0xd81   : > { %v1082_v63 = vrot.slane %v2019_v47, 5 }
 0xd82   : > { %v1083_v60 = vrot.slane %v2021_v59, 4 }
 0xd84   : > { %v1084_v41 = vsel %vm460_vm10, %v1083_v60, %v1082_v63 }
 0xd85   : > { %1085 = vrot.lane.b32.xlu1 %v1084_v41, %s1732_s10 }
 0xdf7   : > { %v1086_v0 = vpop.permute.xlu1 %1085 }
 0xdf8   : > { %1481 = vmatmul.msk.f32.vlgmr.msrb.gmra.mxu0 %vm305_vm1, %v1086_v0 }
 0xe75   : > { %v1106_v1 = vpop.f32.mrf.mxu0 }
 0xe76   : > { %v1110_v2 = vrot.slane %v1106_v1, 2  ;;  %v1111_v3 = vrot.slane %v1106_v1, 3 }
 0xe78   : > { %v1114_v5 = vadd.f32 %v1110_v2, %v1879_v23  ;;  %v1115_v6 = vadd.f32 %v1111_v3, %v1876_v21 }
 0xe7a   : > { %1635 = vtanh.f32 %v1114_v5  ;;  %v1482_v10 = vmul.f32 -1.442695, %v1114_v5  ;;  %v1483_v14 = vmul.f32 -1.442695, %v1115_v6 }
 0xe7b   : > { %1637 = vtanh.f32 %v1115_v6 }
 0xe7c   : > { %1639 = vpow2.f32 %v1482_v10 }
 0xe80   : > { %v1636_v8 = vpop.eup %1635 }
 0xe81   : > { %v1638_v9 = vpop.eup %1637  ;;  %1166 = vrot.lane.b32.xlu2 %v1636_v8, %s1733_s11 }
 0xe82   : > { %1168 = vrot.lane.b32.xlu0 %v1638_v9, %s1733_s11  ;;  %v1640_v11 = vpop.eup %1639 }
 0xe83   : > { %v1122_v12 = vadd.f32 1.0, %v1640_v11 }
 0xe85   : > { %1641 = vrcp.f32 %v1122_v12  ;;  %v1135_v22 = vand.u32 2147483648, %v1122_v12  ;;  %vm1129_vm9 = vweird.f32 %v1122_v12  ;;  %v1133_v24 = vand.u32 2147483647, %v1122_v12 }
 0xe86   : > { %1643 = vpow2.f32 %v1483_v14 }
 0xe87   : > { %v1136_v26 = vor.u32 1.1754944e-38, %v1135_v22  ;;  %vm1134_vm12 = vcmp.eq.f32.partialorder %v1133_v24, 8.507059e+37 }
 0xe8b   : > { %v1642_v13 = vpop.eup %1641 }
 0xe8c   : > { %v1125_v15 = vmul.f32 %v1642_v13, %v1122_v12  ;;  %v1644_v18 = vpop.eup %1643  ;;  %vm1130_vm8 = vweird.f32 %v1642_v13 }
 0xe8d   : > { %v1123_v19 = vadd.f32 1.0, %v1644_v18  ;;  %vm1131_vm11 = vmor %vm1129_vm9, %vm1130_vm8  ;;  %vm456_vm8 = vcmask 253952   ;;  %vm580_vm9 = vcmask 254977  }
 0xe8e   : > { %v1126_v16 = vsub.f32 1.0, %v1125_v15 }
 0xe8f   : > { %1645 = vrcp.f32 %v1123_v19  ;;  %v1150_v35 = vand.u32 2147483648, %v1123_v19  ;;  %vm1144_vm14 = vweird.f32 %v1123_v19  ;;  %v1148_v36 = vand.u32 2147483647, %v1123_v19 }
 0xe90   : > { %v1127_v17 = vmul.f32 %v1642_v13, %v1126_v16 }
 0xe91   : > { %v1151_v38 = vor.u32 1.1754944e-38, %v1150_v35  ;;  %vm1149_vm0 = vcmp.eq.f32.partialorder %v1148_v36, 8.507059e+37 }
 0xe92   : > { %v1128_v20 = vadd.f32 %v1642_v13, %v1127_v17 }
 0xe94   : > { %v1132_v25 = vsel %vm1131_vm11, %v1642_v13, %v1128_v20  ;;  %vm829_vm11 = vcmask 257027  }
 0xe95   : > { %v1137_v28 = vsel %vm1134_vm12, %v1136_v26, %v1132_v25  ;;  %v1646_v30 = vpop.eup %1645  ;;  %vm954_vm12 = vcmask 258052  }
 0xe96   : > { %v1140_v31 = vmul.f32 %v1646_v30, %v1123_v19  ;;  %vm1145_vm13 = vweird.f32 %v1646_v30  ;;  %v1162_v50 = vmul.f32 %v1158_v44, %v1137_v28 }
 0xe97   : > { %vm1146_vm15 = vmor %vm1144_vm14, %vm1145_vm13  ;;  %vm1204_vm13 = vcmask 260102   ;;  %vm704_vm14 = vcmask 256002  }
 0xe98   : > { %v1141_v32 = vsub.f32 1.0, %v1140_v31 }
 0xe9a   : > { %v1142_v33 = vmul.f32 %v1646_v30, %v1141_v32 }
 0xe9c   : > { %v1143_v34 = vadd.f32 %v1646_v30, %v1142_v33 }
 0xe9e   : > { %v1147_v37 = vsel %vm1146_vm15, %v1646_v30, %v1143_v34  ;;  %vm1079_vm15 = vcmask 259077  }
 0xe9f   : > { %v1152_v40 = vsel %vm1149_vm0, %v1151_v38, %v1147_v37  ;;  %vm1329_vm0 = vcmask 261127  }
 0xea0   : > { %v1163_v46 = vmul.f32 %v1159_v48, %v1152_v40 }
 0xedb   : > { %v1167_v27 = vpop.permute.xlu2 %1166 }
 0xedc   : > { %v1172_v29 = vmul.f32 %v1167_v27, %v1137_v28 }
 0xede   : > { %1176 = vrot.lane.b32.xlu1 %v1172_v29, %s1732_s10 }
 0xef4   : > { %v1169_v39 = vpop.permute.xlu0 %1168 }
 0xef5   : > { %v1173_v42 = vmul.f32 %v1169_v39, %v1152_v40 }
 0xef7   : > { %1178 = vrot.lane.b32.xlu2 %v1173_v42, %s1732_s10 }
 0xf50   : > { %v1177_v58 = vpop.permute.xlu1 %1176 }
 0xf51   : > { %v1179_v49 = vpop.permute.xlu2 %1178  ;;  %v2036_v51 = vadd.f32 %v1177_v58, %v1162_v50 }
 0xf52   : > { %v2038_v63 = vadd.f32 %v1179_v49, %v1163_v46 }
 0xf53   : > { %1647 = vtanh.f32 %v2036_v51 }
 0xf54   : > { %1649 = vtanh.f32 %v2038_v63  ;;  %v1284_v46 = vrot.slane %v2038_v63, 7 }
 0xf59   : > { %v1648_v60 = vpop.eup %1647 }
 0xf5a   : > { %v1650_v41 = vpop.eup %1649  ;;  %1188 = vrot.lane.b32.xlu0 %v1648_v60, %s1733_s11 }
 0xf5b   : > { %1190 = vrot.lane.b32.xlu1 %v1650_v41, %s1733_s11 }
 0xfcc   : > { %v1189_v45 = vpop.permute.xlu0 %1188 }
 0xfcd   : > { %v1191_v43 = vpop.permute.xlu1 %1190  ;;  %v2044_v0 = vmul.f32 %v1189_v45, %v1137_v28 }
 0xfce   : > { %v2046_v1 = vmul.f32 %v1191_v43, %v1152_v40 }
 0xfcf   : > { %v1207_v2 = vrot.slane %v2044_v0, 6 }
 0xfd0   : > { %v1208_v3 = vrot.slane %v2046_v1, 5 }
 0xfd2   : > { %v1209_v5 = vsel %vm460_vm10, %v1208_v3, %v1207_v2 }
 0xfd3   : > { %1210 = vrot.lane.b32.xlu2 %v1209_v5, %s1732_s10 }
0x102d   : > { %v1211_v6 = vpop.permute.xlu2 %1210 }
0x102e   : > { %1484 = vmatmul.msk.f32.vlgmr.msra.gmra.mxu1 %vm305_vm1, %v1211_v6 }
0x10ab   : > { %v1231_v8 = vpop.f32.mrf.mxu1 }
0x10ac   : > { %v1235_v9 = vrot.slane %v1231_v8, 1  ;;  %v1236_v10 = vrot.slane %v1231_v8, 2 }
0x10ae   : > { %v1239_v11 = vadd.f32 %v1235_v9, %v1879_v23  ;;  %v1240_v12 = vadd.f32 %v1236_v10, %v1876_v21 }
0x10b0   : > { %1651 = vtanh.f32 %v1239_v11  ;;  %v1485_v15 = vmul.f32 -1.442695, %v1239_v11  ;;  %v1486_v16 = vmul.f32 -1.442695, %v1240_v12 }
0x10b1   : > { %1653 = vtanh.f32 %v1240_v12 }
0x10b2   : > { %1655 = vpow2.f32 %v1485_v15 }
0x10b3   : > { %1657 = vpow2.f32 %v1486_v16 }
0x10b6   : > { %v1652_v13 = vpop.eup %1651 }
0x10b7   : > { %v1654_v14 = vpop.eup %1653  ;;  %1291 = vrot.lane.b32.xlu1 %v1652_v13, %s1733_s11 }
0x10b8   : > { %1293 = vrot.lane.b32.xlu0 %v1654_v14, %s1733_s11  ;;  %v1656_v17 = vpop.eup %1655 }
0x10b9   : > { %v1658_v18 = vpop.eup %1657  ;;  %v1247_v19 = vadd.f32 1.0, %v1656_v17 }
0x10ba   : > { %v1248_v20 = vadd.f32 1.0, %v1658_v18 }
0x10bb   : > { %1659 = vrcp.f32 %v1247_v19  ;;  %v1260_v31 = vand.u32 2147483648, %v1247_v19  ;;  %vm1254_vm2 = vweird.f32 %v1247_v19  ;;  %v1258_v33 = vand.u32 2147483647, %v1247_v19 }
0x10bc   : > { %1661 = vrcp.f32 %v1248_v20  ;;  %v1275_v32 = vand.u32 2147483648, %v1248_v20  ;;  %vm1269_vm3 = vweird.f32 %v1248_v20  ;;  %v1273_v34 = vand.u32 2147483647, %v1248_v20 }
0x10bd   : > { %v1261_v37 = vor.u32 1.1754944e-38, %v1260_v31  ;;  %vm1259_vm6 = vcmp.eq.f32.partialorder %v1258_v33, 8.507059e+37 }
0x10be   : > { %v1276_v38 = vor.u32 1.1754944e-38, %v1275_v32  ;;  %vm1274_vm7 = vcmp.eq.f32.partialorder %v1273_v34, 8.507059e+37 }
0x10c1   : > { %v1660_v23 = vpop.eup %1659 }
0x10c2   : > { %v1662_v21 = vpop.eup %1661  ;;  %v1250_v22 = vmul.f32 %v1660_v23, %v1247_v19  ;;  %vm1255_vm1 = vweird.f32 %v1660_v23 }
0x10c3   : > { %v1265_v24 = vmul.f32 %v1662_v21, %v1248_v20  ;;  %vm1270_vm10 = vweird.f32 %v1662_v21  ;;  %vm1256_vm4 = vmor %vm1254_vm2, %vm1255_vm1 }
0x10c4   : > { %v1251_v25 = vsub.f32 1.0, %v1250_v22  ;;  %vm1271_vm5 = vmor %vm1269_vm3, %vm1270_vm10 }
0x10c5   : > { %v1266_v26 = vsub.f32 1.0, %v1265_v24 }
0x10c6   : > { %v1252_v27 = vmul.f32 %v1660_v23, %v1251_v25 }
0x10c7   : > { %v1267_v28 = vmul.f32 %v1662_v21, %v1266_v26 }
0x10c8   : > { %v1253_v29 = vadd.f32 %v1660_v23, %v1252_v27 }
0x10c9   : > { %v1268_v30 = vadd.f32 %v1662_v21, %v1267_v28 }
0x10ca   : > { %v1257_v35 = vsel %vm1256_vm4, %v1660_v23, %v1253_v29 }
0x10cb   : > { %v1272_v36 = vsel %vm1271_vm5, %v1662_v21, %v1268_v30  ;;  %v1262_v40 = vsel %vm1259_vm6, %v1261_v37, %v1257_v35 }
0x10cc   : > { %v1277_v44 = vsel %vm1274_vm7, %v1276_v38, %v1272_v36 }
0x10cd   : > { %v1288_v58 = vmul.f32 %v1284_v46, %v1277_v44 }
0x1129   : > { %v1292_v39 = vpop.permute.xlu1 %1291 }
0x112a   : > { %v1294_v42 = vpop.permute.xlu0 %1293  ;;  %v1297_v48 = vmul.f32 %v1292_v39, %v1262_v40 }
0x112b   : > { %v1298_v50 = vmul.f32 %v1294_v42, %v1277_v44 }
0x112c   : > { %1301 = vrot.lane.b32.xlu0 %v1297_v48, %s1732_s10 }
0x112d   : > { %1303 = vrot.lane.b32.xlu2 %v1298_v50, %s1732_s10 }
0x1134   : > { %450 = vrot.lane.b32.xlu0 %v1897_v7, %s1732_s10 }
0x113c   : > { %576 = vrot.lane.b32.xlu0 %v1921_v62, %s1732_s10  ;;  %v1283_v62 = vrot.slane %v2036_v51, 7 }
0x1144   : > { %823 = vrot.lane.b32.xlu0 %v1969_v52, %s1732_s10  ;;  %v1287_v52 = vmul.f32 %v1283_v62, %v1262_v40 }
0x114c   : > { %950 = vrot.lane.b32.xlu0 %v1996_v57, %s1732_s10 }
0x1154   : > { %1198 = vrot.lane.b32.xlu0 %v2044_v0, %s1732_s10 }
0x1187   : > { %v1304_v49 = vpop.permute.xlu2 %1303 }
0x1188   : > { %v1308_v60 = vadd.f32 %v1304_v49, %v1288_v58 }
0x118a   : > { %1663 = vtanh.f32 %v1308_v60 }
0x1190   : > { %v1664_v7 = vpop.eup %1663 }
0x1191   : > { %1315 = vrot.lane.b32.xlu1 %v1664_v7, %s1733_s11 }
0x1199   : > { %452 = vrot.lane.b32.xlu1 %v1894_v4, %s1732_s10 }
0x119e   : > { %v1302_v57 = vpop.permute.xlu0 %1301 }
0x119f   : > { %v1307_v41 = vadd.f32 %v1302_v57, %v1287_v52 }
0x11a1   : > { %1665 = vtanh.f32 %v1307_v41  ;;  %698 = vrot.lane.b32.xlu1 %v1944_v55, %s1732_s10 }
0x11a6   : > { %v451_v63 = vpop.permute.xlu0 %450 }
0x11a7   : > { %v1666_v45 = vpop.eup %1665  ;;  %457 = vst.msk [vmem:[%s1837_s19] sm:$0x1] %vm456_vm8, %v451_v63 }
0x11a8   : > { %1313 = vrot.lane.b32.xlu2 %v1666_v45, %s1733_s11 }
0x11a9   : > { %825 = vrot.lane.b32.xlu1 %v1971_v53, %s1732_s10 }
0x11ae   : > { %v577_v4 = vpop.permute.xlu0 %576 }
0x11af   : > { %582 = vst.msk [vmem:[%s1837_s19 + $0x8] sm:$0x2] %vm580_vm9, %v577_v4 }
0x11b0   : > { %574 = vrot.lane.b32.xlu2 %v1919_v61, %s1732_s10 }
0x11b1   : > { %1073 = vrot.lane.b32.xlu1 %v2019_v47, %s1732_s10 }
0x11b6   : > { %v824_v55 = vpop.permute.xlu0 %823 }
0x11b7   : > { %830 = vst.msk [vmem:[%s1837_s19] sm:$0x8] %vm829_vm11, %v824_v55 }
0x11b8   : > { %700 = vrot.lane.b32.xlu2 %v1946_v56, %s1732_s10 }
0x11b9   : > { %1200 = vrot.lane.b32.xlu1 %v2046_v1, %s1732_s10 }
0x11be   : > { %v951_v53 = vpop.permute.xlu0 %950 }
0x11bf   : > { %956 = vst.msk [vmem:[%s1837_s19 + $0x8] sm:$0x10] %vm954_vm12, %v951_v53 }
0x11c0   : > { %948 = vrot.lane.b32.xlu2 %v1994_v54, %s1732_s10 }
0x11c6   : > { %v1199_v61 = vpop.permute.xlu0 %1198 }
0x11c7   : > { %1205 = vst.msk [vmem:[%s1837_s19] sm:$0x40] %vm1204_vm13, %v1199_v61 }
0x11c8   : > { %1075 = vrot.lane.b32.xlu2 %v2021_v59, %s1732_s10  ;;  %v1340_v59 = vrot.slane %v1308_v60, 7 }
0x1202   : > { %v1314_v56 = vpop.permute.xlu2 %1313 }
0x1203   : > { %v1316_v47 = vpop.permute.xlu1 %1315  ;;  %v1319_v51 = vmul.f32 %v1314_v56, %v1262_v40 }
0x1204   : > { %v1320_v43 = vmul.f32 %v1316_v47, %v1277_v44 }
0x1205   : > { %1323 = vrot.lane.b32.xlu2 %v1319_v51, %s1732_s10 }
0x1206   : > { %v1332_v0 = vrot.slane %v1320_v43, 7  ;;  %1325 = vrot.lane.b32.xlu0 %v1320_v43, %s1732_s10 }
0x1208   : > { %1333 = vrot.lane.b32.xlu1 %v1332_v0, %s1732_s10 }
0x120a   : > { %v575_v54 = vpop.permute.xlu2 %574 }
0x120b   : > { %v453_v1 = vpop.permute.xlu1 %452  ;;  %581 = vst.msk [vmem:[%s1837_s19] sm:$0x2] %vm580_vm9, %v575_v54 }
0x120c   : > { %458 = vst.msk [vmem:[%s1837_s19 + $0x8] sm:$0x1] %vm456_vm8, %v453_v1 }
0x120d   : > { %1341 = vrot.lane.b32.xlu2 %v1307_v41, %s1734_s12 }
0x120e   : > { %1343 = vrot.lane.b32.xlu0 %v1340_v59, %s1734_s12 }
0x1212   : > { %v701_v2 = vpop.permute.xlu2 %700 }
0x1213   : > { %v699_v3 = vpop.permute.xlu1 %698  ;;  %706 = vst.msk [vmem:[%s1837_s19 + $0x8] sm:$0x4] %vm704_vm14, %v701_v2 }
0x1214   : > { %705 = vst.msk [vmem:[%s1837_s19] sm:$0x4] %vm704_vm14, %v699_v3 }
0x121a   : > { %v949_v5 = vpop.permute.xlu2 %948 }
0x121b   : > { %v826_v6 = vpop.permute.xlu1 %825  ;;  %955 = vst.msk [vmem:[%s1837_s19] sm:$0x10] %vm954_vm12, %v949_v5 }
0x121c   : > { %831 = vst.msk [vmem:[%s1837_s19 + $0x8] sm:$0x8] %vm829_vm11, %v826_v6 }
0x1222   : > { %v1076_v8 = vpop.permute.xlu2 %1075 }
0x1223   : > { %v1074_v9 = vpop.permute.xlu1 %1073  ;;  %1081 = vst.msk [vmem:[%s1837_s19 + $0x8] sm:$0x20] %vm1079_vm15, %v1076_v8 }
0x1224   : > { %1080 = vst.msk [vmem:[%s1837_s19] sm:$0x20] %vm1079_vm15, %v1074_v9 }
0x122b   : > { %v1201_v10 = vpop.permute.xlu1 %1200 }
0x122c   : > { %1206 = vst.msk [vmem:[%s1837_s19 + $0x8] sm:$0x40] %vm1204_vm13, %v1201_v10 }
0x125f   : > { %v1324_v11 = vpop.permute.xlu2 %1323 }
0x1260   : > { %1330 = vst.msk [vmem:[%s1837_s19] sm:$0x80] %vm1329_vm0, %v1324_v11 }
0x1261   : > { %1336 = vst.msk [vmem:[#allocation2 - $0x7] sm:$0x80] %vm1329_vm0, %v1324_v11 }
0x1267   : > { %v1342_v12 = vpop.permute.xlu2 %1341 }
0x1268   : > { %1347 = vst.msk [vmem:[#allocation3 - $0x7] sm:$0x80] %vm1329_vm0, %v1342_v12 }
0x1278   : > { %v1326_v13 = vpop.permute.xlu0 %1325 }
0x1279   : > { %1331 = vst.msk [vmem:[%s1837_s19 + $0x8] sm:$0x80] %vm1329_vm0, %v1326_v13 }
0x127a   : > { %v1334_v14 = vpop.permute.xlu1 %1333 }
0x127b   : > { %1337 = vst.msk [vmem:[#allocation2 + $0x1] sm:$0x1] %vm456_vm8, %v1334_v14 }
0x127d   : > { %1352 = sbr.rel (%p1487_p0) target bundleno = 4742 (0x1286), region = 82 }
0x1280   : > { %v1344_v15 = vpop.permute.xlu0 %1343 }
0x1281   : > { %1348 = vst.msk [vmem:[#allocation3 + $0x1] sm:$0x1] %vm456_vm8, %v1344_v15 }
0x1282   : > { %1353 = vst.msk [vmem:[%s2183_s5 - $0x7] sm:$0x80] %vm1329_vm0, %v1324_v11 }
0x1283   : > { %1354 = vst.msk [vmem:[%s2183_s5 + $0x1] sm:$0x1] %vm456_vm8, %v1334_v14 }
0x1284   : > { %1355 = vst.msk [vmem:[%s2184_s6 - $0x7] sm:$0x80] %vm1329_vm0, %v1342_v12 }
0x1285   : > { %1356 = vst.msk [vmem:[%s2184_s6 + $0x1] sm:$0x1] %vm456_vm8, %v1344_v15 }
0x1286 PF: > { %s1489_s10 = sshll.u32 %s1794_s25, 3  ;;  %s1369_s12 = sshll.u32 %s1837_s19, 4  ;;  %s1370_s12 = int_to_ptr.vmem [resolvable:$true] %s1369_s12 }
0x1287   : > { %s1368_s11 = scalar_lea.hbm %s2182_s4, %s1489_s10  ;;  %s1358_s14 = scalar_lea.sflag [#allocation6], %s255_s16 }
0x1288   : > { %s1371_s13 = sshll.u32 %s1368_s11, 4  ;;  %s1687_s25 = scalar_lea.hbm %s2182_s4, 32  ;;  %s1372_s13 = int_to_ptr.hbm [resolvable:$true] %s1371_s13 }
0x1289   : > { %s1681_s15 = sshra.s32 %s1372_s13, 4  ;;  %s1682_s15 = int_to_ptr.hbm [resolvable:$true] %s1681_s15 }
0x128a   : > { %s1683_s20 = scalar_lea.hbm %s1682_s15, 16  ;;  %p1688_p4 = scmp.lt.s32.totalorder %s1682_s15, %s2182_s4 }
0x128b   : > { %p1684_p1 = scmp.ne.s32.totalorder %s1682_s15, %s1683_s20  ;;  %p1689_p5 = scmp.lt.s32.totalorder %s1687_s25, %s1683_s20 }
0x128d   : > { %p1685_p2 = pnand %p1684_p1, %p1812_p6  ;;  %p1690_p7 = por %p1689_p5, %p1688_p4 }
0x128f   : > { %p1686_p3 = pneg %p1685_p2 }
0x1291   : > { %p1691_p10 = pnand %p1690_p7, %p1686_p3 }
0x1293   : > { %1694 = shalt.err (!%p1691_p10)
}
0x1294   : > { %s1735_s16 = smov 128   ;;  %s1736_s19 = smov 256  }
0x1295   : > { %s1737_s10 = smov 8  }
0x1296   : > { %1492 = dma.vmem_to_hbm [thread:$0]  (%p1812_p6), %s1370_s12, 256, %s1372_s13, %s1358_s14, %s1735_s16, %s1736_s19, %s1737_s10  }
0x1297 PF: > { %s1398_s17 = sand.u32 1, %s1717_s21   ;;  %p1495_p11 = pnand %p1454_p9, %p1816_p8 }
0x1298   : > { %s1399_s18 = scalar_lea.sflag [#allocation6], %s1398_s17 }
0x1299   : > { %p1496_p12 = pneg %p1495_p11 }
0x129b   : > { %1712 = dma.done.wait (%p1496_p12), %s1399_s18, 256  }
0x129c   : > { %1714 = vsyncadd (%p1496_p12), %s1399_s18, 4294967040  ;;  %p17_p13 = scmp.ge.s32.totalorder %s1798_s27, 4   ;;  %s2187_s21 = smov %s1721_s22 }
0x129d   : > { %s2188_s22 = smov %s1725_s23  ;;  %s2189_s23 = smov %s1810_s30 }
0x129e   : > { %s2190_s24 = smov %s1798_s27  ;;  %19 = sbr.rel (!%p17_p13) target bundleno = 3 (0x3), region = 138 }
0x12a3   :  { %1405 = vsyncpa [#allocation6], 1 }
0x12a4   :  { %1407 = vsyncpa [#allocation6 + $0x1], 1 }

// kernel: encoder_forward.2
= control target key start
LH: loop header
LB: loop body
LE: loop exit
PB: predicated region body
PF: predicated region fallthrough
CT: control target
= control target key end

     0   :  { %s1728_s21 = smov 0   ;;  %s1730_s22 = smov 0   ;;  %s2090_s0 = inlined_call_operand.vmem [shape: f32[2,16,32], index: 0, kind: input, shape index: {}]   ;;  %s2091_s1 = inlined_call_operand.vmem [shape: f32[32,128], index: 1, kind: input, shape index: {}]   ;;  %s2092_s2 = inlined_call_operand.vmem [shape: f32[32,128], index: 2, kind: input, shape index: {}]   ;;  %s2093_s3 = inlined_call_operand.vmem [shape: f32[1,128], index: 3, kind: input, shape index: {}]   ;;  %s2094_s4 = inlined_call_operand.vmem [shape: f32[2,16,32], index: 4, kind: output, shape index: {0}]   ;;  %s2095_s5 = inlined_call_operand.vmem [shape: f32[2,32], index: 5, kind: output, shape index: {1}]   ;;  %s2096_s6 = inlined_call_operand.vmem [shape: f32[2,32], index: 6, kind: output, shape index: {2}]  }
   0x1   :  { %s1732_s23 = smov 0  }
   0x2 LB: > { %s1741_s24 = sadd.s32 4294967295, %s1687_s23   ;;  %s1743_s25 = sadd.s32 1, %s1687_s23   ;;  %s1687_s23 = sphi %s1732_s23, %s2100_s23   ;;  %s1683_s22 = sphi %s1730_s22, %s2099_s22   ;;  %s1679_s21 = sphi %s1728_s21, %s2098_s21  }
   0x3   : > { %s21_s26 = ssub.s32 %s1687_s23, %s1743_s25  ;;  %s24_s27 = sadd.s32 1, %s1683_s22 }
   0x4   : > { %p22_p0 = scmp.eq.s32.totalorder %s21_s26, 0  ;;  %p31_p1 = scmp.ne.s32.totalorder %s1683_s22, %s1679_s21 }
   0x5   : > { %p32_p2 = scmp.eq.s32.totalorder %s1687_s23, 0  ;;  %p124_p3 = scmp.eq.s32.totalorder %s1741_s24, 1 }
   0x6   : > { %s1751_s28 = scalar_select %p22_p0, %s1683_s22, %s24_s27  }
   0x7   : > { %p33_p4 = por %p32_p2, %p31_p1  ;;  %p1753_p5 = por %p124_p3, %p31_p1 }
   0x8   : > { %p1470_p6 = scmp.ge.s32.totalorder %s1687_s23, 2 }
   0xa   : > { %197 = sbr.rel (%p1470_p6) target bundleno = 21 (0x15), region = 28 }
   0xf   : > { %200 = sbr.rel (!%p33_p4) target bundleno = 21 (0x15), region = 32  ;;  %s202_s30 = sand.u32 (%p33_p4), 1, %s1683_s22  }
  0x10   : > { %s1472_s7 = sshll.u32 (%p33_p4), %s1687_s23, 3  ;;  %s1471_s8 = sshll.u32 (%p33_p4), %s202_s30, 4 }
  0x11   : > { %s206_s11 = scalar_lea.vmem (%p33_p4), %s2090_s0, %s1472_s7  ;;  %s204_s12 = scalar_lea.vmem (%p33_p4), [#allocation4], %s1471_s8 }
  0x12   : > { %v237_v0 = vld [vmem:[%s206_s11] sm:$0xff] (%p33_p4)  ;;  %v239_v1 = vld [vmem:[%s206_s11 + $0x10] sm:$0xff] (%p33_p4) }
  0x13   : > { %238 = vst [vmem:[%s204_s12] sm:$0xff] (%p33_p4), %v237_v0 }
  0x14   : > { %240 = vst [vmem:[%s204_s12 + $0x8] sm:$0xff] %v239_v1 }
  0x15 PF: > { %p1473_p7 = scmp.ge.s32.totalorder %s1687_s23, 1  ;;  %p245_p8 = scmp.lt.s32.totalorder %s1687_s23, 3 }
  0x17   : > { %p246_p9 = pnand %p1473_p7, %p245_p8 }
  0x18   : > { %s252_s13 = sand.u32 (!%p246_p9), 1, %s1679_s21   ;;  %p1476_p10 = scmp.ne.s32.totalorder (!%p246_p9), %s1741_s24, 0 }
  0x19   : > { %249 = sbr.rel (%p246_p9) target bundleno = 4745 (0x1289), region = 70  ;;  %s1762_s14 = sshll.u32 (!%p246_p9), %s252_s13, 4 }
  0x1a   : > { %s254_s15 = scalar_lea.vmem (!%p246_p9), [#allocation4], %s1762_s14  ;;  %s1766_s16 = scalar_lea.vmem (!%p246_p9), [#allocation5], %s1762_s14 }
  0x1e   : > { %283 = sbr.rel (%p1476_p10) target bundleno = 38 (0x26), region = 78 }
  0x23   : > { %vm284_vm0 = vcmask 254976   ;;  %v1689_v2 = vmov 0.0  }
  0x24   : > { %285 = vst.msk [vmem:[#allocation2] sm:$0x3] %vm284_vm0, %v1689_v2 }
  0x25   : > { %286 = vst.msk [vmem:[#allocation3] sm:$0x3] %vm284_vm0, %v1689_v2 }
  0x26 PF: > { %v290_v3 = vld [vmem:[%s2091_s1 + $0x18] sm:$0xff]  ;;  %v289_v4 = vld [vmem:[%s2091_s1 + $0x10] sm:$0xff]  ;;  %v288_v7 = vld [vmem:[%s2091_s1 + $0x8] sm:$0xff]  ;;  %vm301_vm1 = vcmask 261120   ;;  %s1690_s17 = smov 32   ;;  %s1691_s18 = smov 64  }
  0x27   : > { %v294_v5 = vld [vmem:[%s2092_s2 + $0x18] sm:$0xff]  ;;  %320 = vmatpush.msra.mxu0 %v290_v3  ;;  %v293_v6 = vld [vmem:[%s2092_s2 + $0x10] sm:$0xff]  ;;  %v292_v8 = vld [vmem:[%s2092_s2 + $0x8] sm:$0xff]  ;;  %vm456_vm10 = vcmask 1041409   ;;  %s1692_s19 = smov 96   ;;  %p1503_p11 = scmp.ne.s32.totalorder %s1741_s24, 1 }
  0x28   : > { %348 = vmatpush.msra.mxu1 %v294_v5  ;;  %474 = vmatpush.msra.mxu2 %v294_v5  ;;  %v287_v10 = vld [vmem:[%s2091_s1] sm:$0xff] }
  0x29   : > { %597 = vmatpush.msra.mxu3 %v294_v5  ;;  %321 = vmatpush.msra.mxu0 %v289_v4  ;;  %v291_v11 = vld [vmem:[%s2092_s2] sm:$0xff] }
  0x2a   : > { %349 = vmatpush.msra.mxu1 %v293_v6  ;;  %475 = vmatpush.msra.mxu2 %v293_v6  ;;  %v296_v13 = vld [vmem:[%s254_s15] sm:$0xff]  ;;  %v297_v15 = vld [vmem:[%s254_s15 + $0x8] sm:$0xff] }
  0x2b   : > { %598 = vmatpush.msra.mxu3 %v293_v6  ;;  %322 = vmatpush.msra.mxu0 %v288_v7  ;;  %v331_v14 = vld [vmem:[#allocation2] sm:$0x3] }
  0x2c   : > { %v332_v9 = vld [vmem:[#allocation3] sm:$0x3]  ;;  %350 = vmatpush.msra.mxu1 %v292_v8  ;;  %476 = vmatpush.msra.mxu2 %v292_v8  ;;  %v1536_v18 = vld [vmem:[%s2093_s3] ss:$0 sm:$0xff] }
  0x2d   : > { %v403_v12 = vrot.slane %v332_v9, 1  ;;  %323 = vmatpush.msra.mxu0 %v287_v10  ;;  %599 = vmatpush.msra.mxu3 %v292_v8 }
  0x2e   : > { %351 = vmatpush.msra.mxu1 %v291_v11  ;;  %1477 = vmatmul.msk.f32.vlgmr.msra.gmra.mxu0 %vm301_vm1, %v296_v13 }
  0x2f   : > { %406 = vrot.lane.b32.xlu1 %v403_v12, %s1690_s17  ;;  %1479 = vmatmul.msk.f32.vlgmr.msra.gmra.mxu1 %vm301_vm1, %v331_v14 }
  0x30   : > { %477 = vmatpush.msra.mxu2 %v291_v11  ;;  %722 = vmatpush.msrb.mxu1 %v294_v5 }
  0x31   : > { %600 = vmatpush.msra.mxu3 %v291_v11  ;;  %1097 = vmatpush.msrb.mxu0 %v294_v5 }
  0x32   : > { %847 = vmatpush.msrb.mxu2 %v294_v5  ;;  %723 = vmatpush.msrb.mxu1 %v293_v6 }
  0x33   : > { %972 = vmatpush.msrb.mxu3 %v294_v5  ;;  %1098 = vmatpush.msrb.mxu0 %v293_v6 }
  0x34   : > { %848 = vmatpush.msrb.mxu2 %v293_v6  ;;  %724 = vmatpush.msrb.mxu1 %v292_v8 }
  0x35   : > { %973 = vmatpush.msrb.mxu3 %v293_v6  ;;  %1099 = vmatpush.msrb.mxu0 %v292_v8 }
  0x36   : > { %849 = vmatpush.msrb.mxu2 %v292_v8  ;;  %1478 = vmatmul.msk.f32.gmra.mxu0 %vm301_vm1, %v297_v15 }
  0x37   : > { %404 = vrot.lane.b32.xlu1 %v332_v9, %s1690_s17  ;;  %725 = vmatpush.msrb.mxu1 %v291_v11 }
  0x38   : > { %850 = vmatpush.msrb.mxu2 %v291_v11  ;;  %974 = vmatpush.msrb.mxu3 %v292_v8 }
  0x39   : > { %1222 = vmatpush.msra.mxu1 %v294_v5  ;;  %1100 = vmatpush.msrb.mxu0 %v291_v11 }
  0x3a   : > { %975 = vmatpush.msrb.mxu3 %v291_v11 }
  0x3b   : > { %1223 = vmatpush.msra.mxu1 %v293_v6 }
  0x3d   : > { %1224 = vmatpush.msra.mxu1 %v292_v8 }
  0x3f   : > { %1225 = vmatpush.msra.mxu1 %v291_v11 }
  0xa1   : > { %v407_v57 = vpop.permute.xlu1 %406 }
  0xa9   : > { %v405_v61 = vpop.permute.xlu1 %404 }
  0xab   : > { %v325_v16 = vpop.f32.mrf.mxu0 }
  0xac   : > { %v353_v17 = vpop.f32.mrf.mxu1  ;;  %v1808_v23 = vadd.f32 %v1536_v18, %v325_v16 }
  0xad   : > { %v357_v19 = vrot.slane %v353_v17, 1 }
  0xae   : > { %v360_v24 = vadd.f32 %v353_v17, %v1808_v23 }
  0xb0   : > { %v1480_v28 = vmul.f32 -1.442695, %v360_v24 }
  0xb3   : > { %v328_v20 = vpop.f32.mrf.mxu0 }
  0xb4   : > { %v1805_v21 = vadd.f32 %v1536_v18, %v328_v20 }
  0xb6   : > { %v361_v22 = vadd.f32 %v357_v19, %v1805_v21 }
  0xb8   : > { %1537 = vtanh.f32 %v361_v22  ;;  %v1481_v27 = vmul.f32 -1.442695, %v361_v22 }
  0xb9   : > { %1539 = vtanh.f32 %v360_v24 }
  0xba   : > { %1541 = vpow2.f32 %v1481_v27 }
  0xbb   : > { %1543 = vpow2.f32 %v1480_v28 }
  0xbe   : > { %v1538_v25 = vpop.eup %1537 }
  0xbf   : > { %416 = vrot.lane.b32.xlu0 %v1538_v25, %s1691_s18  ;;  %v1540_v26 = vpop.eup %1539 }
  0xc0   : > { %v1542_v29 = vpop.eup %1541 }
  0xc1   : > { %v369_v30 = vadd.f32 1.0, %v1542_v29  ;;  %v1544_v31 = vpop.eup %1543 }
  0xc2   : > { %v368_v32 = vadd.f32 1.0, %v1544_v31 }
  0xc3   : > { %1545 = vrcp.f32 %v369_v30  ;;  %v396_v41 = vand.u32 2147483648, %v369_v30  ;;  %vm390_vm3 = vweird.f32 %v369_v30  ;;  %v394_v42 = vand.u32 2147483647, %v369_v30 }
  0xc4   : > { %1547 = vrcp.f32 %v368_v32  ;;  %v381_v50 = vand.u32 2147483648, %v368_v32  ;;  %vm375_vm7 = vweird.f32 %v368_v32  ;;  %v379_v51 = vand.u32 2147483647, %v368_v32 }
  0xc5   : > { %v397_v45 = vor.u32 1.1754944e-38, %v396_v41  ;;  %vm395_vm5 = vcmp.eq.f32.partialorder %v394_v42, 8.507059e+37 }
  0xc6   : > { %v382_v53 = vor.u32 1.1754944e-38, %v381_v50  ;;  %vm380_vm9 = vcmp.eq.f32.partialorder %v379_v51, 8.507059e+37 }
  0xc7   : > { %414 = vrot.lane.b32.xlu0 %v1540_v26, %s1691_s18 }
  0xc9   : > { %v1546_v33 = vpop.eup %1545 }
  0xca   : > { %v386_v34 = vmul.f32 %v1546_v33, %v369_v30  ;;  %v1548_v36 = vpop.eup %1547  ;;  %vm391_vm2 = vweird.f32 %v1546_v33 }
  0xcb   : > { %v371_v38 = vmul.f32 %v1548_v36, %v368_v32  ;;  %vm392_vm4 = vmor %vm390_vm3, %vm391_vm2  ;;  %vm376_vm6 = vweird.f32 %v1548_v36 }
  0xcc   : > { %v387_v35 = vsub.f32 1.0, %v386_v34  ;;  %vm377_vm8 = vmor %vm375_vm7, %vm376_vm6 }
  0xcd   : > { %v372_v40 = vsub.f32 1.0, %v371_v38 }
  0xce   : > { %v388_v37 = vmul.f32 %v1546_v33, %v387_v35 }
  0xcf   : > { %v373_v44 = vmul.f32 %v1548_v36, %v372_v40 }
  0xd0   : > { %v389_v39 = vadd.f32 %v1546_v33, %v388_v37 }
  0xd1   : > { %v374_v48 = vadd.f32 %v1548_v36, %v373_v44 }
  0xd2   : > { %v393_v43 = vsel %vm392_vm4, %v1546_v33, %v389_v39 }
  0xd3   : > { %v398_v46 = vsel %vm395_vm5, %v397_v45, %v393_v43  ;;  %v378_v52 = vsel %vm377_vm8, %v1548_v36, %v374_v48 }
  0xd4   : > { %v383_v54 = vsel %vm380_vm9, %v382_v53, %v378_v52  ;;  %v411_v58 = vmul.f32 %v407_v57, %v398_v46 }
  0xd5   : > { %v410_v62 = vmul.f32 %v405_v61, %v383_v54 }
 0x131   : > { %v417_v47 = vpop.permute.xlu0 %416 }
 0x132   : > { %v421_v49 = vmul.f32 %v417_v47, %v398_v46 }
 0x134   : > { %426 = vrot.lane.b32.xlu2 %v421_v49, %s1690_s17 }
 0x139   : > { %v415_v55 = vpop.permute.xlu0 %414 }
 0x13a   : > { %v420_v56 = vmul.f32 %v415_v55, %v383_v54 }
 0x13c   : > { %424 = vrot.lane.b32.xlu2 %v420_v56, %s1690_s17 }
 0x18e   : > { %v427_v59 = vpop.permute.xlu2 %426 }
 0x18f   : > { %v1815_v60 = vadd.f32 %v427_v59, %v411_v58 }
 0x191   : > { %1549 = vtanh.f32 %v1815_v60  ;;  %v531_v53 = vrot.slane %v1815_v60, 7 }
 0x196   : > { %v425_v63 = vpop.permute.xlu2 %424 }
 0x197   : > { %v1550_v0 = vpop.eup %1549  ;;  %v1818_v1 = vadd.f32 %v425_v63, %v410_v62 }
 0x198   : > { %438 = vrot.lane.b32.xlu0 %v1550_v0, %s1691_s18 }
 0x199   : > { %1551 = vtanh.f32 %v1818_v1  ;;  %v530_v48 = vrot.slane %v1818_v1, 7 }
 0x19f   : > { %v1552_v2 = vpop.eup %1551 }
 0x1a0   : > { %436 = vrot.lane.b32.xlu1 %v1552_v2, %s1691_s18 }
 0x20a   : > { %v439_v3 = vpop.permute.xlu0 %438 }
 0x20b   : > { %v1823_v4 = vmul.f32 %v439_v3, %v398_v46 }
 0x20d   : > { %v455_v6 = vrot.slane %v1823_v4, 7 }
 0x212   : > { %v437_v5 = vpop.permute.xlu1 %436 }
 0x213   : > { %v1826_v7 = vmul.f32 %v437_v5, %v383_v54 }
 0x215   : > { %v457_v8 = vsel %vm456_vm10, %v455_v6, %v1826_v7 }
 0x216   : > { %458 = vrot.lane.b32.xlu2 %v457_v8, %s1690_s17 }
 0x270   : > { %v459_v9 = vpop.permute.xlu2 %458 }
 0x271   : > { %1482 = vmatmul.msk.f32.vlgmr.msra.gmra.mxu2 %vm301_vm1, %v459_v9 }
 0x2f4   : > { %v479_v10 = vpop.f32.mrf.mxu2 }
 0x2f5   : > { %v483_v11 = vrot.slane %v479_v10, 7  ;;  %v487_v12 = vadd.f32 %v479_v10, %v1805_v21 }
 0x2f7   : > { %v486_v13 = vadd.f32 %v483_v11, %v1808_v23  ;;  %1553 = vtanh.f32 %v487_v12  ;;  %v1484_v16 = vmul.f32 -1.442695, %v487_v12 }
 0x2f9   : > { %1555 = vtanh.f32 %v486_v13  ;;  %v1483_v17 = vmul.f32 -1.442695, %v486_v13 }
 0x2fa   : > { %1557 = vpow2.f32 %v1484_v16 }
 0x2fb   : > { %1559 = vpow2.f32 %v1483_v17 }
 0x2fd   : > { %v1554_v14 = vpop.eup %1553 }
 0x2fe   : > { %540 = vrot.lane.b32.xlu1 %v1554_v14, %s1691_s18 }
 0x2ff   : > { %v1556_v15 = vpop.eup %1555 }
 0x300   : > { %538 = vrot.lane.b32.xlu0 %v1556_v15, %s1691_s18  ;;  %v1558_v18 = vpop.eup %1557 }
 0x301   : > { %v1560_v19 = vpop.eup %1559  ;;  %v495_v20 = vadd.f32 1.0, %v1558_v18 }
 0x302   : > { %v494_v22 = vadd.f32 1.0, %v1560_v19 }
 0x303   : > { %1561 = vrcp.f32 %v495_v20  ;;  %v522_v33 = vand.u32 2147483648, %v495_v20  ;;  %vm516_vm12 = vweird.f32 %v495_v20  ;;  %v520_v34 = vand.u32 2147483647, %v495_v20 }
 0x304   : > { %1563 = vrcp.f32 %v494_v22  ;;  %v507_v37 = vand.u32 2147483648, %v494_v22  ;;  %vm501_vm15 = vweird.f32 %v494_v22  ;;  %v505_v39 = vand.u32 2147483647, %v494_v22 }
 0x305   : > { %v523_v38 = vor.u32 1.1754944e-38, %v522_v33  ;;  %vm521_vm0 = vcmp.eq.f32.partialorder %v520_v34, 8.507059e+37 }
 0x306   : > { %v508_v44 = vor.u32 1.1754944e-38, %v507_v37  ;;  %vm506_vm3 = vcmp.eq.f32.partialorder %v505_v39, 8.507059e+37 }
 0x309   : > { %v1562_v24 = vpop.eup %1561 }
 0x30a   : > { %v1564_v25 = vpop.eup %1563  ;;  %v512_v26 = vmul.f32 %v1562_v24, %v495_v20  ;;  %vm517_vm11 = vweird.f32 %v1562_v24 }
 0x30b   : > { %v497_v27 = vmul.f32 %v1564_v25, %v494_v22  ;;  %vm518_vm13 = vmor %vm516_vm12, %vm517_vm11  ;;  %vm502_vm14 = vweird.f32 %v1564_v25 }
 0x30c   : > { %v513_v28 = vsub.f32 1.0, %v512_v26  ;;  %vm503_vm2 = vmor %vm501_vm15, %vm502_vm14 }
 0x30d   : > { %v498_v29 = vsub.f32 1.0, %v497_v27 }
 0x30e   : > { %v514_v30 = vmul.f32 %v1562_v24, %v513_v28 }
 0x30f   : > { %v499_v31 = vmul.f32 %v1564_v25, %v498_v29 }
 0x310   : > { %v515_v32 = vadd.f32 %v1562_v24, %v514_v30 }
 0x311   : > { %v500_v35 = vadd.f32 %v1564_v25, %v499_v31 }
 0x312   : > { %v519_v36 = vsel %vm518_vm13, %v1562_v24, %v515_v32 }
 0x313   : > { %v524_v41 = vsel %vm521_vm0, %v523_v38, %v519_v36  ;;  %v504_v42 = vsel %vm503_vm2, %v1564_v25, %v500_v35 }
 0x314   : > { %v509_v46 = vsel %vm506_vm3, %v508_v44, %v504_v42  ;;  %v535_v54 = vmul.f32 %v531_v53, %v524_v41 }
 0x315   : > { %v534_v49 = vmul.f32 %v530_v48, %v509_v46 }
 0x370   : > { %v541_v40 = vpop.permute.xlu1 %540 }
 0x371   : > { %v545_v43 = vmul.f32 %v541_v40, %v524_v41 }
 0x372   : > { %v539_v45 = vpop.permute.xlu0 %538 }
 0x373   : > { %550 = vrot.lane.b32.xlu0 %v545_v43, %s1690_s17  ;;  %v544_v47 = vmul.f32 %v539_v45, %v509_v46 }
 0x375   : > { %548 = vrot.lane.b32.xlu2 %v544_v47, %s1690_s17 }
 0x3cf   : > { %v549_v50 = vpop.permute.xlu2 %548 }
 0x3d0   : > { %v1839_v51 = vadd.f32 %v549_v50, %v534_v49 }
 0x3d2   : > { %1565 = vtanh.f32 %v1839_v51  ;;  %v654_v47 = vrot.slane %v1839_v51, 7 }
 0x3d8   : > { %v1566_v52 = vpop.eup %1565 }
 0x3d9   : > { %560 = vrot.lane.b32.xlu1 %v1566_v52, %s1691_s18 }
 0x3e5   : > { %v551_v55 = vpop.permute.xlu0 %550 }
 0x3e6   : > { %v1844_v56 = vadd.f32 %v551_v55, %v535_v54 }
 0x3e8   : > { %1567 = vtanh.f32 %v1844_v56  ;;  %v655_v42 = vrot.slane %v1844_v56, 7 }
 0x3ee   : > { %v1568_v57 = vpop.eup %1567 }
 0x3ef   : > { %562 = vrot.lane.b32.xlu2 %v1568_v57, %s1691_s18 }
 0x449   : > { %v563_v58 = vpop.permute.xlu2 %562 }
 0x44a   : > { %v1850_v62 = vmul.f32 %v563_v58, %v524_v41 }
 0x44b   : > { %v561_v59 = vpop.permute.xlu1 %560 }
 0x44c   : > { %v1848_v61 = vmul.f32 %v561_v59, %v509_v46 }
 0x44e   : > { %v579_v63 = vrot.slane %v1848_v61, 1 }
 0x450   : > { %v580_v60 = vsel %vm456_vm10, %v1850_v62, %v579_v63 }
 0x451   : > { %581 = vrot.lane.b32.xlu0 %v580_v60, %s1690_s17 }
 0x4c3   : > { %v582_v0 = vpop.permute.xlu0 %581 }
 0x4c4   : > { %1485 = vmatmul.msk.f32.vlgmr.msra.gmra.mxu3 %vm301_vm1, %v582_v0 }
 0x547   : > { %v602_v1 = vpop.f32.mrf.mxu3 }
 0x548   : > { %v606_v2 = vrot.slane %v602_v1, 6  ;;  %v607_v3 = vrot.slane %v602_v1, 7 }
 0x54a   : > { %v610_v5 = vadd.f32 %v606_v2, %v1808_v23  ;;  %v611_v6 = vadd.f32 %v607_v3, %v1805_v21 }
 0x54c   : > { %1569 = vtanh.f32 %v610_v5  ;;  %v1487_v10 = vmul.f32 -1.442695, %v611_v6  ;;  %v1486_v14 = vmul.f32 -1.442695, %v610_v5 }
 0x54d   : > { %1571 = vtanh.f32 %v611_v6 }
 0x54e   : > { %1573 = vpow2.f32 %v1487_v10 }
 0x552   : > { %v1570_v8 = vpop.eup %1569 }
 0x553   : > { %v1572_v9 = vpop.eup %1571  ;;  %662 = vrot.lane.b32.xlu1 %v1570_v8, %s1691_s18 }
 0x554   : > { %664 = vrot.lane.b32.xlu2 %v1572_v9, %s1691_s18  ;;  %v1574_v11 = vpop.eup %1573 }
 0x555   : > { %v619_v12 = vadd.f32 1.0, %v1574_v11 }
 0x557   : > { %1575 = vrcp.f32 %v619_v12  ;;  %v646_v22 = vand.u32 2147483648, %v619_v12  ;;  %vm640_vm5 = vweird.f32 %v619_v12  ;;  %v644_v24 = vand.u32 2147483647, %v619_v12 }
 0x558   : > { %1577 = vpow2.f32 %v1486_v14 }
 0x559   : > { %v647_v26 = vor.u32 1.1754944e-38, %v646_v22  ;;  %vm645_vm7 = vcmp.eq.f32.partialorder %v644_v24, 8.507059e+37 }
 0x55d   : > { %v1576_v13 = vpop.eup %1575 }
 0x55e   : > { %v636_v15 = vmul.f32 %v1576_v13, %v619_v12  ;;  %v1578_v17 = vpop.eup %1577  ;;  %vm641_vm4 = vweird.f32 %v1576_v13 }
 0x55f   : > { %v618_v19 = vadd.f32 1.0, %v1578_v17  ;;  %vm642_vm6 = vmor %vm640_vm5, %vm641_vm4 }
 0x560   : > { %v637_v16 = vsub.f32 1.0, %v636_v15 }
 0x561   : > { %1579 = vrcp.f32 %v618_v19  ;;  %v631_v35 = vand.u32 2147483648, %v618_v19  ;;  %vm625_vm9 = vweird.f32 %v618_v19  ;;  %v629_v36 = vand.u32 2147483647, %v618_v19 }
 0x562   : > { %v638_v18 = vmul.f32 %v1576_v13, %v637_v16 }
 0x563   : > { %v632_v38 = vor.u32 1.1754944e-38, %v631_v35  ;;  %vm630_vm12 = vcmp.eq.f32.partialorder %v629_v36, 8.507059e+37 }
 0x564   : > { %v639_v20 = vadd.f32 %v1576_v13, %v638_v18 }
 0x566   : > { %v643_v25 = vsel %vm642_vm6, %v1576_v13, %v639_v20 }
 0x567   : > { %v648_v28 = vsel %vm645_vm7, %v647_v26, %v643_v25  ;;  %v1580_v29 = vpop.eup %1579 }
 0x568   : > { %v621_v31 = vmul.f32 %v1580_v29, %v618_v19  ;;  %vm626_vm8 = vweird.f32 %v1580_v29  ;;  %v659_v43 = vmul.f32 %v655_v42, %v648_v28 }
 0x569   : > { %vm627_vm11 = vmor %vm625_vm9, %vm626_vm8 }
 0x56a   : > { %v622_v32 = vsub.f32 1.0, %v621_v31 }
 0x56c   : > { %v623_v33 = vmul.f32 %v1580_v29, %v622_v32 }
 0x56e   : > { %v624_v34 = vadd.f32 %v1580_v29, %v623_v33 }
 0x570   : > { %v628_v37 = vsel %vm627_vm11, %v1580_v29, %v624_v34 }
 0x571   : > { %v633_v40 = vsel %vm630_vm12, %v632_v38, %v628_v37 }
 0x572   : > { %v658_v48 = vmul.f32 %v654_v47, %v633_v40 }
 0x5ae   : > { %v665_v27 = vpop.permute.xlu2 %664 }
 0x5af   : > { %v669_v30 = vmul.f32 %v665_v27, %v648_v28 }
 0x5b1   : > { %674 = vrot.lane.b32.xlu1 %v669_v30, %s1690_s17 }
 0x5c5   : > { %v663_v39 = vpop.permute.xlu1 %662 }
 0x5c6   : > { %v668_v41 = vmul.f32 %v663_v39, %v633_v40 }
 0x5c8   : > { %672 = vrot.lane.b32.xlu0 %v668_v41, %s1690_s17 }
 0x623   : > { %v675_v44 = vpop.permute.xlu1 %674 }
 0x624   : > { %v1864_v45 = vadd.f32 %v675_v44, %v659_v43 }
 0x626   : > { %1581 = vtanh.f32 %v1864_v45 }
 0x62c   : > { %v1582_v46 = vpop.eup %1581 }
 0x62d   : > { %686 = vrot.lane.b32.xlu0 %v1582_v46, %s1691_s18 }
 0x63a   : > { %v673_v49 = vpop.permute.xlu0 %672 }
 0x63b   : > { %v1869_v50 = vadd.f32 %v673_v49, %v658_v48 }
 0x63d   : > { %1583 = vtanh.f32 %v1869_v50  ;;  %v779_v39 = vrot.slane %v1869_v50, 7 }
 0x643   : > { %v1584_v52 = vpop.eup %1583 }
 0x644   : > { %684 = vrot.lane.b32.xlu2 %v1584_v52, %s1691_s18 }
 0x69e   : > { %v685_v53 = vpop.permute.xlu2 %684 }
 0x69f   : > { %v687_v54 = vpop.permute.xlu0 %686  ;;  %v1873_v55 = vmul.f32 %v685_v53, %v633_v40  ;;  %v780_v40 = vrot.slane %v1864_v45, 7 }
 0x6a0   : > { %v1875_v56 = vmul.f32 %v687_v54, %v648_v28 }
 0x6a1   : > { %v703_v57 = vrot.slane %v1873_v55, 2 }
 0x6a2   : > { %v704_v58 = vrot.slane %v1875_v56, 1 }
 0x6a4   : > { %v705_v51 = vsel %vm456_vm10, %v704_v58, %v703_v57 }
 0x6a5   : > { %706 = vrot.lane.b32.xlu1 %v705_v51, %s1690_s17 }
 0x717   : > { %v707_v59 = vpop.permute.xlu1 %706 }
 0x718   : > { %1488 = vmatmul.msk.f32.vlgmr.msrb.gmra.mxu1 %vm301_vm1, %v707_v59 }
 0x795   : > { %v727_v63 = vpop.f32.mrf.mxu1 }
 0x796   : > { %v731_v60 = vrot.slane %v727_v63, 5  ;;  %v732_v0 = vrot.slane %v727_v63, 6 }
 0x798   : > { %v735_v1 = vadd.f32 %v731_v60, %v1808_v23  ;;  %v736_v2 = vadd.f32 %v732_v0, %v1805_v21 }
 0x79a   : > { %1585 = vtanh.f32 %v735_v1  ;;  %v1489_v6 = vmul.f32 -1.442695, %v735_v1  ;;  %v1490_v11 = vmul.f32 -1.442695, %v736_v2 }
 0x79b   : > { %1587 = vtanh.f32 %v736_v2 }
 0x79c   : > { %1589 = vpow2.f32 %v1489_v6 }
 0x7a0   : > { %v1586_v3 = vpop.eup %1585 }
 0x7a1   : > { %v1588_v5 = vpop.eup %1587  ;;  %787 = vrot.lane.b32.xlu2 %v1586_v3, %s1691_s18 }
 0x7a2   : > { %789 = vrot.lane.b32.xlu0 %v1588_v5, %s1691_s18  ;;  %v1590_v8 = vpop.eup %1589 }
 0x7a3   : > { %v743_v9 = vadd.f32 1.0, %v1590_v8 }
 0x7a5   : > { %1591 = vrcp.f32 %v743_v9  ;;  %v756_v18 = vand.u32 2147483648, %v743_v9  ;;  %vm750_vm14 = vweird.f32 %v743_v9  ;;  %v754_v19 = vand.u32 2147483647, %v743_v9 }
 0x7a6   : > { %1593 = vpow2.f32 %v1490_v11 }
 0x7a7   : > { %v757_v22 = vor.u32 1.1754944e-38, %v756_v18  ;;  %vm755_vm0 = vcmp.eq.f32.partialorder %v754_v19, 8.507059e+37 }
 0x7ab   : > { %v1592_v10 = vpop.eup %1591 }
 0x7ac   : > { %v746_v12 = vmul.f32 %v1592_v10, %v743_v9  ;;  %v1594_v15 = vpop.eup %1593  ;;  %vm751_vm13 = vweird.f32 %v1592_v10 }
 0x7ad   : > { %v744_v16 = vadd.f32 1.0, %v1594_v15  ;;  %vm752_vm15 = vmor %vm750_vm14, %vm751_vm13 }
 0x7ae   : > { %v747_v13 = vsub.f32 1.0, %v746_v12 }
 0x7af   : > { %1595 = vrcp.f32 %v744_v16  ;;  %v771_v32 = vand.u32 2147483648, %v744_v16  ;;  %vm765_vm3 = vweird.f32 %v744_v16  ;;  %v769_v33 = vand.u32 2147483647, %v744_v16 }
 0x7b0   : > { %v748_v14 = vmul.f32 %v1592_v10, %v747_v13 }
 0x7b1   : > { %v772_v35 = vor.u32 1.1754944e-38, %v771_v32  ;;  %vm770_vm5 = vcmp.eq.f32.partialorder %v769_v33, 8.507059e+37 }
 0x7b2   : > { %v749_v17 = vadd.f32 %v1592_v10, %v748_v14 }
 0x7b4   : > { %v753_v20 = vsel %vm752_vm15, %v1592_v10, %v749_v17 }
 0x7b5   : > { %v758_v25 = vsel %vm755_vm0, %v757_v22, %v753_v20  ;;  %v1596_v27 = vpop.eup %1595 }
 0x7b6   : > { %v761_v28 = vmul.f32 %v1596_v27, %v744_v16  ;;  %vm766_vm2 = vweird.f32 %v1596_v27  ;;  %v783_v41 = vmul.f32 %v779_v39, %v758_v25 }
 0x7b7   : > { %vm767_vm4 = vmor %vm765_vm3, %vm766_vm2 }
 0x7b8   : > { %v762_v29 = vsub.f32 1.0, %v761_v28 }
 0x7ba   : > { %v763_v30 = vmul.f32 %v1596_v27, %v762_v29 }
 0x7bc   : > { %v764_v31 = vadd.f32 %v1596_v27, %v763_v30 }
 0x7be   : > { %v768_v34 = vsel %vm767_vm4, %v1596_v27, %v764_v31 }
 0x7bf   : > { %v773_v37 = vsel %vm770_vm5, %v772_v35, %v768_v34 }
 0x7c0   : > { %v784_v42 = vmul.f32 %v780_v40, %v773_v37 }
 0x7fb   : > { %v788_v24 = vpop.permute.xlu2 %787 }
 0x7fc   : > { %v793_v26 = vmul.f32 %v788_v24, %v758_v25 }
 0x7fe   : > { %797 = vrot.lane.b32.xlu1 %v793_v26, %s1690_s17 }
 0x814   : > { %v790_v36 = vpop.permute.xlu0 %789 }
 0x815   : > { %v794_v38 = vmul.f32 %v790_v36, %v773_v37 }
 0x817   : > { %799 = vrot.lane.b32.xlu2 %v794_v38, %s1690_s17 }
 0x870   : > { %v798_v43 = vpop.permute.xlu1 %797 }
 0x871   : > { %v800_v44 = vpop.permute.xlu2 %799  ;;  %v1890_v46 = vadd.f32 %v798_v43, %v783_v41 }
 0x872   : > { %v1892_v47 = vadd.f32 %v800_v44, %v784_v42 }
 0x873   : > { %1597 = vtanh.f32 %v1890_v46  ;;  %v904_v38 = vrot.slane %v1890_v46, 7 }
 0x874   : > { %1599 = vtanh.f32 %v1892_v47  ;;  %v905_v43 = vrot.slane %v1892_v47, 7 }
 0x879   : > { %v1598_v48 = vpop.eup %1597 }
 0x87a   : > { %v1600_v49 = vpop.eup %1599  ;;  %809 = vrot.lane.b32.xlu0 %v1598_v48, %s1691_s18 }
 0x87b   : > { %811 = vrot.lane.b32.xlu1 %v1600_v49, %s1691_s18 }
 0x8ec   : > { %v810_v50 = vpop.permute.xlu0 %809 }
 0x8ed   : > { %v812_v45 = vpop.permute.xlu1 %811  ;;  %v1898_v52 = vmul.f32 %v810_v50, %v758_v25 }
 0x8ee   : > { %v1900_v53 = vmul.f32 %v812_v45, %v773_v37 }
 0x8ef   : > { %v828_v54 = vrot.slane %v1898_v52, 3 }
 0x8f0   : > { %v829_v57 = vrot.slane %v1900_v53, 2 }
 0x8f2   : > { %v830_v58 = vsel %vm456_vm10, %v829_v57, %v828_v54 }
 0x8f3   : > { %831 = vrot.lane.b32.xlu2 %v830_v58, %s1690_s17 }
 0x94d   : > { %v832_v51 = vpop.permute.xlu2 %831 }
 0x94e   : > { %1491 = vmatmul.msk.f32.vlgmr.msrb.gmra.mxu2 %vm301_vm1, %v832_v51 }
 0x9d1   : > { %v852_v59 = vpop.f32.mrf.mxu2 }
 0x9d2   : > { %v856_v63 = vrot.slane %v852_v59, 4  ;;  %v857_v60 = vrot.slane %v852_v59, 5 }
 0x9d4   : > { %v860_v0 = vadd.f32 %v856_v63, %v1808_v23  ;;  %v861_v1 = vadd.f32 %v857_v60, %v1805_v21 }
 0x9d6   : > { %1601 = vtanh.f32 %v860_v0  ;;  %v1492_v5 = vmul.f32 -1.442695, %v860_v0  ;;  %v1493_v6 = vmul.f32 -1.442695, %v861_v1 }
 0x9d7   : > { %1603 = vtanh.f32 %v861_v1 }
 0x9d8   : > { %1605 = vpow2.f32 %v1492_v5 }
 0x9d9   : > { %1607 = vpow2.f32 %v1493_v6 }
 0x9dc   : > { %v1602_v2 = vpop.eup %1601 }
 0x9dd   : > { %v1604_v3 = vpop.eup %1603  ;;  %912 = vrot.lane.b32.xlu0 %v1602_v2, %s1691_s18 }
 0x9de   : > { %914 = vrot.lane.b32.xlu1 %v1604_v3, %s1691_s18  ;;  %v1606_v8 = vpop.eup %1605 }
 0x9df   : > { %v1608_v9 = vpop.eup %1607  ;;  %v868_v10 = vadd.f32 1.0, %v1606_v8 }
 0x9e0   : > { %v869_v11 = vadd.f32 1.0, %v1608_v9 }
 0x9e1   : > { %1609 = vrcp.f32 %v868_v10  ;;  %v881_v24 = vand.u32 2147483648, %v868_v10  ;;  %vm875_vm8 = vweird.f32 %v868_v10  ;;  %v879_v26 = vand.u32 2147483647, %v868_v10 }
 0x9e2   : > { %1611 = vrcp.f32 %v869_v11  ;;  %v896_v25 = vand.u32 2147483648, %v869_v11  ;;  %vm890_vm9 = vweird.f32 %v869_v11  ;;  %v894_v27 = vand.u32 2147483647, %v869_v11 }
 0x9e3   : > { %v882_v30 = vor.u32 1.1754944e-38, %v881_v24  ;;  %vm880_vm13 = vcmp.eq.f32.partialorder %v879_v26, 8.507059e+37 }
 0x9e4   : > { %v897_v31 = vor.u32 1.1754944e-38, %v896_v25  ;;  %vm895_vm14 = vcmp.eq.f32.partialorder %v894_v27, 8.507059e+37 }
 0x9e7   : > { %v1610_v12 = vpop.eup %1609 }
 0x9e8   : > { %v1612_v13 = vpop.eup %1611  ;;  %v871_v14 = vmul.f32 %v1610_v12, %v868_v10  ;;  %vm876_vm6 = vweird.f32 %v1610_v12 }
 0x9e9   : > { %v886_v15 = vmul.f32 %v1612_v13, %v869_v11  ;;  %vm891_vm7 = vweird.f32 %v1612_v13  ;;  %vm877_vm11 = vmor %vm875_vm8, %vm876_vm6 }
 0x9ea   : > { %v872_v16 = vsub.f32 1.0, %v871_v14  ;;  %vm892_vm12 = vmor %vm890_vm9, %vm891_vm7 }
 0x9eb   : > { %v887_v17 = vsub.f32 1.0, %v886_v15 }
 0x9ec   : > { %v873_v18 = vmul.f32 %v1610_v12, %v872_v16 }
 0x9ed   : > { %v888_v19 = vmul.f32 %v1612_v13, %v887_v17 }
 0x9ee   : > { %v874_v20 = vadd.f32 %v1610_v12, %v873_v18 }
 0x9ef   : > { %v889_v22 = vadd.f32 %v1612_v13, %v888_v19 }
 0x9f0   : > { %v878_v28 = vsel %vm877_vm11, %v1610_v12, %v874_v20 }
 0x9f1   : > { %v893_v29 = vsel %vm892_vm12, %v1612_v13, %v889_v22  ;;  %v883_v33 = vsel %vm880_vm13, %v882_v30, %v878_v28 }
 0x9f2   : > { %v898_v35 = vsel %vm895_vm14, %v897_v31, %v893_v29  ;;  %v908_v39 = vmul.f32 %v904_v38, %v883_v33 }
 0x9f3   : > { %v909_v44 = vmul.f32 %v905_v43, %v898_v35 }
 0xa4f   : > { %v913_v32 = vpop.permute.xlu0 %912 }
 0xa50   : > { %v915_v34 = vpop.permute.xlu1 %914  ;;  %v918_v36 = vmul.f32 %v913_v32, %v883_v33 }
 0xa51   : > { %v919_v37 = vmul.f32 %v915_v34, %v898_v35 }
 0xa52   : > { %922 = vrot.lane.b32.xlu2 %v918_v36, %s1690_s17 }
 0xa53   : > { %924 = vrot.lane.b32.xlu0 %v919_v37, %s1690_s17 }
 0xaac   : > { %v923_v40 = vpop.permute.xlu2 %922 }
 0xaad   : > { %v1914_v41 = vadd.f32 %v923_v40, %v908_v39 }
 0xaaf   : > { %1613 = vtanh.f32 %v1914_v41 }
 0xab5   : > { %v1614_v42 = vpop.eup %1613 }
 0xab6   : > { %934 = vrot.lane.b32.xlu1 %v1614_v42, %s1691_s18 }
 0xac5   : > { %v925_v48 = vpop.permute.xlu0 %924 }
 0xac6   : > { %v1919_v49 = vadd.f32 %v925_v48, %v909_v44  ;;  %v1029_v48 = vrot.slane %v1914_v41, 7 }
 0xac8   : > { %1615 = vtanh.f32 %v1919_v49  ;;  %v1030_v39 = vrot.slane %v1919_v49, 7 }
 0xace   : > { %v1616_v50 = vpop.eup %1615 }
 0xacf   : > { %936 = vrot.lane.b32.xlu2 %v1616_v50, %s1691_s18 }
 0xb28   : > { %v935_v46 = vpop.permute.xlu1 %934 }
 0xb29   : > { %v937_v45 = vpop.permute.xlu2 %936  ;;  %v1923_v54 = vmul.f32 %v935_v46, %v883_v33 }
 0xb2a   : > { %v1925_v57 = vmul.f32 %v937_v45, %v898_v35 }
 0xb2b   : > { %v953_v58 = vrot.slane %v1923_v54, 4 }
 0xb2c   : > { %v954_v51 = vrot.slane %v1925_v57, 3 }
 0xb2e   : > { %v955_v47 = vsel %vm456_vm10, %v954_v51, %v953_v58 }
 0xb2f   : > { %956 = vrot.lane.b32.xlu0 %v955_v47, %s1690_s17 }
 0xba1   : > { %v957_v59 = vpop.permute.xlu0 %956 }
 0xba2   : > { %1494 = vmatmul.msk.f32.vlgmr.msrb.gmra.mxu3 %vm301_vm1, %v957_v59 }
 0xc25   : > { %v977_v63 = vpop.f32.mrf.mxu3 }
 0xc26   : > { %v981_v60 = vrot.slane %v977_v63, 3  ;;  %v982_v0 = vrot.slane %v977_v63, 4 }
 0xc28   : > { %v985_v1 = vadd.f32 %v981_v60, %v1808_v23  ;;  %v986_v2 = vadd.f32 %v982_v0, %v1805_v21 }
 0xc2a   : > { %1617 = vtanh.f32 %v985_v1  ;;  %v1496_v6 = vmul.f32 -1.442695, %v986_v2  ;;  %v1495_v11 = vmul.f32 -1.442695, %v985_v1 }
 0xc2b   : > { %1619 = vtanh.f32 %v986_v2 }
 0xc2c   : > { %1621 = vpow2.f32 %v1496_v6 }
 0xc30   : > { %v1618_v3 = vpop.eup %1617 }
 0xc31   : > { %v1620_v5 = vpop.eup %1619  ;;  %1037 = vrot.lane.b32.xlu1 %v1618_v3, %s1691_s18 }
 0xc32   : > { %1039 = vrot.lane.b32.xlu2 %v1620_v5, %s1691_s18  ;;  %v1622_v8 = vpop.eup %1621 }
 0xc33   : > { %v994_v9 = vadd.f32 1.0, %v1622_v8 }
 0xc35   : > { %1623 = vrcp.f32 %v994_v9  ;;  %v1021_v18 = vand.u32 2147483648, %v994_v9  ;;  %vm1015_vm0 = vweird.f32 %v994_v9  ;;  %v1019_v19 = vand.u32 2147483647, %v994_v9 }
 0xc36   : > { %1625 = vpow2.f32 %v1495_v11 }
 0xc37   : > { %v1022_v22 = vor.u32 1.1754944e-38, %v1021_v18  ;;  %vm1020_vm3 = vcmp.eq.f32.partialorder %v1019_v19, 8.507059e+37 }
 0xc3b   : > { %v1624_v10 = vpop.eup %1623 }
 0xc3c   : > { %v1011_v12 = vmul.f32 %v1624_v10, %v994_v9  ;;  %v1626_v14 = vpop.eup %1625  ;;  %vm1016_vm15 = vweird.f32 %v1624_v10 }
 0xc3d   : > { %v993_v16 = vadd.f32 1.0, %v1626_v14  ;;  %vm1017_vm2 = vmor %vm1015_vm0, %vm1016_vm15 }
 0xc3e   : > { %v1012_v13 = vsub.f32 1.0, %v1011_v12 }
 0xc3f   : > { %1627 = vrcp.f32 %v993_v16  ;;  %v1006_v32 = vand.u32 2147483648, %v993_v16  ;;  %vm1000_vm5 = vweird.f32 %v993_v16  ;;  %v1004_v33 = vand.u32 2147483647, %v993_v16 }
 0xc40   : > { %v1013_v15 = vmul.f32 %v1624_v10, %v1012_v13 }
 0xc41   : > { %v1007_v35 = vor.u32 1.1754944e-38, %v1006_v32  ;;  %vm1005_vm7 = vcmp.eq.f32.partialorder %v1004_v33, 8.507059e+37 }
 0xc42   : > { %v1014_v17 = vadd.f32 %v1624_v10, %v1013_v15 }
 0xc44   : > { %v1018_v20 = vsel %vm1017_vm2, %v1624_v10, %v1014_v17 }
 0xc45   : > { %v1023_v25 = vsel %vm1020_vm3, %v1022_v22, %v1018_v20  ;;  %v1628_v26 = vpop.eup %1627 }
 0xc46   : > { %v996_v28 = vmul.f32 %v1628_v26, %v993_v16  ;;  %vm1001_vm4 = vweird.f32 %v1628_v26  ;;  %v1034_v40 = vmul.f32 %v1030_v39, %v1023_v25 }
 0xc47   : > { %vm1002_vm6 = vmor %vm1000_vm5, %vm1001_vm4 }
 0xc48   : > { %v997_v29 = vsub.f32 1.0, %v996_v28 }
 0xc4a   : > { %v998_v30 = vmul.f32 %v1628_v26, %v997_v29 }
 0xc4c   : > { %v999_v31 = vadd.f32 %v1628_v26, %v998_v30 }
 0xc4e   : > { %v1003_v34 = vsel %vm1002_vm6, %v1628_v26, %v999_v31 }
 0xc4f   : > { %v1008_v37 = vsel %vm1005_vm7, %v1007_v35, %v1003_v34 }
 0xc50   : > { %v1033_v50 = vmul.f32 %v1029_v48, %v1008_v37 }
 0xc8c   : > { %v1040_v24 = vpop.permute.xlu2 %1039 }
 0xc8d   : > { %v1044_v27 = vmul.f32 %v1040_v24, %v1023_v25 }
 0xc8f   : > { %1049 = vrot.lane.b32.xlu1 %v1044_v27, %s1690_s17 }
 0xca3   : > { %v1038_v36 = vpop.permute.xlu1 %1037 }
 0xca4   : > { %v1043_v38 = vmul.f32 %v1038_v36, %v1008_v37 }
 0xca6   : > { %1047 = vrot.lane.b32.xlu0 %v1043_v38, %s1690_s17 }
 0xd01   : > { %v1050_v42 = vpop.permute.xlu1 %1049 }
 0xd02   : > { %v1939_v43 = vadd.f32 %v1050_v42, %v1034_v40 }
 0xd04   : > { %1629 = vtanh.f32 %v1939_v43  ;;  %v1155_v48 = vrot.slane %v1939_v43, 7 }
 0xd0a   : > { %v1630_v44 = vpop.eup %1629 }
 0xd0b   : > { %1061 = vrot.lane.b32.xlu0 %v1630_v44, %s1691_s18 }
 0xd18   : > { %v1048_v46 = vpop.permute.xlu0 %1047 }
 0xd19   : > { %v1944_v45 = vadd.f32 %v1048_v46, %v1033_v50 }
 0xd1b   : > { %1631 = vtanh.f32 %v1944_v45  ;;  %v1154_v44 = vrot.slane %v1944_v45, 7 }
 0xd21   : > { %v1632_v58 = vpop.eup %1631 }
 0xd22   : > { %1059 = vrot.lane.b32.xlu2 %v1632_v58, %s1691_s18 }
 0xd7c   : > { %v1060_v49 = vpop.permute.xlu2 %1059 }
 0xd7d   : > { %v1062_v51 = vpop.permute.xlu0 %1061  ;;  %v1948_v47 = vmul.f32 %v1060_v49, %v1008_v37 }
 0xd7e   : > { %v1950_v59 = vmul.f32 %v1062_v51, %v1023_v25 }
 0xd7f   : > { %v1078_v63 = vrot.slane %v1948_v47, 5 }
 0xd80   : > { %v1079_v60 = vrot.slane %v1950_v59, 4 }
 0xd82   : > { %v1080_v41 = vsel %vm456_vm10, %v1079_v60, %v1078_v63 }
 0xd83   : > { %1081 = vrot.lane.b32.xlu1 %v1080_v41, %s1690_s17 }
 0xdf5   : > { %v1082_v0 = vpop.permute.xlu1 %1081 }
 0xdf6   : > { %1497 = vmatmul.msk.f32.vlgmr.msrb.gmra.mxu0 %vm301_vm1, %v1082_v0 }
 0xe73   : > { %v1102_v1 = vpop.f32.mrf.mxu0 }
 0xe74   : > { %v1106_v2 = vrot.slane %v1102_v1, 2  ;;  %v1107_v3 = vrot.slane %v1102_v1, 3 }
 0xe76   : > { %v1110_v5 = vadd.f32 %v1106_v2, %v1808_v23  ;;  %v1111_v6 = vadd.f32 %v1107_v3, %v1805_v21 }
 0xe78   : > { %1633 = vtanh.f32 %v1110_v5  ;;  %v1498_v10 = vmul.f32 -1.442695, %v1110_v5  ;;  %v1499_v14 = vmul.f32 -1.442695, %v1111_v6 }
 0xe79   : > { %1635 = vtanh.f32 %v1111_v6 }
 0xe7a   : > { %1637 = vpow2.f32 %v1498_v10 }
 0xe7e   : > { %v1634_v8 = vpop.eup %1633 }
 0xe7f   : > { %v1636_v9 = vpop.eup %1635  ;;  %1162 = vrot.lane.b32.xlu2 %v1634_v8, %s1691_s18 }
 0xe80   : > { %1164 = vrot.lane.b32.xlu0 %v1636_v9, %s1691_s18  ;;  %v1638_v11 = vpop.eup %1637 }
 0xe81   : > { %v1118_v12 = vadd.f32 1.0, %v1638_v11 }
 0xe83   : > { %1639 = vrcp.f32 %v1118_v12  ;;  %v1131_v22 = vand.u32 2147483648, %v1118_v12  ;;  %vm1125_vm9 = vweird.f32 %v1118_v12  ;;  %v1129_v24 = vand.u32 2147483647, %v1118_v12 }
 0xe84   : > { %1641 = vpow2.f32 %v1499_v14 }
 0xe85   : > { %v1132_v26 = vor.u32 1.1754944e-38, %v1131_v22  ;;  %vm1130_vm12 = vcmp.eq.f32.partialorder %v1129_v24, 8.507059e+37 }
 0xe89   : > { %v1640_v13 = vpop.eup %1639 }
 0xe8a   : > { %v1121_v15 = vmul.f32 %v1640_v13, %v1118_v12  ;;  %v1642_v18 = vpop.eup %1641  ;;  %vm1126_vm8 = vweird.f32 %v1640_v13 }
 0xe8b   : > { %v1119_v19 = vadd.f32 1.0, %v1642_v18  ;;  %vm1127_vm11 = vmor %vm1125_vm9, %vm1126_vm8  ;;  %vm452_vm8 = vcmask 253952   ;;  %vm576_vm9 = vcmask 254977  }
 0xe8c   : > { %v1122_v16 = vsub.f32 1.0, %v1121_v15 }
 0xe8d   : > { %1643 = vrcp.f32 %v1119_v19  ;;  %v1146_v35 = vand.u32 2147483648, %v1119_v19  ;;  %vm1140_vm14 = vweird.f32 %v1119_v19  ;;  %v1144_v36 = vand.u32 2147483647, %v1119_v19 }
 0xe8e   : > { %v1123_v17 = vmul.f32 %v1640_v13, %v1122_v16 }
 0xe8f   : > { %v1147_v38 = vor.u32 1.1754944e-38, %v1146_v35  ;;  %vm1145_vm0 = vcmp.eq.f32.partialorder %v1144_v36, 8.507059e+37 }
 0xe90   : > { %v1124_v20 = vadd.f32 %v1640_v13, %v1123_v17 }
 0xe92   : > { %v1128_v25 = vsel %vm1127_vm11, %v1640_v13, %v1124_v20  ;;  %vm825_vm11 = vcmask 257027  }
 0xe93   : > { %v1133_v28 = vsel %vm1130_vm12, %v1132_v26, %v1128_v25  ;;  %v1644_v30 = vpop.eup %1643  ;;  %vm950_vm12 = vcmask 258052  }
 0xe94   : > { %v1136_v31 = vmul.f32 %v1644_v30, %v1119_v19  ;;  %vm1141_vm13 = vweird.f32 %v1644_v30  ;;  %v1158_v50 = vmul.f32 %v1154_v44, %v1133_v28 }
 0xe95   : > { %vm1142_vm15 = vmor %vm1140_vm14, %vm1141_vm13  ;;  %vm1200_vm13 = vcmask 260102   ;;  %vm700_vm14 = vcmask 256002  }
 0xe96   : > { %v1137_v32 = vsub.f32 1.0, %v1136_v31 }
 0xe98   : > { %v1138_v33 = vmul.f32 %v1644_v30, %v1137_v32 }
 0xe9a   : > { %v1139_v34 = vadd.f32 %v1644_v30, %v1138_v33 }
 0xe9c   : > { %v1143_v37 = vsel %vm1142_vm15, %v1644_v30, %v1139_v34  ;;  %vm1075_vm15 = vcmask 259077  }
 0xe9d   : > { %v1148_v40 = vsel %vm1145_vm0, %v1147_v38, %v1143_v37  ;;  %vm1325_vm0 = vcmask 261127  }
 0xe9e   : > { %v1159_v46 = vmul.f32 %v1155_v48, %v1148_v40 }
 0xed9   : > { %v1163_v27 = vpop.permute.xlu2 %1162 }
 0xeda   : > { %v1168_v29 = vmul.f32 %v1163_v27, %v1133_v28 }
 0xedc   : > { %1172 = vrot.lane.b32.xlu1 %v1168_v29, %s1690_s17 }
 0xef2   : > { %v1165_v39 = vpop.permute.xlu0 %1164 }
 0xef3   : > { %v1169_v42 = vmul.f32 %v1165_v39, %v1148_v40 }
 0xef5   : > { %1174 = vrot.lane.b32.xlu2 %v1169_v42, %s1690_s17 }
 0xf4e   : > { %v1173_v58 = vpop.permute.xlu1 %1172 }
 0xf4f   : > { %v1175_v49 = vpop.permute.xlu2 %1174  ;;  %v1965_v51 = vadd.f32 %v1173_v58, %v1158_v50 }
 0xf50   : > { %v1967_v63 = vadd.f32 %v1175_v49, %v1159_v46 }
 0xf51   : > { %1645 = vtanh.f32 %v1965_v51 }
 0xf52   : > { %1647 = vtanh.f32 %v1967_v63  ;;  %v1280_v46 = vrot.slane %v1967_v63, 7 }
 0xf57   : > { %v1646_v60 = vpop.eup %1645 }
 0xf58   : > { %v1648_v41 = vpop.eup %1647  ;;  %1184 = vrot.lane.b32.xlu0 %v1646_v60, %s1691_s18 }
 0xf59   : > { %1186 = vrot.lane.b32.xlu1 %v1648_v41, %s1691_s18 }
 0xfca   : > { %v1185_v45 = vpop.permute.xlu0 %1184 }
 0xfcb   : > { %v1187_v43 = vpop.permute.xlu1 %1186  ;;  %v1973_v0 = vmul.f32 %v1185_v45, %v1133_v28 }
 0xfcc   : > { %v1975_v1 = vmul.f32 %v1187_v43, %v1148_v40 }
 0xfcd   : > { %v1203_v2 = vrot.slane %v1973_v0, 6 }
 0xfce   : > { %v1204_v3 = vrot.slane %v1975_v1, 5 }
 0xfd0   : > { %v1205_v5 = vsel %vm456_vm10, %v1204_v3, %v1203_v2 }
 0xfd1   : > { %1206 = vrot.lane.b32.xlu2 %v1205_v5, %s1690_s17 }
0x102b   : > { %v1207_v6 = vpop.permute.xlu2 %1206 }
0x102c   : > { %1500 = vmatmul.msk.f32.vlgmr.msra.gmra.mxu1 %vm301_vm1, %v1207_v6 }
0x10a9   : > { %v1227_v8 = vpop.f32.mrf.mxu1 }
0x10aa   : > { %v1231_v9 = vrot.slane %v1227_v8, 1  ;;  %v1232_v10 = vrot.slane %v1227_v8, 2 }
0x10ac   : > { %v1235_v11 = vadd.f32 %v1231_v9, %v1808_v23  ;;  %v1236_v12 = vadd.f32 %v1232_v10, %v1805_v21 }
0x10ae   : > { %1649 = vtanh.f32 %v1235_v11  ;;  %v1501_v15 = vmul.f32 -1.442695, %v1235_v11  ;;  %v1502_v16 = vmul.f32 -1.442695, %v1236_v12 }
0x10af   : > { %1651 = vtanh.f32 %v1236_v12 }
0x10b0   : > { %1653 = vpow2.f32 %v1501_v15 }
0x10b1   : > { %1655 = vpow2.f32 %v1502_v16 }
0x10b4   : > { %v1650_v13 = vpop.eup %1649 }
0x10b5   : > { %v1652_v14 = vpop.eup %1651  ;;  %1287 = vrot.lane.b32.xlu1 %v1650_v13, %s1691_s18 }
0x10b6   : > { %1289 = vrot.lane.b32.xlu0 %v1652_v14, %s1691_s18  ;;  %v1654_v17 = vpop.eup %1653 }
0x10b7   : > { %v1656_v18 = vpop.eup %1655  ;;  %v1243_v19 = vadd.f32 1.0, %v1654_v17 }
0x10b8   : > { %v1244_v20 = vadd.f32 1.0, %v1656_v18 }
0x10b9   : > { %1657 = vrcp.f32 %v1243_v19  ;;  %v1256_v31 = vand.u32 2147483648, %v1243_v19  ;;  %vm1250_vm2 = vweird.f32 %v1243_v19  ;;  %v1254_v33 = vand.u32 2147483647, %v1243_v19 }
0x10ba   : > { %1659 = vrcp.f32 %v1244_v20  ;;  %v1271_v32 = vand.u32 2147483648, %v1244_v20  ;;  %vm1265_vm3 = vweird.f32 %v1244_v20  ;;  %v1269_v34 = vand.u32 2147483647, %v1244_v20 }
0x10bb   : > { %v1257_v37 = vor.u32 1.1754944e-38, %v1256_v31  ;;  %vm1255_vm6 = vcmp.eq.f32.partialorder %v1254_v33, 8.507059e+37 }
0x10bc   : > { %v1272_v38 = vor.u32 1.1754944e-38, %v1271_v32  ;;  %vm1270_vm7 = vcmp.eq.f32.partialorder %v1269_v34, 8.507059e+37 }
0x10bf   : > { %v1658_v23 = vpop.eup %1657 }
0x10c0   : > { %v1660_v21 = vpop.eup %1659  ;;  %v1246_v22 = vmul.f32 %v1658_v23, %v1243_v19  ;;  %vm1251_vm1 = vweird.f32 %v1658_v23 }
0x10c1   : > { %v1261_v24 = vmul.f32 %v1660_v21, %v1244_v20  ;;  %vm1266_vm10 = vweird.f32 %v1660_v21  ;;  %vm1252_vm4 = vmor %vm1250_vm2, %vm1251_vm1 }
0x10c2   : > { %v1247_v25 = vsub.f32 1.0, %v1246_v22  ;;  %vm1267_vm5 = vmor %vm1265_vm3, %vm1266_vm10 }
0x10c3   : > { %v1262_v26 = vsub.f32 1.0, %v1261_v24 }
0x10c4   : > { %v1248_v27 = vmul.f32 %v1658_v23, %v1247_v25 }
0x10c5   : > { %v1263_v28 = vmul.f32 %v1660_v21, %v1262_v26 }
0x10c6   : > { %v1249_v29 = vadd.f32 %v1658_v23, %v1248_v27 }
0x10c7   : > { %v1264_v30 = vadd.f32 %v1660_v21, %v1263_v28 }
0x10c8   : > { %v1253_v35 = vsel %vm1252_vm4, %v1658_v23, %v1249_v29 }
0x10c9   : > { %v1268_v36 = vsel %vm1267_vm5, %v1660_v21, %v1264_v30  ;;  %v1258_v40 = vsel %vm1255_vm6, %v1257_v37, %v1253_v35 }
0x10ca   : > { %v1273_v44 = vsel %vm1270_vm7, %v1272_v38, %v1268_v36 }
0x10cb   : > { %v1284_v58 = vmul.f32 %v1280_v46, %v1273_v44 }
0x1127   : > { %v1288_v39 = vpop.permute.xlu1 %1287 }
0x1128   : > { %v1290_v42 = vpop.permute.xlu0 %1289  ;;  %v1293_v48 = vmul.f32 %v1288_v39, %v1258_v40 }
0x1129   : > { %v1294_v50 = vmul.f32 %v1290_v42, %v1273_v44 }
0x112a   : > { %1297 = vrot.lane.b32.xlu0 %v1293_v48, %s1690_s17 }
0x112b   : > { %1299 = vrot.lane.b32.xlu2 %v1294_v50, %s1690_s17 }
0x1132   : > { %446 = vrot.lane.b32.xlu0 %v1826_v7, %s1690_s17 }
0x113a   : > { %572 = vrot.lane.b32.xlu0 %v1850_v62, %s1690_s17  ;;  %v1279_v62 = vrot.slane %v1965_v51, 7 }
0x1142   : > { %819 = vrot.lane.b32.xlu0 %v1898_v52, %s1690_s17  ;;  %v1283_v52 = vmul.f32 %v1279_v62, %v1258_v40 }
0x114a   : > { %946 = vrot.lane.b32.xlu0 %v1925_v57, %s1690_s17 }
0x1152   : > { %1194 = vrot.lane.b32.xlu0 %v1973_v0, %s1690_s17 }
0x1185   : > { %v1300_v49 = vpop.permute.xlu2 %1299 }
0x1186   : > { %v1304_v60 = vadd.f32 %v1300_v49, %v1284_v58 }
0x1188   : > { %1661 = vtanh.f32 %v1304_v60 }
0x118e   : > { %v1662_v7 = vpop.eup %1661 }
0x118f   : > { %1311 = vrot.lane.b32.xlu1 %v1662_v7, %s1691_s18 }
0x1197   : > { %448 = vrot.lane.b32.xlu1 %v1823_v4, %s1690_s17 }
0x119c   : > { %v1298_v57 = vpop.permute.xlu0 %1297 }
0x119d   : > { %v1303_v41 = vadd.f32 %v1298_v57, %v1283_v52 }
0x119f   : > { %1663 = vtanh.f32 %v1303_v41  ;;  %694 = vrot.lane.b32.xlu1 %v1873_v55, %s1690_s17 }
0x11a4   : > { %v447_v63 = vpop.permute.xlu0 %446 }
0x11a5   : > { %v1664_v45 = vpop.eup %1663  ;;  %453 = vst.msk [vmem:[%s1766_s16] sm:$0x1] %vm452_vm8, %v447_v63 }
0x11a6   : > { %1309 = vrot.lane.b32.xlu2 %v1664_v45, %s1691_s18 }
0x11a7   : > { %821 = vrot.lane.b32.xlu1 %v1900_v53, %s1690_s17 }
0x11ac   : > { %v573_v4 = vpop.permute.xlu0 %572 }
0x11ad   : > { %578 = vst.msk [vmem:[%s1766_s16 + $0x8] sm:$0x2] %vm576_vm9, %v573_v4 }
0x11ae   : > { %570 = vrot.lane.b32.xlu2 %v1848_v61, %s1690_s17 }
0x11af   : > { %1069 = vrot.lane.b32.xlu1 %v1948_v47, %s1690_s17 }
0x11b4   : > { %v820_v55 = vpop.permute.xlu0 %819 }
0x11b5   : > { %826 = vst.msk [vmem:[%s1766_s16] sm:$0x8] %vm825_vm11, %v820_v55 }
0x11b6   : > { %696 = vrot.lane.b32.xlu2 %v1875_v56, %s1690_s17 }
0x11b7   : > { %1196 = vrot.lane.b32.xlu1 %v1975_v1, %s1690_s17 }
0x11bc   : > { %v947_v53 = vpop.permute.xlu0 %946 }
0x11bd   : > { %952 = vst.msk [vmem:[%s1766_s16 + $0x8] sm:$0x10] %vm950_vm12, %v947_v53 }
0x11be   : > { %944 = vrot.lane.b32.xlu2 %v1923_v54, %s1690_s17 }
0x11c4   : > { %v1195_v61 = vpop.permute.xlu0 %1194 }
0x11c5   : > { %1201 = vst.msk [vmem:[%s1766_s16] sm:$0x40] %vm1200_vm13, %v1195_v61 }
0x11c6   : > { %1071 = vrot.lane.b32.xlu2 %v1950_v59, %s1690_s17  ;;  %v1336_v59 = vrot.slane %v1304_v60, 7 }
0x1200   : > { %v1310_v56 = vpop.permute.xlu2 %1309 }
0x1201   : > { %v1312_v47 = vpop.permute.xlu1 %1311  ;;  %v1315_v51 = vmul.f32 %v1310_v56, %v1258_v40 }
0x1202   : > { %v1316_v43 = vmul.f32 %v1312_v47, %v1273_v44 }
0x1203   : > { %1319 = vrot.lane.b32.xlu2 %v1315_v51, %s1690_s17 }
0x1204   : > { %v1328_v0 = vrot.slane %v1316_v43, 7  ;;  %1321 = vrot.lane.b32.xlu0 %v1316_v43, %s1690_s17 }
0x1206   : > { %1329 = vrot.lane.b32.xlu1 %v1328_v0, %s1690_s17 }
0x1208   : > { %v571_v54 = vpop.permute.xlu2 %570 }
0x1209   : > { %v449_v1 = vpop.permute.xlu1 %448  ;;  %577 = vst.msk [vmem:[%s1766_s16] sm:$0x2] %vm576_vm9, %v571_v54 }
0x120a   : > { %454 = vst.msk [vmem:[%s1766_s16 + $0x8] sm:$0x1] %vm452_vm8, %v449_v1 }
0x120b   : > { %1337 = vrot.lane.b32.xlu2 %v1303_v41, %s1692_s19 }
0x120c   : > { %1339 = vrot.lane.b32.xlu0 %v1336_v59, %s1692_s19 }
0x1210   : > { %v697_v2 = vpop.permute.xlu2 %696 }
0x1211   : > { %v695_v3 = vpop.permute.xlu1 %694  ;;  %702 = vst.msk [vmem:[%s1766_s16 + $0x8] sm:$0x4] %vm700_vm14, %v697_v2 }
0x1212   : > { %701 = vst.msk [vmem:[%s1766_s16] sm:$0x4] %vm700_vm14, %v695_v3 }
0x1218   : > { %v945_v5 = vpop.permute.xlu2 %944 }
0x1219   : > { %v822_v6 = vpop.permute.xlu1 %821  ;;  %951 = vst.msk [vmem:[%s1766_s16] sm:$0x10] %vm950_vm12, %v945_v5 }
0x121a   : > { %827 = vst.msk [vmem:[%s1766_s16 + $0x8] sm:$0x8] %vm825_vm11, %v822_v6 }
0x1220   : > { %v1072_v8 = vpop.permute.xlu2 %1071 }
0x1221   : > { %v1070_v9 = vpop.permute.xlu1 %1069  ;;  %1077 = vst.msk [vmem:[%s1766_s16 + $0x8] sm:$0x20] %vm1075_vm15, %v1072_v8 }
0x1222   : > { %1076 = vst.msk [vmem:[%s1766_s16] sm:$0x20] %vm1075_vm15, %v1070_v9 }
0x1229   : > { %v1197_v10 = vpop.permute.xlu1 %1196 }
0x122a   : > { %1202 = vst.msk [vmem:[%s1766_s16 + $0x8] sm:$0x40] %vm1200_vm13, %v1197_v10 }
0x125d   : > { %v1320_v11 = vpop.permute.xlu2 %1319 }
0x125e   : > { %1326 = vst.msk [vmem:[%s1766_s16] sm:$0x80] %vm1325_vm0, %v1320_v11 }
0x125f   : > { %1332 = vst.msk [vmem:[#allocation2 - $0x7] sm:$0x80] %vm1325_vm0, %v1320_v11 }
0x1265   : > { %v1338_v12 = vpop.permute.xlu2 %1337 }
0x1266   : > { %1343 = vst.msk [vmem:[#allocation3 - $0x7] sm:$0x80] %vm1325_vm0, %v1338_v12 }
0x1276   : > { %v1322_v13 = vpop.permute.xlu0 %1321 }
0x1277   : > { %1327 = vst.msk [vmem:[%s1766_s16 + $0x8] sm:$0x80] %vm1325_vm0, %v1322_v13 }
0x1278   : > { %v1330_v14 = vpop.permute.xlu1 %1329 }
0x1279   : > { %1333 = vst.msk [vmem:[#allocation2 + $0x1] sm:$0x1] %vm452_vm8, %v1330_v14 }
0x127b   : > { %1348 = sbr.rel (%p1503_p11) target bundleno = 4740 (0x1284), region = 82 }
0x127e   : > { %v1340_v15 = vpop.permute.xlu0 %1339 }
0x127f   : > { %1344 = vst.msk [vmem:[#allocation3 + $0x1] sm:$0x1] %vm452_vm8, %v1340_v15 }
0x1280   : > { %1349 = vst.msk [vmem:[%s2095_s5 - $0x7] sm:$0x80] %vm1325_vm0, %v1320_v11 }
0x1281   : > { %1350 = vst.msk [vmem:[%s2095_s5 + $0x1] sm:$0x1] %vm452_vm8, %v1330_v14 }
0x1282   : > { %1351 = vst.msk [vmem:[%s2096_s6 - $0x7] sm:$0x80] %vm1325_vm0, %v1338_v12 }
0x1283   : > { %1352 = vst.msk [vmem:[%s2096_s6 + $0x1] sm:$0x1] %vm452_vm8, %v1340_v15 }
0x1284 PF: > { %1359 = sbr.rel (!%p1753_p5) target bundleno = 4745 (0x1289), region = 86  ;;  %s1505_s9 = sshll.u32 (%p1753_p5), %s1741_s24, 3  ;;  %v1392_v16 = vld [vmem:[%s1766_s16] sm:$0xff] (%p1753_p5)  ;;  %v1394_v17 = vld [vmem:[%s1766_s16 + $0x8] sm:$0xff] (%p1753_p5) }
0x1285   : > { %s1361_s12 = scalar_lea.vmem (%p1753_p5), %s2094_s4, %s1505_s9 }
0x1286   : > { %1393 = vst [vmem:[%s1361_s12] sm:$0xff] (%p1753_p5), %v1392_v16 }
0x1287   : > { %1395 = vst [vmem:[%s1361_s12 + $0x10] sm:$0xff] (%p1753_p5), %v1394_v17 }
0x1289 PF: > { %p14_p12 = scmp.ge.s32.totalorder %s1743_s25, 4   ;;  %s2098_s21 = smov %s1683_s22 }
0x128a   : > { %s2099_s22 = smov %s1751_s28  ;;  %s2100_s23 = smov %s1743_s25 }
0x128b   :  { %16 = sbr.rel (!%p14_p12) target bundleno = 2 (0x2), region = 171 }

</bundles_post_ra>
